<compile_context>
chip_gen: v7x
topology: tpu7x:2x2x1
jax: 0.10.0
libtpu: 0.0.40
codegen_flags: <defaults>
</compile_context>

<pallas_src>
import functools

import jax
import jax.numpy as jnp
from jax import lax
from jax.experimental import pallas as pl
from jax.experimental.pallas import tpu as pltpu

EPS = 1e-5
VMEM_SPEC = pl.BlockSpec(memory_space=pltpu.MemorySpace.VMEM)
SMEM_SPEC = pl.BlockSpec(memory_space=pltpu.MemorySpace.SMEM)

# MXU-native products (single bf16 pass, f32 accumulation).
_dot = functools.partial(
    jnp.dot,
    preferred_element_type=jnp.float32,
    precision=lax.Precision.DEFAULT,
)


def _round_up(a, b):
    return (a + b - 1) // b * b


# ---------------------------------------------------------------------------
# Fused DCBlock kernel.
#
# Layout: channel-major slab (C, H*N*W); lane index r = h*(N*W) + n*W + w.
# A height shift by dh is a lane shift by dh*M (M = N*W), so every conv tap is
# a row-slice of one fused matmul accumulated into a lane sub-window.
# ---------------------------------------------------------------------------
def _dcblock_kernel(*refs, H, H1, M, HM, HM1, HMp, Cin_pad, G, Cout, KH, pad,
                    depth, C_tot):
    x_ref = refs[0]
    wd_refs = refs[1:1 + depth]
    (wg_ref, gd_ref, bd_ref, b1_ref, b2_ref, gg_ref, bg_ref,
     alpha_ref) = refs[1 + depth:9 + depth]
    oe_ref = refs[9 + depth]
    oo_ref = refs[10 + depth]
    sc_ref = refs[11 + depth]     # resident skip-cat slab (C_tot, HMp) f32
    mm_ref = refs[12 + depth]     # fused tap-matmul landing pad

    G2 = 2 * Cout

    lane = lax.broadcasted_iota(jnp.int32, (1, HMp), 1)
    valid = lane < HM        # positions kept in the slab / final output (h < H)
    valid1 = lane < HM1      # dense-conv output positions seen by BN (h < H1)

    def sigmoid(v):
        # tanh form keeps the transcendental on the EUP (no VALU divide).
        return 0.5 * (jnp.tanh(0.5 * v) + 1.0)

    # --- stage the (channel / lane padded) input into the resident slab -----
    sc_ref[0:Cin_pad, :] = x_ref[...]

    # ----------------------- dense Conv -> BN -> PReLU ----------------------
    inv_n1 = 1.0 / float(HM1)
    for l in range(depth):
        K_l = Cin_pad + l * G
        # All KH height taps fused into one MXU matmul (row kh*G + g holds tap
        # kh of output channel g); contract only the slab rows populated so far.
        mm_ref[0:KH * G, :] = _dot(wd_refs[l][...], sc_ref[0:K_l, :])
        # Accumulate the shifted taps into the centre tap's rows.  The static
        # lane-window bounds realise the height-boundary masking; the lane
        # offset (off*M) realises the height shift.  Zero lane padding in the
        # slab keeps every untouched lane of the accumulator exactly zero.
        base = pad * G
        for kh in range(KH):
            off = kh - pad
            if off == 0:
                continue
            a = max(0, -off) * M
            b = min(H1, H - off) * M
            if b <= a:
                continue
            mm_ref[base:base + G, a:b] += (
                mm_ref[kh * G:kh * G + G, a + off * M:b + off * M])
        acc = mm_ref[base:base + G, :]

        # Conv bias omitted: a per-channel constant cancels exactly under the
        # train-mode BatchNorm that follows.  BN statistics cover the FULL
        # conv output (H1 rows); the slice to H rows happens after BN+PReLU,
        # matching the PyTorch module.
        mean = jnp.sum(acc, axis=1, keepdims=True) * inv_n1   # pad lanes are 0
        d = jnp.where(valid1, acc - mean, 0.0)
        var = jnp.sum(d * d, axis=1, keepdims=True) * inv_n1
        scale = gd_ref[l] * lax.rsqrt(var + EPS)
        shift = bd_ref[l] - scale * mean
        z = acc * scale + shift
        alpha = alpha_ref[l]
        y = jnp.where(z >= 0.0, z, alpha * z)

        # Slice to H rows and keep the zero lane-padding invariant of the slab.
        c0 = Cin_pad + l * G
        sc_ref[c0:c0 + G, :] = jnp.where(valid, y, 0.0)

    # -------------- gated ConvTranspose2d -> BatchNorm -> PReLU -------------
    # k=(4,1), stride=(2,1), pad=(1,0) -> output height 2*H:
    #   even rows oh=2i   : tap1 @ x[i] + tap3 @ x[i-1]
    #   odd  rows oh=2i+1 : tap2 @ x[i] + tap0 @ x[i+1]
    # Both branches (value, gate) and all KH taps fused into one matmul; the
    # shifted taps are added as lane sub-window accumulates (boundary rows get
    # no contribution, exactly like the transposed conv).
    mm_ref[0:KH * G2, :] = _dot(wg_ref[...], sc_ref[...])
    mm_ref[G2:2 * G2, M:HM] += mm_ref[3 * G2:4 * G2, 0:HM - M]
    mm_ref[2 * G2:3 * G2, 0:HM - M] += mm_ref[0:G2, M:HM]

    b1 = b1_ref[...]
    b2 = b2_ref[...]
    ge = (mm_ref[G2:G2 + Cout, :] + b1) * sigmoid(
        mm_ref[G2 + Cout:2 * G2, :] + b2)
    oe_ref[...] = ge                                    # pre-BN even rows
    s1 = jnp.sum(jnp.where(valid, ge, 0.0), axis=1, keepdims=True)
    go = (mm_ref[2 * G2:2 * G2 + Cout, :] + b1) * sigmoid(
        mm_ref[2 * G2 + Cout:3 * G2, :] + b2)
    oo_ref[...] = go                                    # pre-BN odd rows
    s1 = s1 + jnp.sum(jnp.where(valid, go, 0.0), axis=1, keepdims=True)

    # BatchNorm over both (even/odd) output halves together (2*H rows).
    inv_n2 = 1.0 / float(2 * HM)
    mean = s1 * inv_n2
    de = jnp.where(valid, oe_ref[...] - mean, 0.0)
    v1 = jnp.sum(de * de, axis=1, keepdims=True)
    do = jnp.where(valid, oo_ref[...] - mean, 0.0)
    v1 = v1 + jnp.sum(do * do, axis=1, keepdims=True)
    var = v1 * inv_n2

    scale = gg_ref[...] * lax.rsqrt(var + EPS)
    shift = bg_ref[...] - scale * mean
    alpha = alpha_ref[depth]
    ze = oe_ref[...] * scale + shift
    oe_ref[...] = jnp.where(ze >= 0.0, ze, alpha * ze)
    zo = oo_ref[...] * scale + shift
    oo_ref[...] = jnp.where(zo >= 0.0, zo, alpha * zo)


# ---------------------------------------------------------------------------
# Wrapper: NCHW in -> NCHW out (encode=False path: ConvTranspose, 2x height).
# ---------------------------------------------------------------------------
def dcblock_forward(x_nchw, dense_params, gated_params):
    N, Cin, H, W = x_nchw.shape
    M = N * W
    HM = H * M
    depth = len(dense_params)
    KH = dense_params[0][0].shape[0]
    pad = KH // 2
    G = dense_params[0][0].shape[-1]
    Cin_pad = _round_up(Cin, 8)                  # keep slab row-writes 8-aligned
    C_tot = Cin_pad + depth * G
    H1 = H + 2 * pad - KH + 1                    # dense conv output height
    HM1 = H1 * M
    HMp = _round_up(max(HM1, HM), 128)           # lane padding (kept zero)

    w1, b1, w2, b2, gamma_o, beta_o, alpha_o = gated_params
    Cout = w1.shape[-1]
    f32 = jnp.float32

    # Channel-major slab: rows = channels, lanes = flattened (h, n, w).
    x2 = jnp.transpose(x_nchw, (1, 2, 0, 3)).reshape(Cin, HM).astype(f32)
    x2 = jnp.pad(x2, ((0, Cin_pad - Cin), (0, HMp - HM)))

    def remap_cols(wt, k_cols):
        # wt: (rows, C_l) with channel order [orig Cin | grown]; embed the
        # columns into the slab channel order (input channels padded to
        # Cin_pad) truncated to the k_cols slab rows populated at this point.
        C_l = wt.shape[-1]
        out = jnp.zeros(wt.shape[:-1] + (k_cols,), f32)
        out = out.at[..., :Cin].set(wt[..., :Cin])
        if C_l > Cin:
            out = out.at[..., Cin_pad:Cin_pad + (C_l - Cin)].set(wt[..., Cin:])
        return out

    # Dense layer l: (KH, C_l, G) -> (KH*G, K_l), all taps stacked along rows.
    wd_list = []
    for l, (w, _b, _g, _bt, _a) in enumerate(dense_params):
        wt = jnp.transpose(w, (0, 2, 1)).reshape(KH * G, -1).astype(f32)
        wd_list.append(remap_cols(wt, Cin_pad + l * G))

    gd = jnp.stack([g.astype(f32).reshape(G, 1)
                    for (_w, _b, g, _bt, _a) in dense_params])
    bd = jnp.stack([bt.astype(f32).reshape(G, 1)
                    for (_w, _b, _g, bt, _a) in dense_params])
    alphas = jnp.concatenate(
        [a.astype(f32).reshape(1) for (_w, _b, _g, _bt, a) in dense_params]
        + [alpha_o.astype(f32).reshape(1)])                       # (depth+1,)

    # Gate: both ConvTranspose branches and all KH taps fused into one weight;
    # rows [kh*2C : kh*2C+C] = conv1 tap kh, rows [kh*2C+C : (kh+1)*2C] = conv2.
    wg = jnp.concatenate(
        [jnp.concatenate([jnp.transpose(w1[kh], (1, 0)),
                          jnp.transpose(w2[kh], (1, 0))], axis=0)
         for kh in range(KH)], axis=0).astype(f32)                # (KH*2C, C_l)
    wg = remap_cols(wg, C_tot)

    kern = functools.partial(
        _dcblock_kernel, H=H, H1=H1, M=M, HM=HM, HM1=HM1, HMp=HMp,
        Cin_pad=Cin_pad, G=G, Cout=Cout, KH=KH, pad=pad, depth=depth,
        C_tot=C_tot)

    n_in = 1 + depth + 8
    oe, oo = pl.pallas_call(
        kern,
        out_shape=(jax.ShapeDtypeStruct((Cout, HMp), f32),
                   jax.ShapeDtypeStruct((Cout, HMp), f32)),
        in_specs=[VMEM_SPEC] * (n_in - 1) + [SMEM_SPEC],
        out_specs=(VMEM_SPEC, VMEM_SPEC),
        scratch_shapes=[
            pltpu.VMEM((C_tot, HMp), f32),                     # skip-cat slab
            pltpu.VMEM((KH * max(G, 2 * Cout), HMp), f32),     # fused tap matmuls
        ],
        compiler_params=pltpu.CompilerParams(
            vmem_limit_bytes=32 * 1024 * 1024),
    )(x2, *wd_list, wg, gd, bd,
      b1.astype(f32).reshape(Cout, 1), b2.astype(f32).reshape(Cout, 1),
      gamma_o.astype(f32).reshape(Cout, 1), beta_o.astype(f32).reshape(Cout, 1),
      alphas)

    # Interleave even/odd output rows and return NCHW.
    oe = oe[:, :HM].reshape(Cout, H, N, W)
    oo = oo[:, :HM].reshape(Cout, H, N, W)
    out = jnp.stack([oe, oo], axis=2).reshape(Cout, 2 * H, N, W)
    return jnp.transpose(out, (2, 0, 1, 3))       # -> (N, Cout, 2H, W)


# ---------------------------------------------------------------------------
# Pure-JAX (XLA) reference mirroring the PyTorch semantics, for self-check.
# ---------------------------------------------------------------------------
def ref_dcblock(x, dense_params, gated_params):
    H = x.shape[2]
    skip = x
    out = x
    for (w, b, gamma, beta, alpha) in dense_params:
        pad = w.shape[0] // 2
        w_oihw = jnp.transpose(w, (2, 1, 0))[:, :, :, None]   # (G, Cin, KH, 1)
        y = lax.conv_general_dilated(out, w_oihw, (1, 1), ((pad, pad), (0, 0)),
                                     dimension_numbers=("NCHW", "OIHW", "NCHW"),
                                     precision=lax.Precision.HIGHEST)
        y = y + b[None, :, None, None]
        # BatchNorm + PReLU on the FULL conv output, then slice (as in PyTorch).
        mean = jnp.mean(y, axis=(0, 2, 3), keepdims=True)
        var = jnp.mean(jnp.square(y - mean), axis=(0, 2, 3), keepdims=True)
        y = (gamma[None, :, None, None] * (y - mean) * lax.rsqrt(var + EPS)
             + beta[None, :, None, None])
        y = jnp.where(y >= 0, y, alpha[0] * y)
        y = y[:, :, :H, :]
        out = jnp.concatenate([skip, y], axis=1)
        skip = out

    (w1, b1, w2, b2, gamma, beta, alpha) = gated_params

    def tconv(xx, w, b):  # ConvTranspose2d k=(4,1) stride=(2,1) pad=(1,0)
        KH = w.shape[0]
        w_oihw = jnp.transpose(w, (2, 1, 0))[:, :, ::-1][:, :, :, None]
        y = lax.conv_general_dilated(xx, w_oihw, (1, 1),
                                     ((KH - 1 - 1, KH - 1 - 1), (0, 0)),
                                     lhs_dilation=(2, 1),
                                     dimension_numbers=("NCHW", "OIHW", "NCHW"),
                                     precision=lax.Precision.HIGHEST)
        return y + b[None, :, None, None]

    y = tconv(out, w1, b1) * jax.nn.sigmoid(tconv(out, w2, b2))
    mean = jnp.mean(y, axis=(0, 2, 3), keepdims=True)
    var = jnp.mean(jnp.square(y - mean), axis=(0, 2, 3), keepdims=True)
    y = (gamma[None, :, None, None] * (y - mean) * lax.rsqrt(var + EPS)
         + beta[None, :, None, None])
    y = jnp.where(y >= 0, y, alpha[0] * y)
    return y


if __name__ == "__main__":
    # Small shapes consistent with DCBlock defaults (W chosen so N*W = 128
    # lanes -> every height-tap lane window is vreg-aligned).
    N, Cin, H, W = 2, 4, 16, 64
    depth, G, Cout, KH = 4, 8, 8, 4

    key = jax.random.PRNGKey(0)
    keys = jax.random.split(key, depth * 4 + 7)

    def nrm(k, shape, s=0.3):
        return (s * jax.random.normal(k, shape)).astype(jnp.float32)

    ki = 0
    dense_params = []
    ch = Cin
    for _ in range(depth):
        w = nrm(keys[ki], (KH, ch, G)); ki += 1          # (KH, Cin, G)
        b = nrm(keys[ki], (G,), 0.1); ki += 1
        gamma = 1.0 + nrm(keys[ki], (G,), 0.1); ki += 1
        beta = nrm(keys[ki], (G,), 0.1); ki += 1
        alpha = jnp.full((1,), 0.25, jnp.float32)        # PReLU init
        dense_params.append((w, b, gamma, beta, alpha))
        ch += G

    w1 = nrm(keys[ki], (KH, ch, Cout)); ki += 1          # ConvTranspose (KH, Cin, Cout)
    b1 = nrm(keys[ki], (Cout,), 0.1); ki += 1
    w2 = nrm(keys[ki], (KH, ch, Cout)); ki += 1
    b2 = nrm(keys[ki], (Cout,), 0.1); ki += 1
    gamma_o = 1.0 + nrm(keys[ki], (Cout,), 0.1); ki += 1
    beta_o = nrm(keys[ki], (Cout,), 0.1); ki += 1
    alpha_o = jnp.full((1,), 0.25, jnp.float32)
    gated_params = (w1, b1, w2, b2, gamma_o, beta_o, alpha_o)

    x = jax.random.normal(keys[ki], (N, Cin, H, W), jnp.float32)

    fwd = jax.jit(dcblock_forward)
    out = jax.block_until_ready(fwd(x, dense_params, gated_params))
    assert out.shape == (N, Cout, 2 * H, W), out.shape

    ref = jax.block_until_ready(ref_dcblock(x, dense_params, gated_params))

    # Kernel matmuls use MXU-native (bf16 x bf16 -> f32) products; the XLA
    # reference runs at HIGHEST precision, so tolerances allow bf16 rounding.
    max_err = float(jnp.max(jnp.abs(out - ref)))
    rel_err = float(jnp.linalg.norm(out - ref)
                    / (float(jnp.linalg.norm(ref)) + 1e-12))
    assert max_err < 7.5e-2 and rel_err < 1.5e-2, (max_err, rel_err)

    print("KERNEL_OK")
</pallas_src>

<mosaic_0001>
module attributes {stable_mosaic.version = 11 : i64} {
  func.func @_dcblock_kernel(%arg0: memref<8x2176xf32, #tpu.memory_space<vmem>>, %arg1: memref<32x8xf32, #tpu.memory_space<vmem>>, %arg2: memref<32x16xf32, #tpu.memory_space<vmem>>, %arg3: memref<32x24xf32, #tpu.memory_space<vmem>>, %arg4: memref<32x32xf32, #tpu.memory_space<vmem>>, %arg5: memref<64x40xf32, #tpu.memory_space<vmem>>, %arg6: memref<4x8x1xf32, #tpu.memory_space<vmem>>, %arg7: memref<4x8x1xf32, #tpu.memory_space<vmem>>, %arg8: memref<8x1xf32, #tpu.memory_space<vmem>>, %arg9: memref<8x1xf32, #tpu.memory_space<vmem>>, %arg10: memref<8x1xf32, #tpu.memory_space<vmem>>, %arg11: memref<8x1xf32, #tpu.memory_space<vmem>>, %arg12: memref<5xf32, #tpu.memory_space<smem>>, %arg13: memref<8x2176xf32, #tpu.memory_space<vmem>>, %arg14: memref<8x2176xf32, #tpu.memory_space<vmem>>, %arg15: memref<40x2176xf32, #tpu.memory_space<vmem>>, %arg16: memref<64x2176xf32, #tpu.memory_space<vmem>>) attributes {dimension_semantics = [], scalar_prefetch = 0 : i64, scratch_operands = 2 : i64, tpu.core_type = #tpu.core_type<tc>} {
    %0 = tpu.iota {dimensions = array<i32: 1>} : vector<1x2176xi32>
    %c2048_i32 = arith.constant 2048 : i32
    %1 = vector.broadcast %c2048_i32 : i32 to vector<1x2176xi32>
    %2 = arith.cmpi slt, %0, %1 : vector<1x2176xi32>
    %c2176_i32 = arith.constant 2176 : i32
    %3 = vector.broadcast %c2176_i32 : i32 to vector<1x2176xi32>
    %4 = arith.cmpi slt, %0, %3 : vector<1x2176xi32>
    %c0 = arith.constant 0 : index
    %c0_0 = arith.constant 0 : index
    %5 = vector.load %arg0[%c0, %c0_0] : memref<8x2176xf32, #tpu.memory_space<vmem>>, vector<8x2176xf32>
    %c0_1 = arith.constant 0 : index
    %c0_2 = arith.constant 0 : index
    %6 = vector.load %arg15[%c0_1, %c0_2] : memref<40x2176xf32, #tpu.memory_space<vmem>>, vector<8x2176xf32>
    tpu.vector_store %arg15[%c0_1, %c0_2], %5 {strides = array<i32>} : memref<40x2176xf32, #tpu.memory_space<vmem>>, vector<8x2176xf32>,
    %c0_3 = arith.constant 0 : index
    %c0_4 = arith.constant 0 : index
    %7 = vector.load %arg1[%c0_3, %c0_4] : memref<32x8xf32, #tpu.memory_space<vmem>>, vector<32x8xf32>
    %c0_5 = arith.constant 0 : index
    %c0_6 = arith.constant 0 : index
    %8 = vector.load %arg15[%c0_5, %c0_6] : memref<40x2176xf32, #tpu.memory_space<vmem>>, vector<8x2176xf32>
    %cst = arith.constant dense<0.000000e+00> : vector<32x2176xf32>
    %9 = tpu.matmul %7, %8, %cst {dimension_numbers = #tpu.dot_dimension_numbers<[1], [0], [0], [1], [0, 0, 1, 1], [], []>} : vector<32x8xf32>, vector<8x2176xf32>, vector<32x2176xf32> -> vector<32x2176xf32>
    %c0_7 = arith.constant 0 : index
    %c0_8 = arith.constant 0 : index
    %10 = vector.load %arg16[%c0_7, %c0_8] : memref<64x2176xf32, #tpu.memory_space<vmem>>, vector<32x2176xf32>
    tpu.vector_store %arg16[%c0_7, %c0_8], %9 {strides = array<i32>} : memref<64x2176xf32, #tpu.memory_space<vmem>>, vector<32x2176xf32>,
    %c16 = arith.constant 16 : index
    %c256 = arith.constant 256 : index
    %11 = vector.load %arg16[%c16, %c256] : memref<64x2176xf32, #tpu.memory_space<vmem>>, vector<8x1920xf32>
    %c0_9 = arith.constant 0 : index
    %c0_10 = arith.constant 0 : index
    %12 = vector.load %arg16[%c0_9, %c0_10] : memref<64x2176xf32, #tpu.memory_space<vmem>>, vector<8x1920xf32>
    %13 = arith.addf %11, %12 : vector<8x1920xf32>
    %c16_11 = arith.constant 16 : index
    %c256_12 = arith.constant 256 : index
    %14 = vector.load %arg16[%c16_11, %c256_12] : memref<64x2176xf32, #tpu.memory_space<vmem>>, vector<8x1920xf32>
    tpu.vector_store %arg16[%c16_11, %c256_12], %13 {strides = array<i32>} : memref<64x2176xf32, #tpu.memory_space<vmem>>, vector<8x1920xf32>,
    %c16_13 = arith.constant 16 : index
    %c128 = arith.constant 128 : index
    %15 = vector.load %arg16[%c16_13, %c128] : memref<64x2176xf32, #tpu.memory_space<vmem>>, vector<8x2048xf32>
    %c8 = arith.constant 8 : index
    %c0_14 = arith.constant 0 : index
    %16 = vector.load %arg16[%c8, %c0_14] : memref<64x2176xf32, #tpu.memory_space<vmem>>, vector<8x2048xf32>
    %17 = arith.addf %15, %16 : vector<8x2048xf32>
    %c16_15 = arith.constant 16 : index
    %c128_16 = arith.constant 128 : index
    %18 = vector.load %arg16[%c16_15, %c128_16] : memref<64x2176xf32, #tpu.memory_space<vmem>>, vector<8x2048xf32>
    tpu.vector_store %arg16[%c16_15, %c128_16], %17 {strides = array<i32>} : memref<64x2176xf32, #tpu.memory_space<vmem>>, vector<8x2048xf32>,
    %c16_17 = arith.constant 16 : index
    %c0_18 = arith.constant 0 : index
    %19 = vector.load %arg16[%c16_17, %c0_18] : memref<64x2176xf32, #tpu.memory_space<vmem>>, vector<8x1920xf32>
    %c24 = arith.constant 24 : index
    %c128_19 = arith.constant 128 : index
    %20 = vector.load %arg16[%c24, %c128_19] : memref<64x2176xf32, #tpu.memory_space<vmem>>, vector<8x1920xf32>
    %21 = arith.addf %19, %20 : vector<8x1920xf32>
    %c16_20 = arith.constant 16 : index
    %c0_21 = arith.constant 0 : index
    %22 = vector.load %arg16[%c16_20, %c0_21] : memref<64x2176xf32, #tpu.memory_space<vmem>>, vector<8x1920xf32>
    tpu.vector_store %arg16[%c16_20, %c0_21], %21 {strides = array<i32>} : memref<64x2176xf32, #tpu.memory_space<vmem>>, vector<8x1920xf32>,
    %c16_22 = arith.constant 16 : index
    %c0_23 = arith.constant 0 : index
    %23 = vector.load %arg16[%c16_22, %c0_23] : memref<64x2176xf32, #tpu.memory_space<vmem>>, vector<8x2176xf32>
    %cst_24 = arith.constant dense<0.000000e+00> : vector<8xf32>
    %24 = vector.multi_reduction <add>, %23, %cst_24 [1] : vector<8x2176xf32> to vector<8xf32>
    %25 = vector.shape_cast %24 : vector<8xf32> to vector<8x1xf32>
    %cst_25 = arith.constant 4.59558825E-4 : f32
    %26 = vector.broadcast %cst_25 : f32 to vector<8x1xf32>
    %27 = arith.mulf %25, %26 : vector<8x1xf32>
    %28 = vector.broadcast %27 : vector<8x1xf32> to vector<8x2176xf32>
    %29 = arith.subf %23, %28 : vector<8x2176xf32>
    %cst_26 = arith.constant 0.000000e+00 : f32
    %30 = vector.shape_cast %4 : vector<1x2176xi1> to vector<1x2176xi1>
    %31 = vector.broadcast %30 : vector<1x2176xi1> to vector<8x2176xi1>
    %32 = vector.broadcast %cst_26 : f32 to vector<8x2176xf32>
    %33 = arith.select %31, %29, %32 : vector<8x2176xi1>, vector<8x2176xf32>
    %34 = arith.mulf %33, %33 : vector<8x2176xf32>
    %cst_27 = arith.constant dense<0.000000e+00> : vector<8xf32>
    %35 = vector.multi_reduction <add>, %34, %cst_27 [1] : vector<8x2176xf32> to vector<8xf32>
    %36 = vector.shape_cast %35 : vector<8xf32> to vector<8x1xf32>
    %cst_28 = arith.constant 4.59558825E-4 : f32
    %37 = vector.broadcast %cst_28 : f32 to vector<8x1xf32>
    %38 = arith.mulf %36, %37 : vector<8x1xf32>
    %c0_29 = arith.constant 0 : index
    %c0_30 = arith.constant 0 : index
    %c0_31 = arith.constant 0 : index
    %39 = vector.load %arg6[%c0_29, %c0_30, %c0_31] : memref<4x8x1xf32, #tpu.memory_space<vmem>>, vector<1x8x1xf32>
    %40 = vector.shape_cast %39 : vector<1x8x1xf32> to vector<8x1xf32>
    %cst_32 = arith.constant 9.99999974E-6 : f32
    %41 = vector.broadcast %cst_32 : f32 to vector<8x1xf32>
    %42 = arith.addf %38, %41 : vector<8x1xf32>
    %43 = math.rsqrt %42 : vector<8x1xf32>
    %44 = arith.mulf %40, %43 : vector<8x1xf32>
    %c0_33 = arith.constant 0 : index
    %c0_34 = arith.constant 0 : index
    %c0_35 = arith.constant 0 : index
    %45 = vector.load %arg7[%c0_33, %c0_34, %c0_35] : memref<4x8x1xf32, #tpu.memory_space<vmem>>, vector<1x8x1xf32>
    %46 = vector.shape_cast %45 : vector<1x8x1xf32> to vector<8x1xf32>
    %47 = arith.mulf %44, %27 : vector<8x1xf32>
    %48 = arith.subf %46, %47 : vector<8x1xf32>
    %49 = vector.broadcast %44 : vector<8x1xf32> to vector<8x2176xf32>
    %50 = arith.mulf %23, %49 : vector<8x2176xf32>
    %51 = vector.broadcast %48 : vector<8x1xf32> to vector<8x2176xf32>
    %52 = arith.addf %50, %51 : vector<8x2176xf32>
    %c0_36 = arith.constant 0 : index
    %53 = memref.load %arg12[%c0_36] : memref<5xf32, #tpu.memory_space<smem>>
    %cst_37 = arith.constant 0.000000e+00 : f32
    %54 = vector.broadcast %cst_37 : f32 to vector<8x2176xf32>
    %55 = arith.cmpf oge, %52, %54 : vector<8x2176xf32>
    %56 = vector.broadcast %53 : f32 to vector<8x2176xf32>
    %57 = arith.mulf %56, %52 : vector<8x2176xf32>
    %58 = arith.select %55, %52, %57 : vector<8x2176xi1>, vector<8x2176xf32>
    %cst_38 = arith.constant 0.000000e+00 : f32
    %59 = vector.shape_cast %2 : vector<1x2176xi1> to vector<1x2176xi1>
    %60 = vector.broadcast %59 : vector<1x2176xi1> to vector<8x2176xi1>
    %61 = vector.broadcast %cst_38 : f32 to vector<8x2176xf32>
    %62 = arith.select %60, %58, %61 : vector<8x2176xi1>, vector<8x2176xf32>
    %c8_39 = arith.constant 8 : index
    %c0_40 = arith.constant 0 : index
    %63 = vector.load %arg15[%c8_39, %c0_40] : memref<40x2176xf32, #tpu.memory_space<vmem>>, vector<8x2176xf32>
    tpu.vector_store %arg15[%c8_39, %c0_40], %62 {strides = array<i32>} : memref<40x2176xf32, #tpu.memory_space<vmem>>, vector<8x2176xf32>,
    %c0_41 = arith.constant 0 : index
    %c0_42 = arith.constant 0 : index
    %64 = vector.load %arg2[%c0_41, %c0_42] : memref<32x16xf32, #tpu.memory_space<vmem>>, vector<32x16xf32>
    %c0_43 = arith.constant 0 : index
    %c0_44 = arith.constant 0 : index
    %65 = vector.load %arg15[%c0_43, %c0_44] : memref<40x2176xf32, #tpu.memory_space<vmem>>, vector<16x2176xf32>
    %cst_45 = arith.constant dense<0.000000e+00> : vector<32x2176xf32>
    %66 = tpu.matmul %64, %65, %cst_45 {dimension_numbers = #tpu.dot_dimension_numbers<[1], [0], [0], [1], [0, 0, 1, 1], [], []>} : vector<32x16xf32>, vector<16x2176xf32>, vector<32x2176xf32> -> vector<32x2176xf32>
    %c0_46 = arith.constant 0 : index
    %c0_47 = arith.constant 0 : index
    %67 = vector.load %arg16[%c0_46, %c0_47] : memref<64x2176xf32, #tpu.memory_space<vmem>>, vector<32x2176xf32>
    tpu.vector_store %arg16[%c0_46, %c0_47], %66 {strides = array<i32>} : memref<64x2176xf32, #tpu.memory_space<vmem>>, vector<32x2176xf32>,
    %c16_48 = arith.constant 16 : index
    %c256_49 = arith.constant 256 : index
    %68 = vector.load %arg16[%c16_48, %c256_49] : memref<64x2176xf32, #tpu.memory_space<vmem>>, vector<8x1920xf32>
    %c0_50 = arith.constant 0 : index
    %c0_51 = arith.constant 0 : index
    %69 = vector.load %arg16[%c0_50, %c0_51] : memref<64x2176xf32, #tpu.memory_space<vmem>>, vector<8x1920xf32>
    %70 = arith.addf %68, %69 : vector<8x1920xf32>
    %c16_52 = arith.constant 16 : index
    %c256_53 = arith.constant 256 : index
    %71 = vector.load %arg16[%c16_52, %c256_53] : memref<64x2176xf32, #tpu.memory_space<vmem>>, vector<8x1920xf32>
    tpu.vector_store %arg16[%c16_52, %c256_53], %70 {strides = array<i32>} : memref<64x2176xf32, #tpu.memory_space<vmem>>, vector<8x1920xf32>,
    %c16_54 = arith.constant 16 : index
    %c128_55 = arith.constant 128 : index
    %72 = vector.load %arg16[%c16_54, %c128_55] : memref<64x2176xf32, #tpu.memory_space<vmem>>, vector<8x2048xf32>
    %c8_56 = arith.constant 8 : index
    %c0_57 = arith.constant 0 : index
    %73 = vector.load %arg16[%c8_56, %c0_57] : memref<64x2176xf32, #tpu.memory_space<vmem>>, vector<8x2048xf32>
    %74 = arith.addf %72, %73 : vector<8x2048xf32>
    %c16_58 = arith.constant 16 : index
    %c128_59 = arith.constant 128 : index
    %75 = vector.load %arg16[%c16_58, %c128_59] : memref<64x2176xf32, #tpu.memory_space<vmem>>, vector<8x2048xf32>
    tpu.vector_store %arg16[%c16_58, %c128_59], %74 {strides = array<i32>} : memref<64x2176xf32, #tpu.memory_space<vmem>>, vector<8x2048xf32>,
    %c16_60 = arith.constant 16 : index
    %c0_61 = arith.constant 0 : index
    %76 = vector.load %arg16[%c16_60, %c0_61] : memref<64x2176xf32, #tpu.memory_space<vmem>>, vector<8x1920xf32>
    %c24_62 = arith.constant 24 : index
    %c128_63 = arith.constant 128 : index
    %77 = vector.load %arg16[%c24_62, %c128_63] : memref<64x2176xf32, #tpu.memory_space<vmem>>, vector<8x1920xf32>
    %78 = arith.addf %76, %77 : vector<8x1920xf32>
    %c16_64 = arith.constant 16 : index
    %c0_65 = arith.constant 0 : index
    %79 = vector.load %arg16[%c16_64, %c0_65] : memref<64x2176xf32, #tpu.memory_space<vmem>>, vector<8x1920xf32>
    tpu.vector_store %arg16[%c16_64, %c0_65], %78 {strides = array<i32>} : memref<64x2176xf32, #tpu.memory_space<vmem>>, vector<8x1920xf32>,
    %c16_66 = arith.constant 16 : index
    %c0_67 = arith.constant 0 : index
    %80 = vector.load %arg16[%c16_66, %c0_67] : memref<64x2176xf32, #tpu.memory_space<vmem>>, vector<8x2176xf32>
    %cst_68 = arith.constant dense<0.000000e+00> : vector<8xf32>
    %81 = vector.multi_reduction <add>, %80, %cst_68 [1] : vector<8x2176xf32> to vector<8xf32>
    %82 = vector.shape_cast %81 : vector<8xf32> to vector<8x1xf32>
    %cst_69 = arith.constant 4.59558825E-4 : f32
    %83 = vector.broadcast %cst_69 : f32 to vector<8x1xf32>
    %84 = arith.mulf %82, %83 : vector<8x1xf32>
    %85 = vector.broadcast %84 : vector<8x1xf32> to vector<8x2176xf32>
    %86 = arith.subf %80, %85 : vector<8x2176xf32>
    %cst_70 = arith.constant 0.000000e+00 : f32
    %87 = vector.shape_cast %4 : vector<1x2176xi1> to vector<1x2176xi1>
    %88 = vector.broadcast %87 : vector<1x2176xi1> to vector<8x2176xi1>
    %89 = vector.broadcast %cst_70 : f32 to vector<8x2176xf32>
    %90 = arith.select %88, %86, %89 : vector<8x2176xi1>, vector<8x2176xf32>
    %91 = arith.mulf %90, %90 : vector<8x2176xf32>
    %cst_71 = arith.constant dense<0.000000e+00> : vector<8xf32>
    %92 = vector.multi_reduction <add>, %91, %cst_71 [1] : vector<8x2176xf32> to vector<8xf32>
    %93 = vector.shape_cast %92 : vector<8xf32> to vector<8x1xf32>
    %cst_72 = arith.constant 4.59558825E-4 : f32
    %94 = vector.broadcast %cst_72 : f32 to vector<8x1xf32>
    %95 = arith.mulf %93, %94 : vector<8x1xf32>
    %c1 = arith.constant 1 : index
    %c0_73 = arith.constant 0 : index
    %c0_74 = arith.constant 0 : index
    %96 = vector.load %arg6[%c1, %c0_73, %c0_74] : memref<4x8x1xf32, #tpu.memory_space<vmem>>, vector<1x8x1xf32>
    %97 = vector.shape_cast %96 : vector<1x8x1xf32> to vector<8x1xf32>
    %cst_75 = arith.constant 9.99999974E-6 : f32
    %98 = vector.broadcast %cst_75 : f32 to vector<8x1xf32>
    %99 = arith.addf %95, %98 : vector<8x1xf32>
    %100 = math.rsqrt %99 : vector<8x1xf32>
    %101 = arith.mulf %97, %100 : vector<8x1xf32>
    %c1_76 = arith.constant 1 : index
    %c0_77 = arith.constant 0 : index
    %c0_78 = arith.constant 0 : index
    %102 = vector.load %arg7[%c1_76, %c0_77, %c0_78] : memref<4x8x1xf32, #tpu.memory_space<vmem>>, vector<1x8x1xf32>
    %103 = vector.shape_cast %102 : vector<1x8x1xf32> to vector<8x1xf32>
    %104 = arith.mulf %101, %84 : vector<8x1xf32>
    %105 = arith.subf %103, %104 : vector<8x1xf32>
    %106 = vector.broadcast %101 : vector<8x1xf32> to vector<8x2176xf32>
    %107 = arith.mulf %80, %106 : vector<8x2176xf32>
    %108 = vector.broadcast %105 : vector<8x1xf32> to vector<8x2176xf32>
    %109 = arith.addf %107, %108 : vector<8x2176xf32>
    %c1_79 = arith.constant 1 : index
    %110 = memref.load %arg12[%c1_79] : memref<5xf32, #tpu.memory_space<smem>>
    %cst_80 = arith.constant 0.000000e+00 : f32
    %111 = vector.broadcast %cst_80 : f32 to vector<8x2176xf32>
    %112 = arith.cmpf oge, %109, %111 : vector<8x2176xf32>
    %113 = vector.broadcast %110 : f32 to vector<8x2176xf32>
    %114 = arith.mulf %113, %109 : vector<8x2176xf32>
    %115 = arith.select %112, %109, %114 : vector<8x2176xi1>, vector<8x2176xf32>
    %cst_81 = arith.constant 0.000000e+00 : f32
    %116 = vector.shape_cast %2 : vector<1x2176xi1> to vector<1x2176xi1>
    %117 = vector.broadcast %116 : vector<1x2176xi1> to vector<8x2176xi1>
    %118 = vector.broadcast %cst_81 : f32 to vector<8x2176xf32>
    %119 = arith.select %117, %115, %118 : vector<8x2176xi1>, vector<8x2176xf32>
    %c16_82 = arith.constant 16 : index
    %c0_83 = arith.constant 0 : index
    %120 = vector.load %arg15[%c16_82, %c0_83] : memref<40x2176xf32, #tpu.memory_space<vmem>>, vector<8x2176xf32>
    tpu.vector_store %arg15[%c16_82, %c0_83], %119 {strides = array<i32>} : memref<40x2176xf32, #tpu.memory_space<vmem>>, vector<8x2176xf32>,
    %c0_84 = arith.constant 0 : index
    %c0_85 = arith.constant 0 : index
    %121 = vector.load %arg3[%c0_84, %c0_85] : memref<32x24xf32, #tpu.memory_space<vmem>>, vector<32x24xf32>
    %c0_86 = arith.constant 0 : index
    %c0_87 = arith.constant 0 : index
    %122 = vector.load %arg15[%c0_86, %c0_87] : memref<40x2176xf32, #tpu.memory_space<vmem>>, vector<24x2176xf32>
    %cst_88 = arith.constant dense<0.000000e+00> : vector<32x2176xf32>
    %123 = tpu.matmul %121, %122, %cst_88 {dimension_numbers = #tpu.dot_dimension_numbers<[1], [0], [0], [1], [0, 0, 1, 1], [], []>} : vector<32x24xf32>, vector<24x2176xf32>, vector<32x2176xf32> -> vector<32x2176xf32>
    %c0_89 = arith.constant 0 : index
    %c0_90 = arith.constant 0 : index
    %124 = vector.load %arg16[%c0_89, %c0_90] : memref<64x2176xf32, #tpu.memory_space<vmem>>, vector<32x2176xf32>
    tpu.vector_store %arg16[%c0_89, %c0_90], %123 {strides = array<i32>} : memref<64x2176xf32, #tpu.memory_space<vmem>>, vector<32x2176xf32>,
    %c16_91 = arith.constant 16 : index
    %c256_92 = arith.constant 256 : index
    %125 = vector.load %arg16[%c16_91, %c256_92] : memref<64x2176xf32, #tpu.memory_space<vmem>>, vector<8x1920xf32>
    %c0_93 = arith.constant 0 : index
    %c0_94 = arith.constant 0 : index
    %126 = vector.load %arg16[%c0_93, %c0_94] : memref<64x2176xf32, #tpu.memory_space<vmem>>, vector<8x1920xf32>
    %127 = arith.addf %125, %126 : vector<8x1920xf32>
    %c16_95 = arith.constant 16 : index
    %c256_96 = arith.constant 256 : index
    %128 = vector.load %arg16[%c16_95, %c256_96] : memref<64x2176xf32, #tpu.memory_space<vmem>>, vector<8x1920xf32>
    tpu.vector_store %arg16[%c16_95, %c256_96], %127 {strides = array<i32>} : memref<64x2176xf32, #tpu.memory_space<vmem>>, vector<8x1920xf32>,
    %c16_97 = arith.constant 16 : index
    %c128_98 = arith.constant 128 : index
    %129 = vector.load %arg16[%c16_97, %c128_98] : memref<64x2176xf32, #tpu.memory_space<vmem>>, vector<8x2048xf32>
    %c8_99 = arith.constant 8 : index
    %c0_100 = arith.constant 0 : index
    %130 = vector.load %arg16[%c8_99, %c0_100] : memref<64x2176xf32, #tpu.memory_space<vmem>>, vector<8x2048xf32>
    %131 = arith.addf %129, %130 : vector<8x2048xf32>
    %c16_101 = arith.constant 16 : index
    %c128_102 = arith.constant 128 : index
    %132 = vector.load %arg16[%c16_101, %c128_102] : memref<64x2176xf32, #tpu.memory_space<vmem>>, vector<8x2048xf32>
    tpu.vector_store %arg16[%c16_101, %c128_102], %131 {strides = array<i32>} : memref<64x2176xf32, #tpu.memory_space<vmem>>, vector<8x2048xf32>,
    %c16_103 = arith.constant 16 : index
    %c0_104 = arith.constant 0 : index
    %133 = vector.load %arg16[%c16_103, %c0_104] : memref<64x2176xf32, #tpu.memory_space<vmem>>, vector<8x1920xf32>
    %c24_105 = arith.constant 24 : index
    %c128_106 = arith.constant 128 : index
    %134 = vector.load %arg16[%c24_105, %c128_106] : memref<64x2176xf32, #tpu.memory_space<vmem>>, vector<8x1920xf32>
    %135 = arith.addf %133, %134 : vector<8x1920xf32>
    %c16_107 = arith.constant 16 : index
    %c0_108 = arith.constant 0 : index
    %136 = vector.load %arg16[%c16_107, %c0_108] : memref<64x2176xf32, #tpu.memory_space<vmem>>, vector<8x1920xf32>
    tpu.vector_store %arg16[%c16_107, %c0_108], %135 {strides = array<i32>} : memref<64x2176xf32, #tpu.memory_space<vmem>>, vector<8x1920xf32>,
    %c16_109 = arith.constant 16 : index
    %c0_110 = arith.constant 0 : index
    %137 = vector.load %arg16[%c16_109, %c0_110] : memref<64x2176xf32, #tpu.memory_space<vmem>>, vector<8x2176xf32>
    %cst_111 = arith.constant dense<0.000000e+00> : vector<8xf32>
    %138 = vector.multi_reduction <add>, %137, %cst_111 [1] : vector<8x2176xf32> to vector<8xf32>
    %139 = vector.shape_cast %138 : vector<8xf32> to vector<8x1xf32>
    %cst_112 = arith.constant 4.59558825E-4 : f32
    %140 = vector.broadcast %cst_112 : f32 to vector<8x1xf32>
    %141 = arith.mulf %139, %140 : vector<8x1xf32>
    %142 = vector.broadcast %141 : vector<8x1xf32> to vector<8x2176xf32>
    %143 = arith.subf %137, %142 : vector<8x2176xf32>
    %cst_113 = arith.constant 0.000000e+00 : f32
    %144 = vector.shape_cast %4 : vector<1x2176xi1> to vector<1x2176xi1>
    %145 = vector.broadcast %144 : vector<1x2176xi1> to vector<8x2176xi1>
    %146 = vector.broadcast %cst_113 : f32 to vector<8x2176xf32>
    %147 = arith.select %145, %143, %146 : vector<8x2176xi1>, vector<8x2176xf32>
    %148 = arith.mulf %147, %147 : vector<8x2176xf32>
    %cst_114 = arith.constant dense<0.000000e+00> : vector<8xf32>
    %149 = vector.multi_reduction <add>, %148, %cst_114 [1] : vector<8x2176xf32> to vector<8xf32>
    %150 = vector.shape_cast %149 : vector<8xf32> to vector<8x1xf32>
    %cst_115 = arith.constant 4.59558825E-4 : f32
    %151 = vector.broadcast %cst_115 : f32 to vector<8x1xf32>
    %152 = arith.mulf %150, %151 : vector<8x1xf32>
    %c2 = arith.constant 2 : index
    %c0_116 = arith.constant 0 : index
    %c0_117 = arith.constant 0 : index
    %153 = vector.load %arg6[%c2, %c0_116, %c0_117] : memref<4x8x1xf32, #tpu.memory_space<vmem>>, vector<1x8x1xf32>
    %154 = vector.shape_cast %153 : vector<1x8x1xf32> to vector<8x1xf32>
    %cst_118 = arith.constant 9.99999974E-6 : f32
    %155 = vector.broadcast %cst_118 : f32 to vector<8x1xf32>
    %156 = arith.addf %152, %155 : vector<8x1xf32>
    %157 = math.rsqrt %156 : vector<8x1xf32>
    %158 = arith.mulf %154, %157 : vector<8x1xf32>
    %c2_119 = arith.constant 2 : index
    %c0_120 = arith.constant 0 : index
    %c0_121 = arith.constant 0 : index
    %159 = vector.load %arg7[%c2_119, %c0_120, %c0_121] : memref<4x8x1xf32, #tpu.memory_space<vmem>>, vector<1x8x1xf32>
    %160 = vector.shape_cast %159 : vector<1x8x1xf32> to vector<8x1xf32>
    %161 = arith.mulf %158, %141 : vector<8x1xf32>
    %162 = arith.subf %160, %161 : vector<8x1xf32>
    %163 = vector.broadcast %158 : vector<8x1xf32> to vector<8x2176xf32>
    %164 = arith.mulf %137, %163 : vector<8x2176xf32>
    %165 = vector.broadcast %162 : vector<8x1xf32> to vector<8x2176xf32>
    %166 = arith.addf %164, %165 : vector<8x2176xf32>
    %c2_122 = arith.constant 2 : index
    %167 = memref.load %arg12[%c2_122] : memref<5xf32, #tpu.memory_space<smem>>
    %cst_123 = arith.constant 0.000000e+00 : f32
    %168 = vector.broadcast %cst_123 : f32 to vector<8x2176xf32>
    %169 = arith.cmpf oge, %166, %168 : vector<8x2176xf32>
    %170 = vector.broadcast %167 : f32 to vector<8x2176xf32>
    %171 = arith.mulf %170, %166 : vector<8x2176xf32>
    %172 = arith.select %169, %166, %171 : vector<8x2176xi1>, vector<8x2176xf32>
    %cst_124 = arith.constant 0.000000e+00 : f32
    %173 = vector.shape_cast %2 : vector<1x2176xi1> to vector<1x2176xi1>
    %174 = vector.broadcast %173 : vector<1x2176xi1> to vector<8x2176xi1>
    %175 = vector.broadcast %cst_124 : f32 to vector<8x2176xf32>
    %176 = arith.select %174, %172, %175 : vector<8x2176xi1>, vector<8x2176xf32>
    %c24_125 = arith.constant 24 : index
    %c0_126 = arith.constant 0 : index
    %177 = vector.load %arg15[%c24_125, %c0_126] : memref<40x2176xf32, #tpu.memory_space<vmem>>, vector<8x2176xf32>
    tpu.vector_store %arg15[%c24_125, %c0_126], %176 {strides = array<i32>} : memref<40x2176xf32, #tpu.memory_space<vmem>>, vector<8x2176xf32>,
    %c0_127 = arith.constant 0 : index
    %c0_128 = arith.constant 0 : index
    %178 = vector.load %arg4[%c0_127, %c0_128] : memref<32x32xf32, #tpu.memory_space<vmem>>, vector<32x32xf32>
    %c0_129 = arith.constant 0 : index
    %c0_130 = arith.constant 0 : index
    %179 = vector.load %arg15[%c0_129, %c0_130] : memref<40x2176xf32, #tpu.memory_space<vmem>>, vector<32x2176xf32>
    %cst_131 = arith.constant dense<0.000000e+00> : vector<32x2176xf32>
    %180 = tpu.matmul %178, %179, %cst_131 {dimension_numbers = #tpu.dot_dimension_numbers<[1], [0], [0], [1], [0, 0, 1, 1], [], []>} : vector<32x32xf32>, vector<32x2176xf32>, vector<32x2176xf32> -> vector<32x2176xf32>
    %c0_132 = arith.constant 0 : index
    %c0_133 = arith.constant 0 : index
    %181 = vector.load %arg16[%c0_132, %c0_133] : memref<64x2176xf32, #tpu.memory_space<vmem>>, vector<32x2176xf32>
    tpu.vector_store %arg16[%c0_132, %c0_133], %180 {strides = array<i32>} : memref<64x2176xf32, #tpu.memory_space<vmem>>, vector<32x2176xf32>,
    %c16_134 = arith.constant 16 : index
    %c256_135 = arith.constant 256 : index
    %182 = vector.load %arg16[%c16_134, %c256_135] : memref<64x2176xf32, #tpu.memory_space<vmem>>, vector<8x1920xf32>
    %c0_136 = arith.constant 0 : index
    %c0_137 = arith.constant 0 : index
    %183 = vector.load %arg16[%c0_136, %c0_137] : memref<64x2176xf32, #tpu.memory_space<vmem>>, vector<8x1920xf32>
    %184 = arith.addf %182, %183 : vector<8x1920xf32>
    %c16_138 = arith.constant 16 : index
    %c256_139 = arith.constant 256 : index
    %185 = vector.load %arg16[%c16_138, %c256_139] : memref<64x2176xf32, #tpu.memory_space<vmem>>, vector<8x1920xf32>
    tpu.vector_store %arg16[%c16_138, %c256_139], %184 {strides = array<i32>} : memref<64x2176xf32, #tpu.memory_space<vmem>>, vector<8x1920xf32>,
    %c16_140 = arith.constant 16 : index
    %c128_141 = arith.constant 128 : index
    %186 = vector.load %arg16[%c16_140, %c128_141] : memref<64x2176xf32, #tpu.memory_space<vmem>>, vector<8x2048xf32>
    %c8_142 = arith.constant 8 : index
    %c0_143 = arith.constant 0 : index
    %187 = vector.load %arg16[%c8_142, %c0_143] : memref<64x2176xf32, #tpu.memory_space<vmem>>, vector<8x2048xf32>
    %188 = arith.addf %186, %187 : vector<8x2048xf32>
    %c16_144 = arith.constant 16 : index
    %c128_145 = arith.constant 128 : index
    %189 = vector.load %arg16[%c16_144, %c128_145] : memref<64x2176xf32, #tpu.memory_space<vmem>>, vector<8x2048xf32>
    tpu.vector_store %arg16[%c16_144, %c128_145], %188 {strides = array<i32>} : memref<64x2176xf32, #tpu.memory_space<vmem>>, vector<8x2048xf32>,
    %c16_146 = arith.constant 16 : index
    %c0_147 = arith.constant 0 : index
    %190 = vector.load %arg16[%c16_146, %c0_147] : memref<64x2176xf32, #tpu.memory_space<vmem>>, vector<8x1920xf32>
    %c24_148 = arith.constant 24 : index
    %c128_149 = arith.constant 128 : index
    %191 = vector.load %arg16[%c24_148, %c128_149] : memref<64x2176xf32, #tpu.memory_space<vmem>>, vector<8x1920xf32>
    %192 = arith.addf %190, %191 : vector<8x1920xf32>
    %c16_150 = arith.constant 16 : index
    %c0_151 = arith.constant 0 : index
    %193 = vector.load %arg16[%c16_150, %c0_151] : memref<64x2176xf32, #tpu.memory_space<vmem>>, vector<8x1920xf32>
    tpu.vector_store %arg16[%c16_150, %c0_151], %192 {strides = array<i32>} : memref<64x2176xf32, #tpu.memory_space<vmem>>, vector<8x1920xf32>,
    %c16_152 = arith.constant 16 : index
    %c0_153 = arith.constant 0 : index
    %194 = vector.load %arg16[%c16_152, %c0_153] : memref<64x2176xf32, #tpu.memory_space<vmem>>, vector<8x2176xf32>
    %cst_154 = arith.constant dense<0.000000e+00> : vector<8xf32>
    %195 = vector.multi_reduction <add>, %194, %cst_154 [1] : vector<8x2176xf32> to vector<8xf32>
    %196 = vector.shape_cast %195 : vector<8xf32> to vector<8x1xf32>
    %cst_155 = arith.constant 4.59558825E-4 : f32
    %197 = vector.broadcast %cst_155 : f32 to vector<8x1xf32>
    %198 = arith.mulf %196, %197 : vector<8x1xf32>
    %199 = vector.broadcast %198 : vector<8x1xf32> to vector<8x2176xf32>
    %200 = arith.subf %194, %199 : vector<8x2176xf32>
    %cst_156 = arith.constant 0.000000e+00 : f32
    %201 = vector.shape_cast %4 : vector<1x2176xi1> to vector<1x2176xi1>
    %202 = vector.broadcast %201 : vector<1x2176xi1> to vector<8x2176xi1>
    %203 = vector.broadcast %cst_156 : f32 to vector<8x2176xf32>
    %204 = arith.select %202, %200, %203 : vector<8x2176xi1>, vector<8x2176xf32>
    %205 = arith.mulf %204, %204 : vector<8x2176xf32>
    %cst_157 = arith.constant dense<0.000000e+00> : vector<8xf32>
    %206 = vector.multi_reduction <add>, %205, %cst_157 [1] : vector<8x2176xf32> to vector<8xf32>
    %207 = vector.shape_cast %206 : vector<8xf32> to vector<8x1xf32>
    %cst_158 = arith.constant 4.59558825E-4 : f32
    %208 = vector.broadcast %cst_158 : f32 to vector<8x1xf32>
    %209 = arith.mulf %207, %208 : vector<8x1xf32>
    %c3 = arith.constant 3 : index
    %c0_159 = arith.constant 0 : index
    %c0_160 = arith.constant 0 : index
    %210 = vector.load %arg6[%c3, %c0_159, %c0_160] : memref<4x8x1xf32, #tpu.memory_space<vmem>>, vector<1x8x1xf32>
    %211 = vector.shape_cast %210 : vector<1x8x1xf32> to vector<8x1xf32>
    %cst_161 = arith.constant 9.99999974E-6 : f32
    %212 = vector.broadcast %cst_161 : f32 to vector<8x1xf32>
    %213 = arith.addf %209, %212 : vector<8x1xf32>
    %214 = math.rsqrt %213 : vector<8x1xf32>
    %215 = arith.mulf %211, %214 : vector<8x1xf32>
    %c3_162 = arith.constant 3 : index
    %c0_163 = arith.constant 0 : index
    %c0_164 = arith.constant 0 : index
    %216 = vector.load %arg7[%c3_162, %c0_163, %c0_164] : memref<4x8x1xf32, #tpu.memory_space<vmem>>, vector<1x8x1xf32>
    %217 = vector.shape_cast %216 : vector<1x8x1xf32> to vector<8x1xf32>
    %218 = arith.mulf %215, %198 : vector<8x1xf32>
    %219 = arith.subf %217, %218 : vector<8x1xf32>
    %220 = vector.broadcast %215 : vector<8x1xf32> to vector<8x2176xf32>
    %221 = arith.mulf %194, %220 : vector<8x2176xf32>
    %222 = vector.broadcast %219 : vector<8x1xf32> to vector<8x2176xf32>
    %223 = arith.addf %221, %222 : vector<8x2176xf32>
    %c3_165 = arith.constant 3 : index
    %224 = memref.load %arg12[%c3_165] : memref<5xf32, #tpu.memory_space<smem>>
    %cst_166 = arith.constant 0.000000e+00 : f32
    %225 = vector.broadcast %cst_166 : f32 to vector<8x2176xf32>
    %226 = arith.cmpf oge, %223, %225 : vector<8x2176xf32>
    %227 = vector.broadcast %224 : f32 to vector<8x2176xf32>
    %228 = arith.mulf %227, %223 : vector<8x2176xf32>
    %229 = arith.select %226, %223, %228 : vector<8x2176xi1>, vector<8x2176xf32>
    %cst_167 = arith.constant 0.000000e+00 : f32
    %230 = vector.shape_cast %2 : vector<1x2176xi1> to vector<1x2176xi1>
    %231 = vector.broadcast %230 : vector<1x2176xi1> to vector<8x2176xi1>
    %232 = vector.broadcast %cst_167 : f32 to vector<8x2176xf32>
    %233 = arith.select %231, %229, %232 : vector<8x2176xi1>, vector<8x2176xf32>
    %c32 = arith.constant 32 : index
    %c0_168 = arith.constant 0 : index
    %234 = vector.load %arg15[%c32, %c0_168] : memref<40x2176xf32, #tpu.memory_space<vmem>>, vector<8x2176xf32>
    tpu.vector_store %arg15[%c32, %c0_168], %233 {strides = array<i32>} : memref<40x2176xf32, #tpu.memory_space<vmem>>, vector<8x2176xf32>,
    %c0_169 = arith.constant 0 : index
    %c0_170 = arith.constant 0 : index
    %235 = vector.load %arg5[%c0_169, %c0_170] : memref<64x40xf32, #tpu.memory_space<vmem>>, vector<64x40xf32>
    %c0_171 = arith.constant 0 : index
    %c0_172 = arith.constant 0 : index
    %236 = vector.load %arg15[%c0_171, %c0_172] : memref<40x2176xf32, #tpu.memory_space<vmem>>, vector<40x2176xf32>
    %cst_173 = arith.constant dense<0.000000e+00> : vector<64x2176xf32>
    %237 = tpu.matmul %235, %236, %cst_173 {dimension_numbers = #tpu.dot_dimension_numbers<[1], [0], [0], [1], [0, 0, 1, 1], [], []>} : vector<64x40xf32>, vector<40x2176xf32>, vector<64x2176xf32> -> vector<64x2176xf32>
    %c0_174 = arith.constant 0 : index
    %c0_175 = arith.constant 0 : index
    %238 = vector.load %arg16[%c0_174, %c0_175] : memref<64x2176xf32, #tpu.memory_space<vmem>>, vector<64x2176xf32>
    tpu.vector_store %arg16[%c0_174, %c0_175], %237 {strides = array<i32>} : memref<64x2176xf32, #tpu.memory_space<vmem>>, vector<64x2176xf32>,
    %c16_176 = arith.constant 16 : index
    %c128_177 = arith.constant 128 : index
    %239 = vector.load %arg16[%c16_176, %c128_177] : memref<64x2176xf32, #tpu.memory_space<vmem>>, vector<16x1920xf32>
    %c48 = arith.constant 48 : index
    %c0_178 = arith.constant 0 : index
    %240 = vector.load %arg16[%c48, %c0_178] : memref<64x2176xf32, #tpu.memory_space<vmem>>, vector<16x1920xf32>
    %241 = arith.addf %239, %240 : vector<16x1920xf32>
    %c16_179 = arith.constant 16 : index
    %c128_180 = arith.constant 128 : index
    %242 = vector.load %arg16[%c16_179, %c128_180] : memref<64x2176xf32, #tpu.memory_space<vmem>>, vector<16x1920xf32>
    tpu.vector_store %arg16[%c16_179, %c128_180], %241 {strides = array<i32>} : memref<64x2176xf32, #tpu.memory_space<vmem>>, vector<16x1920xf32>,
    %c32_181 = arith.constant 32 : index
    %c0_182 = arith.constant 0 : index
    %243 = vector.load %arg16[%c32_181, %c0_182] : memref<64x2176xf32, #tpu.memory_space<vmem>>, vector<16x1920xf32>
    %c0_183 = arith.constant 0 : index
    %c128_184 = arith.constant 128 : index
    %244 = vector.load %arg16[%c0_183, %c128_184] : memref<64x2176xf32, #tpu.memory_space<vmem>>, vector<16x1920xf32>
    %245 = arith.addf %243, %244 : vector<16x1920xf32>
    %c32_185 = arith.constant 32 : index
    %c0_186 = arith.constant 0 : index
    %246 = vector.load %arg16[%c32_185, %c0_186] : memref<64x2176xf32, #tpu.memory_space<vmem>>, vector<16x1920xf32>
    tpu.vector_store %arg16[%c32_185, %c0_186], %245 {strides = array<i32>} : memref<64x2176xf32, #tpu.memory_space<vmem>>, vector<16x1920xf32>,
    %c0_187 = arith.constant 0 : index
    %c0_188 = arith.constant 0 : index
    %247 = vector.load %arg8[%c0_187, %c0_188] : memref<8x1xf32, #tpu.memory_space<vmem>>, vector<8x1xf32>
    %c0_189 = arith.constant 0 : index
    %c0_190 = arith.constant 0 : index
    %248 = vector.load %arg9[%c0_189, %c0_190] : memref<8x1xf32, #tpu.memory_space<vmem>>, vector<8x1xf32>
    %c16_191 = arith.constant 16 : index
    %c0_192 = arith.constant 0 : index
    %249 = vector.load %arg16[%c16_191, %c0_192] : memref<64x2176xf32, #tpu.memory_space<vmem>>, vector<8x2176xf32>
    %250 = vector.broadcast %247 : vector<8x1xf32> to vector<8x2176xf32>
    %251 = arith.addf %249, %250 : vector<8x2176xf32>
    %c24_193 = arith.constant 24 : index
    %c0_194 = arith.constant 0 : index
    %252 = vector.load %arg16[%c24_193, %c0_194] : memref<64x2176xf32, #tpu.memory_space<vmem>>, vector<8x2176xf32>
    %253 = vector.broadcast %248 : vector<8x1xf32> to vector<8x2176xf32>
    %254 = arith.addf %252, %253 : vector<8x2176xf32>
    %cst_195 = arith.constant 5.000000e-01 : f32
    %255 = vector.broadcast %cst_195 : f32 to vector<8x2176xf32>
    %256 = arith.mulf %255, %254 : vector<8x2176xf32>
    %257 = math.tanh %256 : vector<8x2176xf32>
    %cst_196 = arith.constant 1.000000e+00 : f32
    %258 = vector.broadcast %cst_196 : f32 to vector<8x2176xf32>
    %259 = arith.addf %257, %258 : vector<8x2176xf32>
    %cst_197 = arith.constant 5.000000e-01 : f32
    %260 = vector.broadcast %cst_197 : f32 to vector<8x2176xf32>
    %261 = arith.mulf %260, %259 : vector<8x2176xf32>
    %262 = arith.mulf %251, %261 : vector<8x2176xf32>
    %c0_198 = arith.constant 0 : index
    %c0_199 = arith.constant 0 : index
    %263 = vector.load %arg13[%c0_198, %c0_199] : memref<8x2176xf32, #tpu.memory_space<vmem>>, vector<8x2176xf32>
    tpu.vector_store %arg13[%c0_198, %c0_199], %262 {strides = array<i32>} : memref<8x2176xf32, #tpu.memory_space<vmem>>, vector<8x2176xf32>,
    %cst_200 = arith.constant 0.000000e+00 : f32
    %264 = vector.shape_cast %2 : vector<1x2176xi1> to vector<1x2176xi1>
    %265 = vector.broadcast %264 : vector<1x2176xi1> to vector<8x2176xi1>
    %266 = vector.broadcast %cst_200 : f32 to vector<8x2176xf32>
    %267 = arith.select %265, %262, %266 : vector<8x2176xi1>, vector<8x2176xf32>
    %cst_201 = arith.constant dense<0.000000e+00> : vector<8xf32>
    %268 = vector.multi_reduction <add>, %267, %cst_201 [1] : vector<8x2176xf32> to vector<8xf32>
    %269 = vector.shape_cast %268 : vector<8xf32> to vector<8x1xf32>
    %c32_202 = arith.constant 32 : index
    %c0_203 = arith.constant 0 : index
    %270 = vector.load %arg16[%c32_202, %c0_203] : memref<64x2176xf32, #tpu.memory_space<vmem>>, vector<8x2176xf32>
    %271 = vector.broadcast %247 : vector<8x1xf32> to vector<8x2176xf32>
    %272 = arith.addf %270, %271 : vector<8x2176xf32>
    %c40 = arith.constant 40 : index
    %c0_204 = arith.constant 0 : index
    %273 = vector.load %arg16[%c40, %c0_204] : memref<64x2176xf32, #tpu.memory_space<vmem>>, vector<8x2176xf32>
    %274 = vector.broadcast %248 : vector<8x1xf32> to vector<8x2176xf32>
    %275 = arith.addf %273, %274 : vector<8x2176xf32>
    %cst_205 = arith.constant 5.000000e-01 : f32
    %276 = vector.broadcast %cst_205 : f32 to vector<8x2176xf32>
    %277 = arith.mulf %276, %275 : vector<8x2176xf32>
    %278 = math.tanh %277 : vector<8x2176xf32>
    %cst_206 = arith.constant 1.000000e+00 : f32
    %279 = vector.broadcast %cst_206 : f32 to vector<8x2176xf32>
    %280 = arith.addf %278, %279 : vector<8x2176xf32>
    %cst_207 = arith.constant 5.000000e-01 : f32
    %281 = vector.broadcast %cst_207 : f32 to vector<8x2176xf32>
    %282 = arith.mulf %281, %280 : vector<8x2176xf32>
    %283 = arith.mulf %272, %282 : vector<8x2176xf32>
    %c0_208 = arith.constant 0 : index
    %c0_209 = arith.constant 0 : index
    %284 = vector.load %arg14[%c0_208, %c0_209] : memref<8x2176xf32, #tpu.memory_space<vmem>>, vector<8x2176xf32>
    tpu.vector_store %arg14[%c0_208, %c0_209], %283 {strides = array<i32>} : memref<8x2176xf32, #tpu.memory_space<vmem>>, vector<8x2176xf32>,
    %cst_210 = arith.constant 0.000000e+00 : f32
    %285 = vector.shape_cast %2 : vector<1x2176xi1> to vector<1x2176xi1>
    %286 = vector.broadcast %285 : vector<1x2176xi1> to vector<8x2176xi1>
    %287 = vector.broadcast %cst_210 : f32 to vector<8x2176xf32>
    %288 = arith.select %286, %283, %287 : vector<8x2176xi1>, vector<8x2176xf32>
    %cst_211 = arith.constant dense<0.000000e+00> : vector<8xf32>
    %289 = vector.multi_reduction <add>, %288, %cst_211 [1] : vector<8x2176xf32> to vector<8xf32>
    %290 = vector.shape_cast %289 : vector<8xf32> to vector<8x1xf32>
    %291 = arith.addf %269, %290 : vector<8x1xf32>
    %cst_212 = arith.constant 2.44140625E-4 : f32
    %292 = vector.broadcast %cst_212 : f32 to vector<8x1xf32>
    %293 = arith.mulf %291, %292 : vector<8x1xf32>
    %c0_213 = arith.constant 0 : index
    %c0_214 = arith.constant 0 : index
    %294 = vector.load %arg13[%c0_213, %c0_214] : memref<8x2176xf32, #tpu.memory_space<vmem>>, vector<8x2176xf32>
    %295 = vector.broadcast %293 : vector<8x1xf32> to vector<8x2176xf32>
    %296 = arith.subf %294, %295 : vector<8x2176xf32>
    %cst_215 = arith.constant 0.000000e+00 : f32
    %297 = vector.shape_cast %2 : vector<1x2176xi1> to vector<1x2176xi1>
    %298 = vector.broadcast %297 : vector<1x2176xi1> to vector<8x2176xi1>
    %299 = vector.broadcast %cst_215 : f32 to vector<8x2176xf32>
    %300 = arith.select %298, %296, %299 : vector<8x2176xi1>, vector<8x2176xf32>
    %301 = arith.mulf %300, %300 : vector<8x2176xf32>
    %cst_216 = arith.constant dense<0.000000e+00> : vector<8xf32>
    %302 = vector.multi_reduction <add>, %301, %cst_216 [1] : vector<8x2176xf32> to vector<8xf32>
    %303 = vector.shape_cast %302 : vector<8xf32> to vector<8x1xf32>
    %c0_217 = arith.constant 0 : index
    %c0_218 = arith.constant 0 : index
    %304 = vector.load %arg14[%c0_217, %c0_218] : memref<8x2176xf32, #tpu.memory_space<vmem>>, vector<8x2176xf32>
    %305 = vector.broadcast %293 : vector<8x1xf32> to vector<8x2176xf32>
    %306 = arith.subf %304, %305 : vector<8x2176xf32>
    %cst_219 = arith.constant 0.000000e+00 : f32
    %307 = vector.shape_cast %2 : vector<1x2176xi1> to vector<1x2176xi1>
    %308 = vector.broadcast %307 : vector<1x2176xi1> to vector<8x2176xi1>
    %309 = vector.broadcast %cst_219 : f32 to vector<8x2176xf32>
    %310 = arith.select %308, %306, %309 : vector<8x2176xi1>, vector<8x2176xf32>
    %311 = arith.mulf %310, %310 : vector<8x2176xf32>
    %cst_220 = arith.constant dense<0.000000e+00> : vector<8xf32>
    %312 = vector.multi_reduction <add>, %311, %cst_220 [1] : vector<8x2176xf32> to vector<8xf32>
    %313 = vector.shape_cast %312 : vector<8xf32> to vector<8x1xf32>
    %314 = arith.addf %303, %313 : vector<8x1xf32>
    %cst_221 = arith.constant 2.44140625E-4 : f32
    %315 = vector.broadcast %cst_221 : f32 to vector<8x1xf32>
    %316 = arith.mulf %314, %315 : vector<8x1xf32>
    %c0_222 = arith.constant 0 : index
    %c0_223 = arith.constant 0 : index
    %317 = vector.load %arg10[%c0_222, %c0_223] : memref<8x1xf32, #tpu.memory_space<vmem>>, vector<8x1xf32>
    %cst_224 = arith.constant 9.99999974E-6 : f32
    %318 = vector.broadcast %cst_224 : f32 to vector<8x1xf32>
    %319 = arith.addf %316, %318 : vector<8x1xf32>
    %320 = math.rsqrt %319 : vector<8x1xf32>
    %321 = arith.mulf %317, %320 : vector<8x1xf32>
    %c0_225 = arith.constant 0 : index
    %c0_226 = arith.constant 0 : index
    %322 = vector.load %arg11[%c0_225, %c0_226] : memref<8x1xf32, #tpu.memory_space<vmem>>, vector<8x1xf32>
    %323 = arith.mulf %321, %293 : vector<8x1xf32>
    %324 = arith.subf %322, %323 : vector<8x1xf32>
    %c4 = arith.constant 4 : index
    %325 = memref.load %arg12[%c4] : memref<5xf32, #tpu.memory_space<smem>>
    %c0_227 = arith.constant 0 : index
    %c0_228 = arith.constant 0 : index
    %326 = vector.load %arg13[%c0_227, %c0_228] : memref<8x2176xf32, #tpu.memory_space<vmem>>, vector<8x2176xf32>
    %327 = vector.broadcast %321 : vector<8x1xf32> to vector<8x2176xf32>
    %328 = arith.mulf %326, %327 : vector<8x2176xf32>
    %329 = vector.broadcast %324 : vector<8x1xf32> to vector<8x2176xf32>
    %330 = arith.addf %328, %329 : vector<8x2176xf32>
    %cst_229 = arith.constant 0.000000e+00 : f32
    %331 = vector.broadcast %cst_229 : f32 to vector<8x2176xf32>
    %332 = arith.cmpf oge, %330, %331 : vector<8x2176xf32>
    %333 = vector.broadcast %325 : f32 to vector<8x2176xf32>
    %334 = arith.mulf %333, %330 : vector<8x2176xf32>
    %335 = arith.select %332, %330, %334 : vector<8x2176xi1>, vector<8x2176xf32>
    %c0_230 = arith.constant 0 : index
    %c0_231 = arith.constant 0 : index
    %336 = vector.load %arg13[%c0_230, %c0_231] : memref<8x2176xf32, #tpu.memory_space<vmem>>, vector<8x2176xf32>
    tpu.vector_store %arg13[%c0_230, %c0_231], %335 {strides = array<i32>} : memref<8x2176xf32, #tpu.memory_space<vmem>>, vector<8x2176xf32>,
    %c0_232 = arith.constant 0 : index
    %c0_233 = arith.constant 0 : index
    %337 = vector.load %arg14[%c0_232, %c0_233] : memref<8x2176xf32, #tpu.memory_space<vmem>>, vector<8x2176xf32>
    %338 = vector.broadcast %321 : vector<8x1xf32> to vector<8x2176xf32>
    %339 = arith.mulf %337, %338 : vector<8x2176xf32>
    %340 = vector.broadcast %324 : vector<8x1xf32> to vector<8x2176xf32>
    %341 = arith.addf %339, %340 : vector<8x2176xf32>
    %cst_234 = arith.constant 0.000000e+00 : f32
    %342 = vector.broadcast %cst_234 : f32 to vector<8x2176xf32>
    %343 = arith.cmpf oge, %341, %342 : vector<8x2176xf32>
    %344 = vector.broadcast %325 : f32 to vector<8x2176xf32>
    %345 = arith.mulf %344, %341 : vector<8x2176xf32>
    %346 = arith.select %343, %341, %345 : vector<8x2176xi1>, vector<8x2176xf32>
    %c0_235 = arith.constant 0 : index
    %c0_236 = arith.constant 0 : index
    %347 = vector.load %arg14[%c0_235, %c0_236] : memref<8x2176xf32, #tpu.memory_space<vmem>>, vector<8x2176xf32>
    tpu.vector_store %arg14[%c0_235, %c0_236], %346 {strides = array<i32>} : memref<8x2176xf32, #tpu.memory_space<vmem>>, vector<8x2176xf32>,
    return
  }
}

</mosaic_0001>

<bundles_post_ra>
// kernel: dcblock_forward.1
= control target key start
LH: loop header
LB: loop body
LE: loop exit
PB: predicated region body
PF: predicated region fallthrough
CT: control target
= control target key end

     0   :  { %20 = vsyncpa [#allocation5], 0  ;;  %s11148_s0 = inlined_call_operand.vmem [shape: f32[8,2176], index: 0, kind: input, shape index: {}]   ;;  %s11149_s1 = inlined_call_operand.vmem [shape: f32[32,8], index: 1, kind: input, shape index: {}]   ;;  %s11150_s2 = inlined_call_operand.vmem [shape: f32[32,16], index: 2, kind: input, shape index: {}]   ;;  %s11151_s3 = inlined_call_operand.vmem [shape: f32[32,24], index: 3, kind: input, shape index: {}]   ;;  %s11152_s4 = inlined_call_operand.vmem [shape: f32[32,32], index: 4, kind: input, shape index: {}]   ;;  %s11153_s5 = inlined_call_operand.vmem [shape: f32[64,40], index: 5, kind: input, shape index: {}]   ;;  %s11154_s6 = inlined_call_operand.vmem [shape: f32[4,8,1], index: 6, kind: input, shape index: {}]   ;;  %s11155_s7 = inlined_call_operand.vmem [shape: f32[4,8,1], index: 7, kind: input, shape index: {}]   ;;  %s11156_s8 = inlined_call_operand.vmem [shape: f32[8,1], index: 8, kind: input, shape index: {}]   ;;  %s11157_s9 = inlined_call_operand.vmem [shape: f32[8,1], index: 9, kind: input, shape index: {}]   ;;  %s11158_s10 = inlined_call_operand.vmem [shape: f32[8,1], index: 10, kind: input, shape index: {}]   ;;  %s11159_s11 = inlined_call_operand.vmem [shape: f32[8,1], index: 11, kind: input, shape index: {}]   ;;  %s11160_s12 = inlined_call_operand.vmem [shape: f32[5], index: 12, kind: input, shape index: {}]   ;;  %s11161_s13 = inlined_call_operand.vmem [shape: f32[8,2176], index: 13, kind: output, shape index: {0}]   ;;  %s11162_s14 = inlined_call_operand.vmem [shape: f32[8,2176], index: 14, kind: output, shape index: {1}]  }
   0x1   :  { %s51_s15 = sshll.u32 %s11160_s12, 4  ;;  %s52_s15 = int_to_ptr.vmem [resolvable:$true] %s51_s15 }
   0x2   :  { %s8613_s16 = scalar_lea.vmem %s52_s15, 16  ;;  %p8618_p1 = scmp.lt.s32.totalorder %s52_s15, %s52_s15 }
   0x3   :  { %p8614_p0 = scmp.ne.s32.totalorder %s52_s15, %s8613_s16  ;;  %p8619_p2 = scmp.lt.s32.totalorder %s8613_s16, %s8613_s16 }
   0x5   :  { %p8620_p3 = por %p8619_p2, %p8618_p1 }
   0x7   :  { %p8621_p4 = pnand %p8620_p3, %p8614_p0 }
   0x9   :  { %8624 = shalt.err (!%p8621_p4)
}
   0xa   :  { %s8627_s17 = smov [#allocation4]  }
   0xb   :  { %54 = dma.vmem_to_smem %s52_s15, 16, %s8627_s17, [#allocation5]  }
   0xc   :  { %8625 = dma.done.wait [#allocation5], 16  }
   0xd   :  { %8626 = vsyncadd [#allocation5], 4294967280 }
   0xe   :  { %58 = sfence }
   0xf   :  { %v8711_v0 = vld [vmem:[%s11148_s0 + $0x8] sm:$0xff]  ;;  %v8716_v1 = vld [vmem:[%s11148_s0] sm:$0xff]  ;;  %vm166_vm0 = vcmask 64512   ;;  %v11163_v3 = vmov 0.0   ;;  %v8728_v4 = vld [vmem:[%s11148_s0 + $0x18] sm:$0xff]  ;;  %vm1578_vm1 = vcmask 130048  }
  0x10   :  { %v8721_v2 = vld [vmem:[%s11149_s1] sm:$0xff]  ;;  %179 = vmatprep.subr.mxu0 %v8711_v0  ;;  %243 = vmatprep.mubr.f32.mxu0 %v11163_v3  ;;  %v8733_v5 = vld [vmem:[%s11148_s0 + $0x10] sm:$0xff]  ;;  %v8739_v6 = vld [vmem:[%s11148_s0 + $0x28] sm:$0xff]  ;;  %s1419_s19 = sld [smem:[#allocation4]]  ;;  %s8053_s29 = sld [smem:[#allocation4 + $0x1]] }
  0x11   :  { %180 = vmatpush1.msra.mxu0 %v8716_v1  ;;  %1655 = vmatprep.mubr.f32.mxu1 %v11163_v3  ;;  %v8749_v7 = vld [vmem:[%s11149_s1 + $0x8] sm:$0xff]  ;;  %v8759_v8 = vld [vmem:[%s11149_s1 + $0x10] sm:$0xff]  ;;  %v8767_v9 = vld [vmem:[%s11149_s1 + $0x18] sm:$0xff]  ;;  %s8092_s24 = sld [smem:[#allocation4 + $0x2]] }
  0x12   :  { %7979 = vmatmul.mubr.msk.f32.vlgmr.msra.gmra.mrb[0].mxu0 %vm166_vm0, %v8721_v2  ;;  %268 = vmatprep.subr.mxu0 %v8728_v4  ;;  %v8775_v10 = vld [vmem:[%s11148_s0 + $0x20] sm:$0xff]  ;;  %v8780_v11 = vld [vmem:[%s11148_s0 + $0x38] sm:$0xff]  ;;  %v8799_v12 = vld [vmem:[%s11148_s0 + $0x30] sm:$0xff] }
  0x13   :  { %249 = vmatprep.mubr.f32.mxu0 %v11163_v3  ;;  %269 = vmatpush1.msra.mxu0 %v8733_v5  ;;  %v8804_v13 = vld [vmem:[%s11148_s0 + $0x48] sm:$0xff]  ;;  %v8823_v14 = vld [vmem:[%s11148_s0 + $0x40] sm:$0xff]  ;;  %v8828_v15 = vld [vmem:[%s11148_s0 + $0x58] sm:$0xff] }
  0x14   :  { %357 = vmatprep.subr.mxu0 %v8739_v6  ;;  %v8847_v16 = vld [vmem:[%s11148_s0 + $0x50] sm:$0xff]  ;;  %v8852_v17 = vld [vmem:[%s11148_s0 + $0x68] sm:$0xff]  ;;  %v8871_v18 = vld [vmem:[%s11148_s0 + $0x60] sm:$0xff] }
  0x15   :  { %v8876_v19 = vld [vmem:[%s11148_s0 + $0x78] sm:$0xff]  ;;  %v8895_v20 = vld [vmem:[%s11148_s0 + $0x70] sm:$0xff]  ;;  %v8900_v21 = vld [vmem:[%s11148_s0 + $0x80] sm:$0xff] }
  0x16   :  { %7980 = vmatmul.mubr.msk.f32.gmra.mrb[2].mxu0 %vm166_vm0, %v8749_v7 }
  0x17   :  { %255 = vmatprep.mubr.f32.mxu0 %v11163_v3 }
  0x1a   :  { %7981 = vmatmul.mubr.msk.f32.gmra.mrb[4].mxu0 %vm166_vm0, %v8759_v8 }
  0x1b   :  { %261 = vmatprep.mubr.f32.mxu0 %v11163_v3 }
  0x1e   :  { %7982 = vmatmul.mubr.msk.f32.gmra.mrb[6].mxu0 %vm166_vm0, %v8767_v9 }
  0x1f   :  { %332 = vmatprep.mubr.f32.mxu0 %v11163_v3 }
  0x22   :  { %7983 = vmatmul.mubr.msk.f32.vlgmr.msra.gmra.mrb[8].mxu0 %vm166_vm0, %v8721_v2 }
  0x23   :  { %338 = vmatprep.mubr.f32.mxu0 %v11163_v3  ;;  %358 = vmatpush1.msra.mxu0 %v8775_v10 }
  0x24   :  { %446 = vmatprep.subr.mxu0 %v8780_v11 }
  0x26   :  { %7984 = vmatmul.mubr.msk.f32.gmra.mrb[10].mxu0 %vm166_vm0, %v8749_v7 }
  0x27   :  { %344 = vmatprep.mubr.f32.mxu0 %v11163_v3 }
  0x2a   :  { %7985 = vmatmul.mubr.msk.f32.gmra.mrb[0].mxu0 %vm166_vm0, %v8759_v8 }
  0x2b   :  { %350 = vmatprep.mubr.f32.mxu0 %v11163_v3 }
  0x2e   :  { %7986 = vmatmul.mubr.msk.f32.gmra.mrb[12].mxu0 %vm166_vm0, %v8767_v9 }
  0x2f   :  { %421 = vmatprep.mubr.f32.mxu0 %v11163_v3 }
  0x32   :  { %7987 = vmatmul.mubr.msk.f32.vlgmr.msra.gmra.mrb[14].mxu0 %vm166_vm0, %v8721_v2 }
  0x33   :  { %427 = vmatprep.mubr.f32.mxu0 %v11163_v3  ;;  %447 = vmatpush1.msra.mxu0 %v8799_v12 }
  0x34   :  { %535 = vmatprep.subr.mxu0 %v8804_v13 }
  0x36   :  { %7988 = vmatmul.mubr.msk.f32.gmra.mrb[16].mxu0 %vm166_vm0, %v8749_v7 }
  0x37   :  { %433 = vmatprep.mubr.f32.mxu0 %v11163_v3 }
  0x3a   :  { %7989 = vmatmul.mubr.msk.f32.gmra.mrb[8].mxu0 %vm166_vm0, %v8759_v8 }
  0x3b   :  { %439 = vmatprep.mubr.f32.mxu0 %v11163_v3 }
  0x3e   :  { %7990 = vmatmul.mubr.msk.f32.gmra.mrb[18].mxu0 %vm166_vm0, %v8767_v9 }
  0x3f   :  { %510 = vmatprep.mubr.f32.mxu0 %v11163_v3 }
  0x42   :  { %7991 = vmatmul.mubr.msk.f32.vlgmr.msra.gmra.mrb[20].mxu0 %vm166_vm0, %v8721_v2 }
  0x43   :  { %516 = vmatprep.mubr.f32.mxu0 %v11163_v3  ;;  %536 = vmatpush1.msra.mxu0 %v8823_v14 }
  0x44   :  { %624 = vmatprep.subr.mxu0 %v8828_v15 }
  0x46   :  { %7992 = vmatmul.mubr.msk.f32.gmra.mrb[22].mxu0 %vm166_vm0, %v8749_v7 }
  0x47   :  { %522 = vmatprep.mubr.f32.mxu0 %v11163_v3 }
  0x4a   :  { %7993 = vmatmul.mubr.msk.f32.gmra.mrb[14].mxu0 %vm166_vm0, %v8759_v8 }
  0x4b   :  { %528 = vmatprep.mubr.f32.mxu0 %v11163_v3 }
  0x4e   :  { %7994 = vmatmul.mubr.msk.f32.gmra.mrb[24].mxu0 %vm166_vm0, %v8767_v9 }
  0x4f   :  { %599 = vmatprep.mubr.f32.mxu0 %v11163_v3 }
  0x52   :  { %7995 = vmatmul.mubr.msk.f32.vlgmr.msra.gmra.mrb[26].mxu0 %vm166_vm0, %v8721_v2 }
  0x53   :  { %605 = vmatprep.mubr.f32.mxu0 %v11163_v3  ;;  %625 = vmatpush1.msra.mxu0 %v8847_v16 }
  0x54   :  { %713 = vmatprep.subr.mxu0 %v8852_v17 }
  0x56   :  { %7996 = vmatmul.mubr.msk.f32.gmra.mrb[28].mxu0 %vm166_vm0, %v8749_v7 }
  0x57   :  { %611 = vmatprep.mubr.f32.mxu0 %v11163_v3 }
  0x5a   :  { %7997 = vmatmul.mubr.msk.f32.gmra.mrb[20].mxu0 %vm166_vm0, %v8759_v8 }
  0x5b   :  { %617 = vmatprep.mubr.f32.mxu0 %v11163_v3 }
  0x5e   :  { %7998 = vmatmul.mubr.msk.f32.gmra.mrb[30].mxu0 %vm166_vm0, %v8767_v9 }
  0x5f   :  { %688 = vmatprep.mubr.f32.mxu0 %v11163_v3 }
  0x62   :  { %7999 = vmatmul.mubr.msk.f32.vlgmr.msra.gmra.mrb[32].mxu0 %vm166_vm0, %v8721_v2 }
  0x63   :  { %694 = vmatprep.mubr.f32.mxu0 %v11163_v3  ;;  %714 = vmatpush1.msra.mxu0 %v8871_v18 }
  0x64   :  { %802 = vmatprep.subr.mxu0 %v8876_v19 }
  0x66   :  { %8000 = vmatmul.mubr.msk.f32.gmra.mrb[34].mxu0 %vm166_vm0, %v8749_v7 }
  0x67   :  { %700 = vmatprep.mubr.f32.mxu0 %v11163_v3 }
  0x6a   :  { %8001 = vmatmul.mubr.msk.f32.gmra.mrb[26].mxu0 %vm166_vm0, %v8759_v8 }
  0x6b   :  { %706 = vmatprep.mubr.f32.mxu0 %v11163_v3 }
  0x6e   :  { %8002 = vmatmul.mubr.msk.f32.gmra.mrb[36].mxu0 %vm166_vm0, %v8767_v9 }
  0x6f   :  { %777 = vmatprep.mubr.f32.mxu0 %v11163_v3 }
  0x72   :  { %8003 = vmatmul.mubr.msk.f32.vlgmr.msra.gmra.mrb[38].mxu0 %vm166_vm0, %v8721_v2 }
  0x73   :  { %783 = vmatprep.mubr.f32.mxu0 %v11163_v3  ;;  %803 = vmatpush1.msra.mxu0 %v8895_v20 }
  0x74   :  { %8234 = vmatprep.subr.mxu0 %v8900_v21 }
  0x76   :  { %8004 = vmatmul.mubr.msk.f32.gmra.mrb[40].mxu0 %vm166_vm0, %v8749_v7 }
  0x77   :  { %789 = vmatprep.mubr.f32.mxu0 %v11163_v3 }
  0x7a   :  { %8005 = vmatmul.mubr.msk.f32.gmra.mrb[32].mxu0 %vm166_vm0, %v8759_v8 }
  0x7b   :  { %795 = vmatprep.mubr.f32.mxu0 %v11163_v3 }
  0x7e   :  { %8006 = vmatmul.mubr.msk.f32.gmra.mrb[42].mxu0 %vm166_vm0, %v8767_v9 }
  0x7f   :  { %866 = vmatprep.mubr.f32.mxu0 %v11163_v3 }
  0x82   :  { %8007 = vmatmul.mubr.msk.f32.vlgmr.msra.gmra.mrb[44].mxu0 %vm166_vm0, %v8721_v2 }
  0x83   :  { %872 = vmatprep.mubr.f32.mxu0 %v11163_v3  ;;  %8235 = vmatpush3.msra.mxu0 %v8900_v21 }
  0x84   :  { %8242 = vmatprep.subr.mxu0 %v8900_v21 }
  0x86   :  { %8008 = vmatmul.mubr.msk.f32.gmra.mrb[46].mxu0 %vm166_vm0, %v8749_v7 }
  0x87   :  { %878 = vmatprep.mubr.f32.mxu0 %v11163_v3 }
  0x8a   :  { %8009 = vmatmul.mubr.msk.f32.gmra.mrb[38].mxu0 %vm166_vm0, %v8759_v8 }
  0x8b   :  { %884 = vmatprep.mubr.f32.mxu0 %v11163_v3 }
  0x8e   :  { %8010 = vmatmul.mubr.msk.f32.gmra.mrb[48].mxu0 %vm166_vm0, %v8767_v9 }
  0x8f   :  { %8236 = vmatprep.mubr.msk.f32.mxu0 %vm166_vm0, %v8721_v2 }
  0x92   :  { %8237 = vmatmul.mubr.msk.f32.vlgmr.msra.gmra.mrb[50].mxu0 %vm166_vm0, %v8749_v7 }
  0x93   :  { %8239 = vmatprep.mubr.msk.f32.mxu0 %vm166_vm0, %v8759_v8  ;;  %8243 = vmatpush3.msra.mxu0 %v8900_v21 }
  0x96   :  { %8240 = vmatmul.mubr.msk.f32.gmra.mrb[52].mxu0 %vm166_vm0, %v8767_v9 }
  0xe9   :  { %v251_v22 = vpop.f32.mrb[2].mxu0 }
  0xea   :  { %v253_v23 = vpop.f32.mrb[3].mxu0 }
  0xed   :  { %v257_v24 = vpop.f32.mrb[4].mxu0 }
  0xee   :  { %v259_v25 = vpop.f32.mrb[5].mxu0 }
  0xef   :  { %v1136_v26 = vadd.f32 %v259_v25, %v251_v22 }
  0xf1   :  { %v263_v27 = vpop.f32.mrb[6].mxu0 }
  0xf2   :  { %v265_v28 = vpop.f32.mrb[7].mxu0 }
  0xf3   :  { %v8938_v29 = vadd.f32 %v265_v28, %v257_v24 }
  0xf9   :  { %v340_v30 = vpop.f32.mrb[10].mxu0 }
  0xfa   :  { %v342_v31 = vpop.f32.mrb[11].mxu0 }
  0xfd   :  { %v346_v32 = vpop.f32.mrb[0].mxu0 }
  0xfe   :  { %v1137_v33 = vadd.f32 %v346_v32, %v253_v23  ;;  %v348_v34 = vpop.f32.mrb[1].mxu0 }
  0xff   :  { %v1138_v35 = vadd.f32 %v348_v34, %v340_v30 }
 0x101   :  { %v352_v36 = vpop.f32.mrb[12].mxu0 }
 0x102   :  { %v8940_v37 = vadd.f32 %v1136_v26, %v352_v36  ;;  %v354_v38 = vpop.f32.mrb[13].mxu0 }
 0x103   :  { %v8942_v39 = vadd.f32 %v1137_v33, %v354_v38 }
 0x109   :  { %v429_v40 = vpop.f32.mrb[16].mxu0 }
 0x10a   :  { %v431_v41 = vpop.f32.mrb[17].mxu0 }
 0x10d   :  { %v435_v42 = vpop.f32.mrb[8].mxu0 }
 0x10e   :  { %v1139_v43 = vadd.f32 %v435_v42, %v342_v31  ;;  %v437_v44 = vpop.f32.mrb[9].mxu0  ;;  %v1245_v31 = vadd.f32 %v8940_v37, %v8938_v29 }
 0x10f   :  { %v1140_v45 = vadd.f32 %v437_v44, %v429_v40 }
 0x110   :  { %v1246_v36 = vadd.f32 %v1245_v31, %v8942_v39 }
 0x111   :  { %v441_v46 = vpop.f32.mrb[18].mxu0 }
 0x112   :  { %v8944_v47 = vadd.f32 %v1138_v35, %v441_v46  ;;  %v443_v48 = vpop.f32.mrb[19].mxu0 }
 0x113   :  { %v8946_v49 = vadd.f32 %v1139_v43, %v443_v48 }
 0x114   :  { %v1247_v38 = vadd.f32 %v1246_v36, %v8944_v47 }
 0x116   :  { %v1248_v42 = vadd.f32 %v1247_v38, %v8946_v49 }
 0x119   :  { %v518_v50 = vpop.f32.mrb[22].mxu0 }
 0x11a   :  { %v520_v51 = vpop.f32.mrb[23].mxu0 }
 0x11d   :  { %v524_v52 = vpop.f32.mrb[14].mxu0 }
 0x11e   :  { %v1141_v53 = vadd.f32 %v524_v52, %v431_v41  ;;  %v526_v54 = vpop.f32.mrb[15].mxu0 }
 0x11f   :  { %v1142_v55 = vadd.f32 %v526_v54, %v518_v50 }
 0x121   :  { %v530_v56 = vpop.f32.mrb[24].mxu0 }
 0x122   :  { %v8948_v57 = vadd.f32 %v1140_v45, %v530_v56  ;;  %v532_v58 = vpop.f32.mrb[25].mxu0 }
 0x123   :  { %v8950_v59 = vadd.f32 %v1141_v53, %v532_v58 }
 0x124   :  { %v1249_v43 = vadd.f32 %v1248_v42, %v8948_v57 }
 0x126   :  { %v1250_v50 = vadd.f32 %v1249_v43, %v8950_v59 }
 0x129   :  { %v607_v60 = vpop.f32.mrb[28].mxu0 }
 0x12a   :  { %v609_v61 = vpop.f32.mrb[29].mxu0 }
 0x12d   :  { %v613_v62 = vpop.f32.mrb[20].mxu0 }
 0x12e   :  { %v1143_v63 = vadd.f32 %v613_v62, %v520_v51  ;;  %v615_v2 = vpop.f32.mrb[21].mxu0 }
 0x12f   :  { %v1144_v7 = vadd.f32 %v615_v2, %v607_v60 }
 0x131   :  { %v619_v8 = vpop.f32.mrb[30].mxu0 }
 0x132   :  { %v8952_v9 = vadd.f32 %v1142_v55, %v619_v8  ;;  %v621_v22 = vpop.f32.mrb[31].mxu0 }
 0x133   :  { %v8954_v23 = vadd.f32 %v1143_v63, %v621_v22 }
 0x134   :  { %v1251_v54 = vadd.f32 %v1250_v50, %v8952_v9 }
 0x136   :  { %v1252_v60 = vadd.f32 %v1251_v54, %v8954_v23 }
 0x139   :  { %v696_v24 = vpop.f32.mrb[34].mxu0 }
 0x13a   :  { %v698_v25 = vpop.f32.mrb[35].mxu0 }
 0x13d   :  { %v702_v26 = vpop.f32.mrb[26].mxu0 }
 0x13e   :  { %v1145_v27 = vadd.f32 %v702_v26, %v609_v61  ;;  %v704_v28 = vpop.f32.mrb[27].mxu0 }
 0x13f   :  { %v1146_v30 = vadd.f32 %v704_v28, %v696_v24 }
 0x141   :  { %v708_v32 = vpop.f32.mrb[36].mxu0 }
 0x142   :  { %v8958_v33 = vadd.f32 %v1144_v7, %v708_v32  ;;  %v710_v34 = vpop.f32.mrb[37].mxu0 }
 0x143   :  { %v8960_v35 = vadd.f32 %v1145_v27, %v710_v34 }
 0x144   :  { %v1253_v61 = vadd.f32 %v1252_v60, %v8958_v33 }
 0x146   :  { %v1254_v2 = vadd.f32 %v1253_v61, %v8960_v35 }
 0x149   :  { %v785_v40 = vpop.f32.mrb[40].mxu0 }
 0x14a   :  { %v787_v41 = vpop.f32.mrb[41].mxu0 }
 0x14d   :  { %v791_v44 = vpop.f32.mrb[32].mxu0 }
 0x14e   :  { %v1147_v45 = vadd.f32 %v791_v44, %v698_v25  ;;  %v793_v46 = vpop.f32.mrb[33].mxu0 }
 0x14f   :  { %v1148_v48 = vadd.f32 %v793_v46, %v785_v40 }
 0x151   :  { %v797_v51 = vpop.f32.mrb[42].mxu0 }
 0x152   :  { %v8967_v52 = vadd.f32 %v1146_v30, %v797_v51  ;;  %v799_v53 = vpop.f32.mrb[43].mxu0 }
 0x153   :  { %v8970_v55 = vadd.f32 %v1147_v45, %v799_v53 }
 0x154   :  { %v1255_v24 = vadd.f32 %v1254_v2, %v8967_v52 }
 0x155   :  { %v868_v56 = vpop.f32.mrb[44].mxu0 }
 0x156   :  { %v870_v58 = vpop.f32.mrb[45].mxu0  ;;  %v1256_v30 = vadd.f32 %v1255_v24, %v8970_v55 }
 0x159   :  { %v874_v62 = vpop.f32.mrb[46].mxu0 }
 0x15a   :  { %v876_v63 = vpop.f32.mrb[47].mxu0 }
 0x15d   :  { %v880_v7 = vpop.f32.mrb[38].mxu0 }
 0x15e   :  { %v1149_v8 = vadd.f32 %v880_v7, %v787_v41  ;;  %v882_v22 = vpop.f32.mrb[39].mxu0 }
 0x15f   :  { %v8976_v25 = vadd.f32 %v882_v22, %v874_v62 }
 0x161   :  { %v886_v26 = vpop.f32.mrb[48].mxu0 }
 0x162   :  { %v8978_v27 = vadd.f32 %v1148_v48, %v886_v26  ;;  %v888_v28 = vpop.f32.mrb[49].mxu0 }
 0x163   :  { %v8981_v31 = vadd.f32 %v1149_v8, %v888_v28 }
 0x164   :  { %v1257_v32 = vadd.f32 %v1256_v30, %v8978_v27 }
 0x165   :  { %v8238_v34 = vpop.f32.mrb[50].mxu0 }
 0x166   :  { %v957_v36 = vpop.f32.mrb[51].mxu0  ;;  %v1258_v40 = vadd.f32 %v1257_v32, %v8981_v31 }
 0x168   :  { %v1259_v44 = vadd.f32 %v1258_v40, %v8976_v25 }
 0x169   :  { %v8241_v38 = vpop.f32.mrb[52].mxu0 }
 0x16a   :  { %v967_v41 = vpop.f32.mrb[53].mxu0 }
 0x16b   :  { %v1088_v42 = vadd.f32 %v967_v41, %v868_v56 }
 0x16d   :  { %v1151_v43 = vadd.f32 %v1088_v42, %v876_v63 }
 0x16f   :  { %v1260_v45 = vadd.f32 %v1259_v44, %v1151_v43 }
 0x171   :  { %1261 = vadd.xlane.f32.xlu0 %v1260_v45 }
 0x1fe   :  { %v1262_v46 = vpop.xlane.xlu0 %1261 }
 0x1ff   :  { %v8986_v48 = vmul.f32 0.00045955883, %v1262_v46 }
 0x201   :  { %v1264_v50 = vsub.f32 %v8938_v29, %v8986_v48  ;;  %v1265_v51 = vsub.f32 %v8940_v37, %v8986_v48  ;;  %v1266_v53 = vsub.f32 %v8942_v39, %v8986_v48  ;;  %v1267_v56 = vsub.f32 %v8944_v47, %v8986_v48 }
 0x202   :  { %v1268_v60 = vsub.f32 %v8946_v49, %v8986_v48  ;;  %v1269_v63 = vsub.f32 %v8948_v57, %v8986_v48  ;;  %v1270_v8 = vsub.f32 %v8950_v59, %v8986_v48  ;;  %v1271_v26 = vsub.f32 %v8952_v9, %v8986_v48 }
 0x203   :  { %v1332_v54 = vmul.f32 %v1264_v50, %v1264_v50  ;;  %v1333_v58 = vmul.f32 %v1265_v51, %v1265_v51  ;;  %v1334_v61 = vmul.f32 %v1266_v53, %v1266_v53  ;;  %v1335_v2 = vmul.f32 %v1267_v56, %v1267_v56 }
 0x204   :  { %v1336_v22 = vmul.f32 %v1268_v60, %v1268_v60  ;;  %v1337_v28 = vmul.f32 %v1269_v63, %v1269_v63  ;;  %v1272_v32 = vsub.f32 %v8954_v23, %v8986_v48  ;;  %v1338_v34 = vmul.f32 %v1270_v8, %v1270_v8 }
 0x205   :  { %v1349_v62 = vadd.f32 %v1333_v58, %v1332_v54  ;;  %v1273_v38 = vsub.f32 %v8958_v33, %v8986_v48  ;;  %v1339_v40 = vmul.f32 %v1271_v26, %v1271_v26  ;;  %v1274_v42 = vsub.f32 %v8960_v35, %v8986_v48 }
 0x206   :  { %v1340_v44 = vmul.f32 %v1272_v32, %v1272_v32  ;;  %v1275_v46 = vsub.f32 %v8967_v52, %v8986_v48  ;;  %v1276_v53 = vsub.f32 %v8970_v55, %v8986_v48  ;;  %v1277_v56 = vsub.f32 %v8978_v27, %v8986_v48 }
 0x207   :  { %v1350_v7 = vadd.f32 %v1349_v62, %v1334_v61  ;;  %v1341_v50 = vmul.f32 %v1273_v38, %v1273_v38  ;;  %v1342_v54 = vmul.f32 %v1274_v42, %v1274_v42  ;;  %v1278_v62 = vsub.f32 %v8981_v31, %v8986_v48 }
 0x208   :  { %v1343_v60 = vmul.f32 %v1275_v46, %v1275_v46  ;;  %v1344_v63 = vmul.f32 %v1276_v53, %v1276_v53  ;;  %v1345_v8 = vmul.f32 %v1277_v56, %v1277_v56  ;;  %v9052_v56 = vld [vmem:[%s11150_s2 + $0x18] sm:$0xff] }
 0x209   :  { %v1351_v24 = vadd.f32 %v1350_v7, %v1335_v2  ;;  %v1279_v7 = vsub.f32 %v8976_v25, %v8986_v48  ;;  %v1346_v26 = vmul.f32 %v1278_v62, %v1278_v62 }
 0x20b   :  { %v1352_v30 = vadd.f32 %v1351_v24, %v1336_v22  ;;  %v1280_v24 = vsub.f32 %v1151_v43, %v8986_v48 }
 0x20d   :  { %v1353_v36 = vadd.f32 %v1352_v30, %v1337_v28  ;;  %v1347_v30 = vmul.f32 %v1279_v7, %v1279_v7 }
 0x20f   :  { %v1354_v41 = vadd.f32 %v1353_v36, %v1338_v34  ;;  %v1348_v34 = vmul.f32 %v1280_v24, %v1280_v24 }
 0x211   :  { %v1355_v45 = vadd.f32 %v1354_v41, %v1339_v40  ;;  %v8629_v40 = vmov 0  }
 0x212   :  { %8531 = vset.pattern.permute.xlu1 %v8629_v40  ;;  %8532 = vset.pattern.permute.xlu0 %v8629_v40 }
 0x213   :  { %v1356_v51 = vadd.f32 %v1355_v45, %v1340_v44  ;;  %v1368_v45 = vld [vmem:[%s11154_s6] sm:$0xff] }
 0x215   :  { %v1357_v58 = vadd.f32 %v1356_v51, %v1341_v50  ;;  %v1372_v50 = vld [vmem:[%s11155_s7] sm:$0xff] }
 0x217   :  { %v1358_v61 = vadd.f32 %v1357_v58, %v1342_v54  ;;  %v9031_v54 = vld [vmem:[%s11150_s2] sm:$0xff]  ;;  %v9038_v58 = vld [vmem:[%s11150_s2 + $0x8] sm:$0xff] }
 0x218   :  { %8244 = vmatprep.mubr.msk.f32.mxu0 %vm1578_vm1, %v9031_v54 }
 0x219   :  { %v1359_v2 = vadd.f32 %v1358_v61, %v1343_v60  ;;  %8245 = vmatmul.mubr.msk.f32.vlgmr.msra.gmra.mrb[54].mxu0 %vm1578_vm1, %v9038_v58 }
 0x21b   :  { %v1360_v22 = vadd.f32 %v1359_v2, %v1344_v63 }
 0x21d   :  { %v1361_v28 = vadd.f32 %v1360_v22, %v1345_v8  ;;  %v9069_v8 = vstv %s1419_s19 }
 0x21f   :  { %v1362_v32 = vadd.f32 %v1361_v28, %v1346_v26 }
 0x221   :  { %v1363_v36 = vadd.f32 %v1362_v32, %v1347_v30 }
 0x223   :  { %v1364_v38 = vadd.f32 %v1363_v36, %v1348_v34 }
 0x225   :  { %1365 = vadd.xlane.f32.xlu0 %v1364_v38 }
 0x2b2   :  { %v1366_v41 = vpop.xlane.xlu0 %1365 }
 0x2b3   :  { %v1367_v42 = vmul.f32 0.00045955883, %v1366_v41 }
 0x2b5   :  { %v1369_v44 = vadd.f32 1e-05, %v1367_v42 }
 0x2b7   :  { %8533 = vrsqrt.f32 %v1369_v44 }
 0x2c1   :  { %v8534_v43 = vpop.eup %8533 }
 0x2c2   :  { %v1371_v46 = vmul.f32 %v8534_v43, %v1368_v45 }
 0x2c4   :  { %1377 = vperm.xlu1 %8531, %v1371_v46   ;;  %v1373_v51 = vmul.f32 %v1371_v46, %v8986_v48  ;;  %v9045_v48 = vld [vmem:[%s11150_s2 + $0x10] sm:$0xff] }
 0x2c5   :  { %8247 = vmatprep.mubr.msk.f32.mxu0 %vm1578_vm1, %v9045_v48 }
 0x2c6   :  { %v1374_v53 = vsub.f32 %v1372_v50, %v1373_v51  ;;  %8248 = vmatmul.mubr.msk.f32.gmra.mrb[56].mxu0 %vm1578_vm1, %v9052_v56 }
 0x2c7   :  { %3018 = vmatprep.mubr.f32.mxu0 %v11163_v3 }
 0x2c8   :  { %1399 = vperm.xlu1 %8531, %v1374_v53  }
 0x343   :  { %v9057_v60 = vpop.permute.xlu1 %1377 }
 0x344   :  { %v1381_v61 = vmul.f32 %v9057_v60, %v8940_v37  ;;  %v1380_v62 = vmul.f32 %v9057_v60, %v8938_v29  ;;  %v1383_v63 = vmul.f32 %v9057_v60, %v8944_v47  ;;  %v1382_v2 = vmul.f32 %v9057_v60, %v8942_v39 }
 0x345   :  { %v1385_v22 = vmul.f32 %v9057_v60, %v8948_v57  ;;  %v1390_v45 = vmul.f32 %v9057_v60, %v8960_v35  ;;  %v1393_v35 = vmul.f32 %v9057_v60, %v8978_v27  ;;  %v1392_v46 = vmul.f32 %v9057_v60, %v8970_v55 }
 0x346   :  { %v1384_v50 = vmul.f32 %v9057_v60, %v8946_v49  ;;  %v1395_v53 = vmul.f32 %v9057_v60, %v8976_v25 }
 0x347   :  { %v9067_v7 = vpop.permute.xlu1 %1399 }
 0x348   :  { %v1403_v24 = vadd.f32 %v9067_v7, %v1381_v61  ;;  %v1402_v37 = vadd.f32 %v9067_v7, %v1380_v62  ;;  %v1405_v26 = vadd.f32 %v9067_v7, %v1383_v63  ;;  %v1404_v29 = vadd.f32 %v9067_v7, %v1382_v2 }
 0x349   :  { %v1407_v47 = vadd.f32 %v9067_v7, %v1385_v22  ;;  %v1415_v27 = vadd.f32 %v9067_v7, %v1393_v35  ;;  %v1414_v51 = vadd.f32 %v9067_v7, %v1392_v46  ;;  %v1394_v61 = vmul.f32 %v9057_v60, %v8981_v31 }
 0x34a   :  { %vm1421_vm2 = vcmp.ge.f32.partialorder %v1403_v24, 0.0  ;;  %v1439_v39 = vmul.f32 %v9069_v8, %v1403_v24  ;;  %vm1420_vm3 = vcmp.ge.f32.partialorder %v1402_v37, 0.0  ;;  %v1438_v28 = vmul.f32 %v9069_v8, %v1402_v37 }
 0x34b   :  { %vm1423_vm4 = vcmp.ge.f32.partialorder %v1405_v26, 0.0  ;;  %v1441_v30 = vmul.f32 %v9069_v8, %v1405_v26  ;;  %v1440_v57 = vmul.f32 %v9069_v8, %v1404_v29  ;;  %vm1422_vm5 = vcmp.ge.f32.partialorder %v1404_v29, 0.0 }
 0x34c   :  { %v1456_v32 = vsel %vm1421_vm2, %v1403_v24, %v1439_v39  ;;  %v1455_v34 = vsel %vm1420_vm3, %v1402_v37, %v1438_v28  ;;  %v1443_v36 = vmul.f32 %v9069_v8, %v1407_v47  ;;  %vm1425_vm6 = vcmp.ge.f32.partialorder %v1407_v47, 0.0 }
 0x34d   :  { %v9084_v38 = vpack.c.bf16 %v1456_v32, %v8711_v0  ;;  %v9087_v40 = vpack.c.bf16 %v1455_v34, %v8716_v1  ;;  %v1458_v41 = vsel %vm1423_vm4, %v1405_v26, %v1441_v30  ;;  %v1457_v44 = vsel %vm1422_vm5, %v1404_v29, %v1440_v57 }
 0x34e   :  { %v9092_v42 = vpack.c.bf16 %v1458_v41, %v8728_v4  ;;  %v1460_v0 = vsel %vm1425_vm6, %v1407_v47, %v1443_v36  ;;  %v1412_v1 = vadd.f32 %v9067_v7, %v1390_v45  ;;  %v9101_v43 = vpack.c.bf16 %v1457_v44, %v8733_v5 }
 0x34f   :  { %11178 = vst [vmem:[#allocation7_spill] sm:$0xff] %v9084_v38  ;;  %11179 = vst [vmem:[#allocation8_spill] sm:$0xff] %v9087_v40  ;;  %8281 = vmatprep.subr.bf16.mxu1 %v9084_v38  ;;  %8313 = vmatprep.subr.bf16.mxu0 %v9084_v38  ;;  %v9106_v4 = vpack.c.bf16 %v1460_v0, %v8739_v6  ;;  %v1387_v6 = vmul.f32 %v9057_v60, %v8952_v9  ;;  %vm1433_vm8 = vcmp.ge.f32.partialorder %v1415_v27, 0.0  ;;  %vm2941_vm3 = vcmask 195584  }
 0x350   :  { %8283 = vmatpush1.bf16.msra.mxu1 %v9087_v40  ;;  %8315 = vmatpush1.bf16.msra.mxu0 %v9087_v40  ;;  %vm1430_vm7 = vcmp.ge.f32.partialorder %v1412_v1, 0.0  ;;  %v1448_v5 = vmul.f32 %v9069_v8, %v1412_v1  ;;  %v1406_v49 = vadd.f32 %v9067_v7, %v1384_v50  ;;  %v1451_v9 = vmul.f32 %v9069_v8, %v1415_v27 }
 0x351   :  { %8285 = vmatprep.subr.bf16.mxu1 %v9092_v42  ;;  %v1409_v62 = vadd.f32 %v9067_v7, %v1387_v6  ;;  %vm1432_vm9 = vcmp.ge.f32.partialorder %v1414_v51, 0.0  ;;  %v1450_v63 = vmul.f32 %v9069_v8, %v1414_v51  ;;  %v1417_v25 = vadd.f32 %v9067_v7, %v1395_v53 }
 0x352   :  { %v9122_v55 = vsel %vm1430_vm7, %v1412_v1, %v1448_v5  ;;  %v1416_v2 = vadd.f32 %v9067_v7, %v1394_v61  ;;  %v9137_v31 = vsel %vm1433_vm8, %v1415_v27, %v1451_v9  ;;  %v1442_v37 = vmul.f32 %v9069_v8, %v1406_v49 }
 0x353   :  { %8015 = vmatmul.mubr.msk.f32.vlgmr.msra.gmra.mrb[0].mxu1 %vm1578_vm1, %v9031_v54  ;;  %v9139_v22 = vsel %vm1432_vm9, %v1414_v51, %v1450_v63  ;;  %vm1435_vm10 = vcmp.ge.f32.partialorder %v1417_v25, 0.0  ;;  %v1453_v24 = vmul.f32 %v9069_v8, %v1417_v25  ;;  %vm1424_vm12 = vcmp.ge.f32.partialorder %v1406_v49, 0.0 }
 0x354   :  { %8287 = vmatpush1.bf16.msra.mxu1 %v9101_v43  ;;  %1661 = vmatprep.mubr.f32.mxu1 %v11163_v3  ;;  %vm1434_vm11 = vcmp.ge.f32.partialorder %v1416_v2, 0.0  ;;  %v1452_v26 = vmul.f32 %v9069_v8, %v1416_v2  ;;  %v1445_v29 = vmul.f32 %v9069_v8, %v1409_v62  ;;  %vm1427_vm13 = vcmp.ge.f32.partialorder %v1409_v62, 0.0 }
 0x355   :  { %8289 = vmatprep.subr.bf16.mxu1 %v9106_v4  ;;  %v9148_v47 = vsel %vm1435_vm10, %v1417_v25, %v1453_v24  ;;  %v1459_v28 = vsel %vm1424_vm12, %v1406_v49, %v1442_v37  ;;  %v1386_v34 = vmul.f32 %v9057_v60, %v8950_v59  ;;  %v1389_v36 = vmul.f32 %v9057_v60, %v8958_v33 }
 0x356   :  { %v9150_v39 = vsel %vm1434_vm11, %v1416_v2, %v1452_v26  ;;  %v1462_v30 = vsel %vm1427_vm13, %v1409_v62, %v1445_v29  ;;  %v9156_v57 = vpack.c.bf16 %v1459_v28, %v8775_v10  ;;  %v1388_v1 = vmul.f32 %v9057_v60, %v8954_v23 }
 0x357   :  { %8016 = vmatmul.mubr.msk.f32.gmra.mrb[2].mxu1 %vm1578_vm1, %v9038_v58  ;;  %v9161_v32 = vpack.c.bf16 %v1462_v30, %v8780_v11  ;;  %v1408_v10 = vadd.f32 %v9067_v7, %v1386_v34  ;;  %v1411_v11 = vadd.f32 %v9067_v7, %v1389_v36  ;;  %v1391_v35 = vmul.f32 %v9057_v60, %v8967_v52 }
 0x358   :  { %1667 = vmatprep.mubr.f32.mxu1 %v11163_v3 }
 0x359   :  { %v1444_v41 = vmul.f32 %v9069_v8, %v1408_v10  ;;  %vm1426_vm14 = vcmp.ge.f32.partialorder %v1408_v10, 0.0  ;;  %v1447_v59 = vmul.f32 %v9069_v8, %v1411_v11  ;;  %vm1429_vm15 = vcmp.ge.f32.partialorder %v1411_v11, 0.0 }
 0x35b   :  { %8017 = vmatmul.mubr.msk.f32.gmra.mrb[4].mxu1 %vm1578_vm1, %v9045_v48  ;;  %v1461_v33 = vsel %vm1426_vm14, %v1408_v10, %v1444_v41  ;;  %v1464_v44 = vsel %vm1429_vm15, %v1411_v11, %v1447_v59 }
 0x35c   :  { %1673 = vmatprep.mubr.f32.mxu1 %v11163_v3  ;;  %v9184_v45 = vpack.c.bf16 %v1461_v33, %v8799_v12  ;;  %v9189_v0 = vpack.c.bf16 %v1464_v44, %v8804_v13  ;;  %v1410_v12 = vadd.f32 %v9067_v7, %v1388_v1  ;;  %v1413_v13 = vadd.f32 %v9067_v7, %v1391_v35 }
 0x35e   :  { %v1446_v46 = vmul.f32 %v9069_v8, %v1410_v12  ;;  %vm1428_vm0 = vcmp.ge.f32.partialorder %v1410_v12, 0.0  ;;  %v1449_v23 = vmul.f32 %v9069_v8, %v1413_v13  ;;  %vm1431_vm2 = vcmp.ge.f32.partialorder %v1413_v13, 0.0  ;;  %v8246_v8 = vpop.f32.mrb[54].mxu0 }
 0x35f   :  { %8018 = vmatmul.mubr.msk.f32.gmra.mrb[6].mxu1 %vm1578_vm1, %v9052_v56  ;;  %v2369_v50 = vpop.f32.mrb[55].mxu0 }
 0x360   :  { %1744 = vmatprep.mubr.f32.mxu1 %v11163_v3  ;;  %v1463_v52 = vsel %vm1428_vm0, %v1410_v12, %v1446_v46  ;;  %v1466_v60 = vsel %vm1431_vm2, %v1413_v13, %v1449_v23 }
 0x361   :  { %v9212_v7 = vpack.c.bf16 %v1463_v52, %v8823_v14  ;;  %v9217_v5 = vpack.c.bf16 %v1466_v60, %v8828_v15  ;;  %v9233_v14 = vpack.c.bf16 %v9122_v55, %v8847_v16  ;;  %v9239_v15 = vpack.c.bf16 %v9137_v31, %v8852_v17 }
 0x362   :  { %v9255_v16 = vpack.c.bf16 %v9139_v22, %v8871_v18  ;;  %v9261_v17 = vpack.c.bf16 %v9148_v47, %v8876_v19  ;;  %v9277_v19 = vpack.c.bf16 %v9150_v39, %v8895_v20  ;;  %v9307_v20 = vld [vmem:[%s11151_s3] sm:$0xff] }
 0x363   :  { %8019 = vmatmul.mubr.msk.f32.vlgmr.msra.gmra.mrb[8].mxu1 %vm1578_vm1, %v9031_v54 }
 0x364   :  { %8291 = vmatpush1.bf16.msra.mxu1 %v9156_v57  ;;  %1750 = vmatprep.mubr.f32.mxu1 %v11163_v3  ;;  %11180 = vst [vmem:[#allocation9_spill] sm:$0xff] %v9255_v16  ;;  %11181 = vst [vmem:[#allocation10_spill] sm:$0xff] %v9261_v17 }
 0x365   :  { %8293 = vmatprep.subr.bf16.mxu1 %v9161_v32  ;;  %11182 = vst [vmem:[#allocation11_spill] sm:$0xff] %v9277_v19 }
 0x367   :  { %8020 = vmatmul.mubr.msk.f32.gmra.mrb[10].mxu1 %vm1578_vm1, %v9038_v58 }
 0x368   :  { %1756 = vmatprep.mubr.f32.mxu1 %v11163_v3 }
 0x36b   :  { %8021 = vmatmul.mubr.msk.f32.gmra.mrb[0].mxu1 %vm1578_vm1, %v9045_v48 }
 0x36c   :  { %1762 = vmatprep.mubr.f32.mxu1 %v11163_v3 }
 0x36f   :  { %8022 = vmatmul.mubr.msk.f32.gmra.mrb[12].mxu1 %vm1578_vm1, %v9052_v56 }
 0x370   :  { %1833 = vmatprep.mubr.f32.mxu1 %v11163_v3 }
 0x373   :  { %8023 = vmatmul.mubr.msk.f32.vlgmr.msra.gmra.mrb[14].mxu1 %vm1578_vm1, %v9031_v54 }
 0x374   :  { %8295 = vmatpush1.bf16.msra.mxu1 %v9184_v45  ;;  %1839 = vmatprep.mubr.f32.mxu1 %v11163_v3 }
 0x375   :  { %8297 = vmatprep.subr.bf16.mxu1 %v9189_v0 }
 0x377   :  { %8024 = vmatmul.mubr.msk.f32.gmra.mrb[16].mxu1 %vm1578_vm1, %v9038_v58 }
 0x378   :  { %1845 = vmatprep.mubr.f32.mxu1 %v11163_v3 }
 0x37b   :  { %8025 = vmatmul.mubr.msk.f32.gmra.mrb[8].mxu1 %vm1578_vm1, %v9045_v48 }
 0x37c   :  { %1851 = vmatprep.mubr.f32.mxu1 %v11163_v3 }
 0x37f   :  { %8026 = vmatmul.mubr.msk.f32.gmra.mrb[18].mxu1 %vm1578_vm1, %v9052_v56 }
 0x380   :  { %1922 = vmatprep.mubr.f32.mxu1 %v11163_v3 }
 0x383   :  { %8027 = vmatmul.mubr.msk.f32.vlgmr.msra.gmra.mrb[20].mxu1 %vm1578_vm1, %v9031_v54 }
 0x384   :  { %8299 = vmatpush1.bf16.msra.mxu1 %v9212_v7  ;;  %1928 = vmatprep.mubr.f32.mxu1 %v11163_v3 }
 0x385   :  { %8301 = vmatprep.subr.bf16.mxu1 %v9217_v5 }
 0x387   :  { %8028 = vmatmul.mubr.msk.f32.gmra.mrb[22].mxu1 %vm1578_vm1, %v9038_v58 }
 0x388   :  { %1934 = vmatprep.mubr.f32.mxu1 %v11163_v3 }
 0x38b   :  { %8029 = vmatmul.mubr.msk.f32.gmra.mrb[14].mxu1 %vm1578_vm1, %v9045_v48 }
 0x38c   :  { %1940 = vmatprep.mubr.f32.mxu1 %v11163_v3 }
 0x38f   :  { %8030 = vmatmul.mubr.msk.f32.gmra.mrb[24].mxu1 %vm1578_vm1, %v9052_v56 }
 0x390   :  { %2011 = vmatprep.mubr.f32.mxu1 %v11163_v3 }
 0x393   :  { %8031 = vmatmul.mubr.msk.f32.vlgmr.msra.gmra.mrb[26].mxu1 %vm1578_vm1, %v9031_v54 }
 0x394   :  { %8303 = vmatpush1.bf16.msra.mxu1 %v9233_v14  ;;  %2017 = vmatprep.mubr.f32.mxu1 %v11163_v3 }
 0x395   :  { %8305 = vmatprep.subr.bf16.mxu1 %v9239_v15 }
 0x397   :  { %8032 = vmatmul.mubr.msk.f32.gmra.mrb[28].mxu1 %vm1578_vm1, %v9038_v58 }
 0x398   :  { %2023 = vmatprep.mubr.f32.mxu1 %v11163_v3 }
 0x399   :  { %v8249_v18 = vpop.f32.mrb[56].mxu0 }
 0x39b   :  { %8033 = vmatmul.mubr.msk.f32.gmra.mrb[20].mxu1 %vm1578_vm1, %v9045_v48 }
 0x39c   :  { %2029 = vmatprep.mubr.f32.mxu1 %v11163_v3 }
 0x39f   :  { %8034 = vmatmul.mubr.msk.f32.gmra.mrb[30].mxu1 %vm1578_vm1, %v9052_v56 }
 0x3a0   :  { %2100 = vmatprep.mubr.f32.mxu1 %v11163_v3 }
 0x3a3   :  { %8035 = vmatmul.mubr.msk.f32.vlgmr.msra.gmra.mrb[32].mxu1 %vm1578_vm1, %v9031_v54 }
 0x3a4   :  { %8307 = vmatpush1.bf16.msra.mxu1 %v9255_v16  ;;  %2106 = vmatprep.mubr.f32.mxu1 %v11163_v3 }
 0x3a5   :  { %8309 = vmatprep.subr.bf16.mxu1 %v9261_v17 }
 0x3a7   :  { %8036 = vmatmul.mubr.msk.f32.gmra.mrb[34].mxu1 %vm1578_vm1, %v9038_v58 }
 0x3a8   :  { %2112 = vmatprep.mubr.f32.mxu1 %v11163_v3 }
 0x3ab   :  { %8037 = vmatmul.mubr.msk.f32.gmra.mrb[26].mxu1 %vm1578_vm1, %v9045_v48 }
 0x3ac   :  { %2118 = vmatprep.mubr.f32.mxu1 %v11163_v3 }
 0x3af   :  { %8038 = vmatmul.mubr.msk.f32.gmra.mrb[36].mxu1 %vm1578_vm1, %v9052_v56 }
 0x3b0   :  { %2189 = vmatprep.mubr.f32.mxu1 %v11163_v3 }
 0x3b3   :  { %8039 = vmatmul.mubr.msk.f32.vlgmr.msra.gmra.mrb[38].mxu1 %vm1578_vm1, %v9031_v54 }
 0x3b4   :  { %8311 = vmatpush1.bf16.msra.mxu1 %v9277_v19  ;;  %2195 = vmatprep.mubr.f32.mxu1 %v11163_v3 }
 0x3b5   :  { %8250 = vmatprep.subr.mxu1 %v8900_v21 }
 0x3b7   :  { %8040 = vmatmul.mubr.msk.f32.gmra.mrb[40].mxu1 %vm1578_vm1, %v9038_v58 }
 0x3b8   :  { %2201 = vmatprep.mubr.f32.mxu1 %v11163_v3 }
 0x3bb   :  { %8041 = vmatmul.mubr.msk.f32.gmra.mrb[32].mxu1 %vm1578_vm1, %v9045_v48 }
 0x3bc   :  { %2207 = vmatprep.mubr.f32.mxu1 %v11163_v3 }
 0x3bf   :  { %8042 = vmatmul.mubr.msk.f32.gmra.mrb[42].mxu1 %vm1578_vm1, %v9052_v56 }
 0x3c0   :  { %2278 = vmatprep.mubr.f32.mxu1 %v11163_v3 }
 0x3c3   :  { %8043 = vmatmul.mubr.msk.f32.vlgmr.msra.gmra.mrb[44].mxu1 %vm1578_vm1, %v9031_v54  ;;  %v9321_v54 = vpop.f32.mrb[57].mxu0 }
 0x3c4   :  { %8251 = vmatpush3.msra.mxu1 %v8900_v21  ;;  %2284 = vmatprep.mubr.f32.mxu1 %v11163_v3  ;;  %v9316_v21 = vld [vmem:[%s11151_s3 + $0x8] sm:$0xff] }
 0x3c5   :  { %8345 = vmatprep.subr.bf16.mxu1 %v9084_v38 }
 0x3c7   :  { %8044 = vmatmul.mubr.msk.f32.gmra.mrb[46].mxu1 %vm1578_vm1, %v9038_v58 }
 0x3c8   :  { %2290 = vmatprep.mubr.f32.mxu1 %v11163_v3 }
 0x3cb   :  { %8045 = vmatmul.mubr.msk.f32.gmra.mrb[38].mxu1 %vm1578_vm1, %v9045_v48 }
 0x3cc   :  { %2296 = vmatprep.mubr.f32.mxu1 %v11163_v3 }
 0x3cf   :  { %8046 = vmatmul.mubr.msk.f32.gmra.mrb[48].mxu1 %vm1578_vm1, %v9052_v56 }
 0x3d0   :  { %8252 = vmatprep.mubr.msk.f32.mxu1 %vm2941_vm3, %v9307_v20 }
 0x3d3   :  { %8253 = vmatmul.mubr.msk.f32.vlgmr.msra.gmra.mrb[50].mxu1 %vm2941_vm3, %v9316_v21 }
 0x3d4   :  { %8347 = vmatpush1.bf16.msra.mxu1 %v9087_v40 }
 0x42a   :  { %v1663_v58 = vpop.f32.mrb[2].mxu1 }
 0x42b   :  { %v1665_v48 = vpop.f32.mrb[3].mxu1 }
 0x42e   :  { %v1669_v6 = vpop.f32.mrb[4].mxu1 }
 0x42f   :  { %v1671_v27 = vpop.f32.mrb[5].mxu1 }
 0x430   :  { %v2548_v56 = vadd.f32 %v1671_v27, %v1663_v58 }
 0x432   :  { %v1675_v51 = vpop.f32.mrb[6].mxu1 }
 0x433   :  { %v1677_v55 = vpop.f32.mrb[7].mxu1 }
 0x434   :  { %v9323_v53 = vadd.f32 %v1677_v55, %v1669_v6 }
 0x43a   :  { %v1752_v61 = vpop.f32.mrb[10].mxu1 }
 0x43b   :  { %v1754_v49 = vpop.f32.mrb[11].mxu1 }
 0x43e   :  { %v1758_v62 = vpop.f32.mrb[0].mxu1 }
 0x43f   :  { %v2549_v9 = vadd.f32 %v1758_v62, %v1665_v48  ;;  %v1760_v63 = vpop.f32.mrb[1].mxu1 }
 0x440   :  { %v2550_v25 = vadd.f32 %v1760_v63, %v1752_v61 }
 0x442   :  { %v1764_v2 = vpop.f32.mrb[12].mxu1 }
 0x443   :  { %v9325_v31 = vadd.f32 %v2548_v56, %v1764_v2  ;;  %v1766_v22 = vpop.f32.mrb[13].mxu1 }
 0x444   :  { %v9327_v24 = vadd.f32 %v2549_v9, %v1766_v22 }
 0x445   :  { %v2657_v9 = vadd.f32 %v9325_v31, %v9323_v53 }
 0x44a   :  { %v1841_v37 = vpop.f32.mrb[16].mxu1 }
 0x44b   :  { %v1843_v26 = vpop.f32.mrb[17].mxu1 }
 0x44e   :  { %v1847_v29 = vpop.f32.mrb[8].mxu1 }
 0x44f   :  { %v2551_v47 = vadd.f32 %v1847_v29, %v1754_v49  ;;  %v1849_v39 = vpop.f32.mrb[9].mxu1 }
 0x450   :  { %v2552_v28 = vadd.f32 %v1849_v39, %v1841_v37  ;;  %v2658_v37 = vadd.f32 %v2657_v9, %v9327_v24 }
 0x452   :  { %v1853_v30 = vpop.f32.mrb[18].mxu1 }
 0x453   :  { %v9329_v34 = vadd.f32 %v2550_v25, %v1853_v30  ;;  %v1855_v36 = vpop.f32.mrb[19].mxu1 }
 0x454   :  { %v9331_v10 = vadd.f32 %v2551_v47, %v1855_v36 }
 0x45a   :  { %v1930_v11 = vpop.f32.mrb[22].mxu1 }
 0x45b   :  { %v1932_v41 = vpop.f32.mrb[23].mxu1 }
 0x45e   :  { %v1936_v59 = vpop.f32.mrb[14].mxu1 }
 0x45f   :  { %v2553_v33 = vadd.f32 %v1936_v59, %v1843_v26  ;;  %v1938_v44 = vpop.f32.mrb[15].mxu1  ;;  %v2659_v26 = vadd.f32 %v2658_v37, %v9329_v34 }
 0x460   :  { %v2554_v1 = vadd.f32 %v1938_v44, %v1930_v11 }
 0x461   :  { %v2660_v47 = vadd.f32 %v2659_v26, %v9331_v10 }
 0x462   :  { %v1942_v35 = vpop.f32.mrb[24].mxu1 }
 0x463   :  { %v9333_v12 = vadd.f32 %v2552_v28, %v1942_v35  ;;  %v1944_v13 = vpop.f32.mrb[25].mxu1 }
 0x464   :  { %v9335_v46 = vadd.f32 %v2553_v33, %v1944_v13 }
 0x465   :  { %v2661_v28 = vadd.f32 %v2660_v47, %v9333_v12 }
 0x467   :  { %v2662_v59 = vadd.f32 %v2661_v28, %v9335_v46 }
 0x46a   :  { %v2019_v23 = vpop.f32.mrb[28].mxu1 }
 0x46b   :  { %v2021_v52 = vpop.f32.mrb[29].mxu1 }
 0x46e   :  { %v2025_v60 = vpop.f32.mrb[20].mxu1 }
 0x46f   :  { %v2555_v8 = vadd.f32 %v2025_v60, %v1932_v41  ;;  %v2027_v50 = vpop.f32.mrb[21].mxu1 }
 0x470   :  { %v2556_v18 = vadd.f32 %v2027_v50, %v2019_v23 }
 0x472   :  { %v2031_v58 = vpop.f32.mrb[30].mxu1 }
 0x473   :  { %v9337_v48 = vadd.f32 %v2554_v1, %v2031_v58  ;;  %v2033_v6 = vpop.f32.mrb[31].mxu1 }
 0x474   :  { %v9339_v27 = vadd.f32 %v2555_v8, %v2033_v6 }
 0x475   :  { %v2663_v44 = vadd.f32 %v2662_v59, %v9337_v48 }
 0x47a   :  { %v2108_v56 = vpop.f32.mrb[34].mxu1 }
 0x47b   :  { %v2110_v51 = vpop.f32.mrb[35].mxu1 }
 0x47e   :  { %v2114_v55 = vpop.f32.mrb[26].mxu1 }
 0x47f   :  { %v2557_v61 = vadd.f32 %v2114_v55, %v2021_v52  ;;  %v2116_v49 = vpop.f32.mrb[27].mxu1  ;;  %v2664_v52 = vadd.f32 %v2663_v44, %v9339_v27 }
 0x480   :  { %v2558_v62 = vadd.f32 %v2116_v49, %v2108_v56 }
 0x482   :  { %v2120_v63 = vpop.f32.mrb[36].mxu1 }
 0x483   :  { %v9343_v25 = vadd.f32 %v2556_v18, %v2120_v63  ;;  %v2122_v2 = vpop.f32.mrb[37].mxu1 }
 0x484   :  { %v9345_v22 = vadd.f32 %v2557_v61, %v2122_v2 }
 0x485   :  { %v2665_v50 = vadd.f32 %v2664_v52, %v9343_v25 }
 0x487   :  { %v2666_v56 = vadd.f32 %v2665_v50, %v9345_v22 }
 0x48a   :  { %v2197_v29 = vpop.f32.mrb[40].mxu1 }
 0x48b   :  { %v2199_v39 = vpop.f32.mrb[41].mxu1 }
 0x48e   :  { %v2203_v30 = vpop.f32.mrb[32].mxu1 }
 0x48f   :  { %v2559_v36 = vadd.f32 %v2203_v30, %v2110_v51  ;;  %v2205_v11 = vpop.f32.mrb[33].mxu1 }
 0x490   :  { %v2560_v41 = vadd.f32 %v2205_v11, %v2197_v29 }
 0x492   :  { %v2209_v33 = vpop.f32.mrb[42].mxu1 }
 0x493   :  { %v9353_v1 = vadd.f32 %v2558_v62, %v2209_v33  ;;  %v2211_v35 = vpop.f32.mrb[43].mxu1 }
 0x494   :  { %v9355_v13 = vadd.f32 %v2559_v36, %v2211_v35 }
 0x495   :  { %v2667_v55 = vadd.f32 %v2666_v56, %v9353_v1 }
 0x496   :  { %v2280_v23 = vpop.f32.mrb[44].mxu1 }
 0x497   :  { %v2500_v60 = vadd.f32 %v9321_v54, %v2280_v23  ;;  %v2282_v8 = vpop.f32.mrb[45].mxu1  ;;  %v2668_v63 = vadd.f32 %v2667_v55, %v9355_v13 }
 0x49a   :  { %v2286_v18 = vpop.f32.mrb[46].mxu1 }
 0x49b   :  { %v2288_v58 = vpop.f32.mrb[47].mxu1 }
 0x49c   :  { %v9360_v6 = vadd.f32 %v2500_v60, %v2288_v58 }
 0x49e   :  { %v2292_v51 = vpop.f32.mrb[38].mxu1 }
 0x49f   :  { %v2561_v61 = vadd.f32 %v2292_v51, %v2199_v39  ;;  %v2294_v49 = vpop.f32.mrb[39].mxu1 }
 0x4a0   :  { %v9364_v62 = vadd.f32 %v2294_v49, %v2286_v18 }
 0x4a2   :  { %v2298_v9 = vpop.f32.mrb[48].mxu1 }
 0x4a3   :  { %v9367_v54 = vadd.f32 %v2560_v41, %v2298_v9  ;;  %v2300_v2 = vpop.f32.mrb[49].mxu1 }
 0x4a4   :  { %v9369_v37 = vadd.f32 %v2561_v61, %v2300_v2 }
 0x4a5   :  { %v2669_v26 = vadd.f32 %v2668_v63, %v9367_v54 }
 0x4a6   :  { %v8254_v29 = vpop.f32.mrb[50].mxu1 }
 0x4a7   :  { %v2670_v47 = vadd.f32 %v2669_v26, %v9369_v37  ;;  %v3732_v28 = vpop.f32.mrb[51].mxu1 }
 0x4a9   :  { %v2671_v30 = vadd.f32 %v2670_v47, %v9364_v62 }
 0x4ab   :  { %v2672_v39 = vadd.f32 %v2671_v30, %v9360_v6 }
 0x4ad   :  { %2673 = vadd.xlane.f32.xlu0 %v2672_v39 }
 0x53a   :  { %v2674_v36 = vpop.xlane.xlu0 %2673 }
 0x53b   :  { %v2675_v11 = vmul.f32 0.00045955883, %v2674_v36 }
 0x53d   :  { %v2676_v59 = vsub.f32 %v9323_v53, %v2675_v11  ;;  %v2677_v41 = vsub.f32 %v9325_v31, %v2675_v11  ;;  %v2678_v33 = vsub.f32 %v9327_v24, %v2675_v11  ;;  %v2679_v23 = vsub.f32 %v9329_v34, %v2675_v11 }
 0x53e   :  { %v2680_v52 = vsub.f32 %v9331_v10, %v2675_v11  ;;  %v2681_v50 = vsub.f32 %v9333_v12, %v2675_v11  ;;  %v2682_v56 = vsub.f32 %v9335_v46, %v2675_v11  ;;  %v2683_v61 = vsub.f32 %v9337_v48, %v2675_v11 }
 0x53f   :  { %v2710_v44 = vmul.f32 %v2676_v59, %v2676_v59  ;;  %v2711_v35 = vmul.f32 %v2677_v41, %v2677_v41  ;;  %v2712_v60 = vmul.f32 %v2678_v33, %v2678_v33  ;;  %v2713_v18 = vmul.f32 %v2679_v23, %v2679_v23 }
 0x540   :  { %v2714_v51 = vmul.f32 %v2680_v52, %v2680_v52  ;;  %v2715_v49 = vmul.f32 %v2681_v50, %v2681_v50  ;;  %v2684_v63 = vsub.f32 %v9339_v27, %v2675_v11  ;;  %v2716_v2 = vmul.f32 %v2682_v56, %v2682_v56 }
 0x541   :  { %v2727_v8 = vadd.f32 %v2711_v35, %v2710_v44  ;;  %v2685_v29 = vsub.f32 %v9343_v25, %v2675_v11  ;;  %v2717_v47 = vmul.f32 %v2683_v61, %v2683_v61  ;;  %v2686_v30 = vsub.f32 %v9345_v22, %v2675_v11 }
 0x542   :  { %v2718_v39 = vmul.f32 %v2684_v63, %v2684_v63  ;;  %v2687_v59 = vsub.f32 %v9353_v1, %v2675_v11  ;;  %v2688_v44 = vsub.f32 %v9355_v13, %v2675_v11  ;;  %v2689_v52 = vsub.f32 %v9367_v54, %v2675_v11 }
 0x543   :  { %v2728_v58 = vadd.f32 %v2727_v8, %v2712_v60  ;;  %v2719_v41 = vmul.f32 %v2685_v29, %v2685_v29  ;;  %v2720_v35 = vmul.f32 %v2686_v30, %v2686_v30  ;;  %v2690_v50 = vsub.f32 %v9369_v37, %v2675_v11 }
 0x544   :  { %v2721_v60 = vmul.f32 %v2687_v59, %v2687_v59  ;;  %v2691_v56 = vsub.f32 %v9364_v62, %v2675_v11  ;;  %v2692_v61 = vsub.f32 %v9360_v6, %v2675_v11  ;;  %v8052_v6 = vld [vmem:[%s11155_s7 + $0x8] sm:$0xff] }
 0x545   :  { %v2729_v55 = vadd.f32 %v2728_v58, %v2713_v18  ;;  %v2722_v18 = vmul.f32 %v2688_v44, %v2688_v44 }
 0x546   :  { %v2725_v63 = vmul.f32 %v2691_v56, %v2691_v56 }
 0x547   :  { %v2730_v9 = vadd.f32 %v2729_v55, %v2714_v51  ;;  %v2723_v51 = vmul.f32 %v2689_v52, %v2689_v52 }
 0x549   :  { %v2731_v26 = vadd.f32 %v2730_v9, %v2715_v49  ;;  %v2724_v49 = vmul.f32 %v2690_v50, %v2690_v50 }
 0x54b   :  { %v2732_v28 = vadd.f32 %v2731_v26, %v2716_v2  ;;  %v2726_v26 = vmul.f32 %v2692_v61, %v2692_v61 }
 0x54d   :  { %v2733_v36 = vadd.f32 %v2732_v28, %v2717_v47 }
 0x54f   :  { %v2734_v33 = vadd.f32 %v2733_v36, %v2718_v39  ;;  %v8051_v36 = vld [vmem:[%s11154_s6 + $0x8] sm:$0xff] }
 0x551   :  { %v2735_v23 = vadd.f32 %v2734_v33, %v2719_v41 }
 0x553   :  { %v2736_v8 = vadd.f32 %v2735_v23, %v2720_v35  ;;  %v9401_v35 = vld [vmem:[%s11151_s3 + $0x10] sm:$0xff]  ;;  %v9408_v23 = vld [vmem:[%s11151_s3 + $0x18] sm:$0xff] }
 0x554   :  { %8255 = vmatprep.mubr.msk.f32.mxu1 %vm2941_vm3, %v9401_v35 }
 0x555   :  { %v2737_v58 = vadd.f32 %v2736_v8, %v2721_v60  ;;  %8256 = vmatmul.mubr.msk.f32.gmra.mrb[52].mxu1 %vm2941_vm3, %v9408_v23 }
 0x556   :  { %4398 = vmatprep.mubr.f32.mxu1 %v11163_v3 }
 0x557   :  { %v2738_v55 = vadd.f32 %v2737_v58, %v2722_v18  ;;  %v9423_v18 = vstv %s8053_s29 }
 0x559   :  { %v2739_v9 = vadd.f32 %v2738_v55, %v2723_v51 }
 0x55b   :  { %v2740_v2 = vadd.f32 %v2739_v9, %v2724_v49 }
 0x55d   :  { %v2741_v29 = vadd.f32 %v2740_v2, %v2725_v63 }
 0x55f   :  { %v2742_v47 = vadd.f32 %v2741_v29, %v2726_v26 }
 0x561   :  { %2743 = vadd.xlane.f32.xlu1 %v2742_v47 }
 0x5ee   :  { %v2744_v28 = vpop.xlane.xlu1 %2743 }
 0x5ef   :  { %v2745_v30 = vmul.f32 0.00045955883, %v2744_v28 }
 0x5f1   :  { %v2748_v39 = vadd.f32 1e-05, %v2745_v30 }
 0x5f3   :  { %8535 = vrsqrt.f32 %v2748_v39 }
 0x5fd   :  { %v8536_v59 = vpop.eup %8535 }
 0x5fe   :  { %v2750_v41 = vmul.f32 %v8536_v59, %v8051_v36 }
 0x600   :  { %2757 = vperm.xlu0 %8532, %v2750_v41   ;;  %v2753_v33 = vmul.f32 %v2750_v41, %v2675_v11 }
 0x602   :  { %v2754_v44 = vsub.f32 %v8052_v6, %v2753_v33 }
 0x604   :  { %2779 = vperm.xlu1 %8531, %v2754_v44  }
 0x67f   :  { %v9413_v11 = vpop.permute.xlu0 %2757 }
 0x680   :  { %v2761_v52 = vmul.f32 %v9413_v11, %v9325_v31  ;;  %v2760_v60 = vmul.f32 %v9413_v11, %v9323_v53  ;;  %v2763_v8 = vmul.f32 %v9413_v11, %v9329_v34  ;;  %v2762_v55 = vmul.f32 %v9413_v11, %v9327_v24 }
 0x681   :  { %v2765_v26 = vmul.f32 %v9413_v11, %v9333_v12  ;;  %v2764_v47 = vmul.f32 %v9413_v11, %v9331_v10  ;;  %v2767_v36 = vmul.f32 %v9413_v11, %v9337_v48  ;;  %v2766_v41 = vmul.f32 %v9413_v11, %v9335_v46 }
 0x683   :  { %v9421_v50 = vpop.permute.xlu1 %2779 }
 0x684   :  { %v2783_v58 = vadd.f32 %v9421_v50, %v2761_v52  ;;  %v2782_v56 = vadd.f32 %v9421_v50, %v2760_v60  ;;  %v2785_v51 = vadd.f32 %v9421_v50, %v2763_v8  ;;  %v2784_v34 = vadd.f32 %v9421_v50, %v2762_v55 }
 0x685   :  { %v2787_v29 = vadd.f32 %v9421_v50, %v2765_v26  ;;  %v2786_v28 = vadd.f32 %v9421_v50, %v2764_v47  ;;  %v2789_v59 = vadd.f32 %v9421_v50, %v2767_v36  ;;  %v2788_v6 = vadd.f32 %v9421_v50, %v2766_v41 }
 0x686   :  { %vm2801_vm1 = vcmp.ge.f32.partialorder %v2783_v58, 0.0  ;;  %v2819_v31 = vmul.f32 %v9423_v18, %v2783_v58  ;;  %vm2800_vm4 = vcmp.ge.f32.partialorder %v2782_v56, 0.0  ;;  %v2818_v53 = vmul.f32 %v9423_v18, %v2782_v56 }
 0x687   :  { %v2821_v9 = vmul.f32 %v9423_v18, %v2785_v51  ;;  %vm2803_vm5 = vcmp.ge.f32.partialorder %v2785_v51, 0.0  ;;  %v2820_v24 = vmul.f32 %v9423_v18, %v2784_v34  ;;  %vm2802_vm6 = vcmp.ge.f32.partialorder %v2784_v34, 0.0 }
 0x688   :  { %v9433_v61 = vsel %vm2801_vm1, %v2783_v58, %v2819_v31  ;;  %v9435_v49 = vsel %vm2800_vm4, %v2782_v56, %v2818_v53  ;;  %v2823_v30 = vmul.f32 %v9423_v18, %v2787_v29  ;;  %vm2805_vm7 = vcmp.ge.f32.partialorder %v2787_v29, 0.0 }
 0x689   :  { %2958 = vmatprep.subr.mxu0 %v9433_v61  ;;  %v9445_v63 = vsel %vm2803_vm5, %v2785_v51, %v2821_v9  ;;  %v9451_v2 = vsel %vm2802_vm6, %v2784_v34, %v2820_v24  ;;  %v2822_v12 = vmul.f32 %v9423_v18, %v2786_v28  ;;  %vm2804_vm8 = vcmp.ge.f32.partialorder %v2786_v28, 0.0 }
 0x68a   :  { %2959 = vmatpush1.msra.mxu0 %v9435_v49  ;;  %v9473_v39 = vsel %vm2805_vm7, %v2787_v29, %v2823_v30  ;;  %v2825_v33 = vmul.f32 %v9423_v18, %v2789_v59  ;;  %vm2807_vm9 = vcmp.ge.f32.partialorder %v2789_v59, 0.0  ;;  %v2824_v48 = vmul.f32 %v9423_v18, %v2788_v6 }
 0x68b   :  { %8054 = vmatmul.mubr.msk.f32.vlgmr.msra.gmra.mrb[58].mxu0 %vm2941_vm3, %v9307_v20  ;;  %8317 = vmatprep.subr.bf16.mxu0 %v9092_v42  ;;  %v9479_v10 = vsel %vm2804_vm8, %v2786_v28, %v2822_v12  ;;  %vm2806_vm10 = vcmp.ge.f32.partialorder %v2788_v6, 0.0  ;;  %v2769_v52 = vmul.f32 %v9413_v11, %v9343_v25  ;;  %v2768_v8 = vmul.f32 %v9413_v11, %v9339_v27 }
 0x68c   :  { %8319 = vmatpush1.bf16.msra.mxu0 %v9101_v43  ;;  %3024 = vmatprep.mubr.f32.mxu0 %v11163_v3  ;;  %v9501_v44 = vsel %vm2807_vm9, %v2789_v59, %v2825_v33  ;;  %v9507_v46 = vsel %vm2806_vm10, %v2788_v6, %v2824_v48  ;;  %v2771_v55 = vmul.f32 %v9413_v11, %v9353_v1  ;;  %vm4321_vm4 = vcmask 261120  }
 0x68d   :  { %3047 = vmatprep.subr.mxu0 %v9445_v63  ;;  %v2791_v60 = vadd.f32 %v9421_v50, %v2769_v52  ;;  %v2790_v58 = vadd.f32 %v9421_v50, %v2768_v8  ;;  %v2770_v53 = vmul.f32 %v9413_v11, %v9345_v22  ;;  %v2773_v26 = vmul.f32 %v9413_v11, %v9367_v54 }
 0x68e   :  { %v2793_v31 = vadd.f32 %v9421_v50, %v2771_v55  ;;  %v2772_v47 = vmul.f32 %v9413_v11, %v9355_v13  ;;  %v2775_v36 = vmul.f32 %v9413_v11, %v9364_v62  ;;  %v2774_v41 = vmul.f32 %v9413_v11, %v9369_v37  ;;  %v8257_v62 = vpop.f32.mrb[52].mxu1  ;;  %v8611_v11 = vld [vmem:[%s11148_s0 + $0x80] sm:$0xff] }
 0x68f   :  { %8055 = vmatmul.mubr.msk.f32.gmra.mrb[60].mxu0 %vm2941_vm3, %v9316_v21  ;;  %v2827_v56 = vmul.f32 %v9423_v18, %v2791_v60  ;;  %vm2809_vm11 = vcmp.ge.f32.partialorder %v2791_v60, 0.0  ;;  %v2826_v25 = vmul.f32 %v9423_v18, %v2790_v58  ;;  %vm2808_vm12 = vcmp.ge.f32.partialorder %v2790_v58, 0.0 }
 0x690   :  { %3048 = vmatpush1.msra.mxu0 %v9451_v2  ;;  %3030 = vmatprep.mubr.f32.mxu0 %v11163_v3  ;;  %v2792_v34 = vadd.f32 %v9421_v50, %v2770_v53  ;;  %v2829_v9 = vmul.f32 %v9423_v18, %v2793_v31  ;;  %vm2811_vm13 = vcmp.ge.f32.partialorder %v2793_v31, 0.0  ;;  %v2795_v29 = vadd.f32 %v9421_v50, %v2773_v26 }
 0x691   :  { %8321 = vmatprep.subr.bf16.mxu0 %v9106_v4  ;;  %v9529_v51 = vsel %vm2809_vm11, %v2791_v60, %v2827_v56  ;;  %v9535_v27 = vsel %vm2808_vm12, %v2790_v58, %v2826_v25  ;;  %v2794_v28 = vadd.f32 %v9421_v50, %v2772_v47  ;;  %v2797_v59 = vadd.f32 %v9421_v50, %v2775_v36 }
 0x692   :  { %v2828_v1 = vmul.f32 %v9423_v18, %v2792_v34  ;;  %v9557_v24 = vsel %vm2811_vm13, %v2793_v31, %v2829_v9  ;;  %vm2810_vm14 = vcmp.ge.f32.partialorder %v2792_v34, 0.0  ;;  %v2831_v30 = vmul.f32 %v9423_v18, %v2795_v29 }
 0x693   :  { %8056 = vmatmul.mubr.msk.f32.gmra.mrb[62].mxu0 %vm2941_vm3, %v9401_v35  ;;  %vm2813_vm15 = vcmp.ge.f32.partialorder %v2795_v29, 0.0  ;;  %v2830_v54 = vmul.f32 %v9423_v18, %v2794_v28  ;;  %vm2812_vm0 = vcmp.ge.f32.partialorder %v2794_v28, 0.0  ;;  %v2796_v6 = vadd.f32 %v9421_v50, %v2774_v41  ;;  %v9645_v50 = vld [vmem:[%s11152_s4] sm:$0xff] }
 0x694   :  { %3036 = vmatprep.mubr.f32.mxu0 %v11163_v3  ;;  %v9563_v22 = vsel %vm2810_vm14, %v2792_v34, %v2828_v1  ;;  %v9585_v12 = vsel %vm2813_vm15, %v2795_v29, %v2831_v30  ;;  %v2833_v33 = vmul.f32 %v9423_v18, %v2797_v59  ;;  %vm2815_vm2 = vcmp.ge.f32.partialorder %v2797_v59, 0.0 }
 0x695   :  { %11183 = vst [vmem:[#allocation12_spill] sm:$0xff] %v9585_v12  ;;  %v9591_v13 = vsel %vm2812_vm0, %v2794_v28, %v2830_v54  ;;  %v2832_v48 = vmul.f32 %v9423_v18, %v2796_v6  ;;  %vm2814_vm1 = vcmp.ge.f32.partialorder %v2796_v6, 0.0 }
 0x696   :  { %11184 = vst [vmem:[#allocation13_spill] sm:$0xff] %v9591_v13  ;;  %v9613_v52 = vsel %vm2815_vm2, %v2797_v59, %v2833_v33 }
 0x697   :  { %8057 = vmatmul.mubr.msk.f32.gmra.mrb[64].mxu0 %vm2941_vm3, %v9408_v23  ;;  %11185 = vst [vmem:[#allocation14_spill] sm:$0xff] %v9613_v52  ;;  %v9619_v37 = vsel %vm2814_vm1, %v2796_v6, %v2832_v48 }
 0x698   :  { %3107 = vmatprep.mubr.f32.mxu0 %v11163_v3  ;;  %11186 = vst [vmem:[#allocation15_spill] sm:$0xff] %v9619_v37 }
 0x69b   :  { %8058 = vmatmul.mubr.msk.f32.vlgmr.msra.gmra.mrb[66].mxu0 %vm2941_vm3, %v9307_v20 }
 0x69c   :  { %8323 = vmatpush1.bf16.msra.mxu0 %v9156_v57  ;;  %3113 = vmatprep.mubr.f32.mxu0 %v11163_v3 }
 0x69d   :  { %3136 = vmatprep.subr.mxu0 %v9473_v39 }
 0x69f   :  { %8059 = vmatmul.mubr.msk.f32.gmra.mrb[68].mxu0 %vm2941_vm3, %v9316_v21 }
 0x6a0   :  { %3137 = vmatpush1.msra.mxu0 %v9479_v10  ;;  %3119 = vmatprep.mubr.f32.mxu0 %v11163_v3 }
 0x6a1   :  { %8325 = vmatprep.subr.bf16.mxu0 %v9161_v32 }
 0x6a3   :  { %8060 = vmatmul.mubr.msk.f32.gmra.mrb[58].mxu0 %vm2941_vm3, %v9401_v35 }
 0x6a4   :  { %3125 = vmatprep.mubr.f32.mxu0 %v11163_v3 }
 0x6a7   :  { %8061 = vmatmul.mubr.msk.f32.gmra.mrb[70].mxu0 %vm2941_vm3, %v9408_v23 }
 0x6a8   :  { %3196 = vmatprep.mubr.f32.mxu0 %v11163_v3 }
 0x6ab   :  { %8062 = vmatmul.mubr.msk.f32.vlgmr.msra.gmra.mrb[72].mxu0 %vm2941_vm3, %v9307_v20 }
 0x6ac   :  { %8327 = vmatpush1.bf16.msra.mxu0 %v9184_v45  ;;  %3202 = vmatprep.mubr.f32.mxu0 %v11163_v3 }
 0x6ad   :  { %3225 = vmatprep.subr.mxu0 %v9501_v44 }
 0x6af   :  { %8063 = vmatmul.mubr.msk.f32.gmra.mrb[74].mxu0 %vm2941_vm3, %v9316_v21 }
 0x6b0   :  { %3226 = vmatpush1.msra.mxu0 %v9507_v46  ;;  %3208 = vmatprep.mubr.f32.mxu0 %v11163_v3 }
 0x6b1   :  { %8329 = vmatprep.subr.bf16.mxu0 %v9189_v0 }
 0x6b3   :  { %8064 = vmatmul.mubr.msk.f32.gmra.mrb[66].mxu0 %vm2941_vm3, %v9401_v35 }
 0x6b4   :  { %3214 = vmatprep.mubr.f32.mxu0 %v11163_v3 }
 0x6b7   :  { %8065 = vmatmul.mubr.msk.f32.gmra.mrb[76].mxu0 %vm2941_vm3, %v9408_v23 }
 0x6b8   :  { %3285 = vmatprep.mubr.f32.mxu0 %v11163_v3 }
 0x6bb   :  { %8066 = vmatmul.mubr.msk.f32.vlgmr.msra.gmra.mrb[78].mxu0 %vm2941_vm3, %v9307_v20 }
 0x6bc   :  { %8331 = vmatpush1.bf16.msra.mxu0 %v9212_v7  ;;  %3291 = vmatprep.mubr.f32.mxu0 %v11163_v3 }
 0x6bd   :  { %3314 = vmatprep.subr.mxu0 %v9529_v51 }
 0x6bf   :  { %8067 = vmatmul.mubr.msk.f32.gmra.mrb[80].mxu0 %vm2941_vm3, %v9316_v21 }
 0x6c0   :  { %3315 = vmatpush1.msra.mxu0 %v9535_v27  ;;  %3297 = vmatprep.mubr.f32.mxu0 %v11163_v3 }
 0x6c1   :  { %8333 = vmatprep.subr.bf16.mxu0 %v9217_v5 }
 0x6c3   :  { %8068 = vmatmul.mubr.msk.f32.gmra.mrb[72].mxu0 %vm2941_vm3, %v9401_v35 }
 0x6c4   :  { %3303 = vmatprep.mubr.f32.mxu0 %v11163_v3 }
 0x6c7   :  { %8069 = vmatmul.mubr.msk.f32.gmra.mrb[82].mxu0 %vm2941_vm3, %v9408_v23 }
 0x6c8   :  { %3374 = vmatprep.mubr.f32.mxu0 %v11163_v3 }
 0x6cb   :  { %8070 = vmatmul.mubr.msk.f32.vlgmr.msra.gmra.mrb[84].mxu0 %vm2941_vm3, %v9307_v20 }
 0x6cc   :  { %8335 = vmatpush1.bf16.msra.mxu0 %v9233_v14  ;;  %3380 = vmatprep.mubr.f32.mxu0 %v11163_v3 }
 0x6cd   :  { %3403 = vmatprep.subr.mxu0 %v9557_v24 }
 0x6cf   :  { %8071 = vmatmul.mubr.msk.f32.gmra.mrb[86].mxu0 %vm2941_vm3, %v9316_v21 }
 0x6d0   :  { %3404 = vmatpush1.msra.mxu0 %v9563_v22  ;;  %3386 = vmatprep.mubr.f32.mxu0 %v11163_v3 }
 0x6d1   :  { %8337 = vmatprep.subr.bf16.mxu0 %v9239_v15 }
 0x6d3   :  { %8072 = vmatmul.mubr.msk.f32.gmra.mrb[78].mxu0 %vm2941_vm3, %v9401_v35 }
 0x6d4   :  { %3392 = vmatprep.mubr.f32.mxu0 %v11163_v3 }
 0x6d7   :  { %8073 = vmatmul.mubr.msk.f32.gmra.mrb[88].mxu0 %vm2941_vm3, %v9408_v23 }
 0x6d8   :  { %3463 = vmatprep.mubr.f32.mxu0 %v11163_v3 }
 0x6db   :  { %8074 = vmatmul.mubr.msk.f32.vlgmr.msra.gmra.mrb[90].mxu0 %vm2941_vm3, %v9307_v20 }
 0x6dc   :  { %8339 = vmatpush1.bf16.msra.mxu0 %v9255_v16  ;;  %3469 = vmatprep.mubr.f32.mxu0 %v11163_v3 }
 0x6dd   :  { %3492 = vmatprep.subr.mxu0 %v9585_v12 }
 0x6df   :  { %8075 = vmatmul.mubr.msk.f32.gmra.mrb[92].mxu0 %vm2941_vm3, %v9316_v21 }
 0x6e0   :  { %3493 = vmatpush1.msra.mxu0 %v9591_v13  ;;  %3475 = vmatprep.mubr.f32.mxu0 %v11163_v3 }
 0x6e1   :  { %8341 = vmatprep.subr.bf16.mxu0 %v9261_v17 }
 0x6e3   :  { %8076 = vmatmul.mubr.msk.f32.gmra.mrb[84].mxu0 %vm2941_vm3, %v9401_v35 }
 0x6e4   :  { %3481 = vmatprep.mubr.f32.mxu0 %v11163_v3 }
 0x6e7   :  { %8077 = vmatmul.mubr.msk.f32.gmra.mrb[94].mxu0 %vm2941_vm3, %v9408_v23 }
 0x6e8   :  { %3552 = vmatprep.mubr.f32.mxu0 %v11163_v3 }
 0x6eb   :  { %8078 = vmatmul.mubr.msk.f32.vlgmr.msra.gmra.mrb[96].mxu0 %vm2941_vm3, %v9307_v20 }
 0x6ec   :  { %8343 = vmatpush1.bf16.msra.mxu0 %v9277_v19  ;;  %3558 = vmatprep.mubr.f32.mxu0 %v11163_v3 }
 0x6ed   :  { %3581 = vmatprep.subr.mxu0 %v9613_v52 }
 0x6ef   :  { %8079 = vmatmul.mubr.msk.f32.gmra.mrb[98].mxu0 %vm2941_vm3, %v9316_v21 }
 0x6f0   :  { %3582 = vmatpush1.msra.mxu0 %v9619_v37  ;;  %3564 = vmatprep.mubr.f32.mxu0 %v11163_v3 }
 0x6f1   :  { %8258 = vmatprep.subr.mxu0 %v8611_v11 }
 0x6f3   :  { %8080 = vmatmul.mubr.msk.f32.gmra.mrb[90].mxu0 %vm2941_vm3, %v9401_v35 }
 0x6f4   :  { %3570 = vmatprep.mubr.f32.mxu0 %v11163_v3 }
 0x6f7   :  { %8081 = vmatmul.mubr.msk.f32.gmra.mrb[100].mxu0 %vm2941_vm3, %v9408_v23 }
 0x6f8   :  { %3641 = vmatprep.mubr.f32.mxu0 %v11163_v3 }
 0x6fb   :  { %8082 = vmatmul.mubr.msk.f32.vlgmr.msra.gmra.mrb[102].mxu0 %vm2941_vm3, %v9307_v20  ;;  %v9654_v20 = vld [vmem:[%s11152_s4 + $0x8] sm:$0xff] }
 0x6fc   :  { %8259 = vmatpush3.msra.mxu0 %v8611_v11  ;;  %3647 = vmatprep.mubr.f32.mxu0 %v11163_v3 }
 0x6fd   :  { %8417 = vmatprep.subr.bf16.mxu0 %v9092_v42 }
 0x6ff   :  { %8083 = vmatmul.mubr.msk.f32.gmra.mrb[104].mxu0 %vm2941_vm3, %v9316_v21  ;;  %v9659_v21 = vpop.f32.mrb[53].mxu1 }
 0x700   :  { %3653 = vmatprep.mubr.f32.mxu0 %v11163_v3 }
 0x703   :  { %8084 = vmatmul.mubr.msk.f32.gmra.mrb[96].mxu0 %vm2941_vm3, %v9401_v35 }
 0x704   :  { %3659 = vmatprep.mubr.f32.mxu0 %v11163_v3 }
 0x707   :  { %8085 = vmatmul.mubr.msk.f32.gmra.mrb[106].mxu0 %vm2941_vm3, %v9408_v23 }
 0x708   :  { %8260 = vmatprep.mubr.msk.f32.mxu0 %vm4321_vm4, %v9645_v50 }
 0x70b   :  { %8261 = vmatmul.mubr.msk.f32.vlgmr.msra.gmra.mrb[108].mxu0 %vm4321_vm4, %v9654_v20 }
 0x70c   :  { %8419 = vmatpush1.bf16.msra.mxu0 %v9101_v43 }
 0x762   :  { %v3026_v35 = vpop.f32.mrb[60].mxu0 }
 0x763   :  { %v3028_v18 = vpop.f32.mrb[61].mxu0 }
 0x766   :  { %v3032_v60 = vpop.f32.mrb[62].mxu0 }
 0x767   :  { %v3034_v8 = vpop.f32.mrb[63].mxu0 }
 0x768   :  { %v3911_v23 = vadd.f32 %v3034_v8, %v3026_v35 }
 0x76a   :  { %v3038_v58 = vpop.f32.mrb[64].mxu0 }
 0x76b   :  { %v3040_v56 = vpop.f32.mrb[65].mxu0 }
 0x76c   :  { %v9661_v25 = vadd.f32 %v3040_v56, %v3032_v60 }
 0x772   :  { %v3115_v55 = vpop.f32.mrb[68].mxu0 }
 0x773   :  { %v3117_v31 = vpop.f32.mrb[69].mxu0 }
 0x776   :  { %v3121_v53 = vpop.f32.mrb[58].mxu0 }
 0x777   :  { %v3912_v34 = vadd.f32 %v3121_v53, %v3028_v18  ;;  %v3123_v9 = vpop.f32.mrb[59].mxu0 }
 0x778   :  { %v3913_v1 = vadd.f32 %v3123_v9, %v3115_v55 }
 0x77a   :  { %v3127_v26 = vpop.f32.mrb[70].mxu0 }
 0x77b   :  { %v9663_v29 = vadd.f32 %v3911_v23, %v3127_v26  ;;  %v3129_v47 = vpop.f32.mrb[71].mxu0 }
 0x77c   :  { %v9665_v28 = vadd.f32 %v3912_v34, %v3129_v47 }
 0x782   :  { %v3204_v30 = vpop.f32.mrb[74].mxu0 }
 0x783   :  { %v3206_v54 = vpop.f32.mrb[75].mxu0 }
 0x786   :  { %v3210_v36 = vpop.f32.mrb[66].mxu0 }
 0x787   :  { %v3914_v59 = vadd.f32 %v3210_v36, %v3117_v31  ;;  %v3212_v41 = vpop.f32.mrb[67].mxu0 }
 0x788   :  { %v3915_v6 = vadd.f32 %v3212_v41, %v3204_v30 }
 0x78a   :  { %v3216_v33 = vpop.f32.mrb[76].mxu0 }
 0x78b   :  { %v9667_v62 = vadd.f32 %v3913_v1, %v3216_v33  ;;  %v3218_v48 = vpop.f32.mrb[77].mxu0 }
 0x78c   :  { %v9669_v11 = vadd.f32 %v3914_v59, %v3218_v48 }
 0x792   :  { %v3293_v35 = vpop.f32.mrb[80].mxu0 }
 0x793   :  { %v3295_v18 = vpop.f32.mrb[81].mxu0 }
 0x796   :  { %v3299_v60 = vpop.f32.mrb[72].mxu0 }
 0x797   :  { %v3916_v8 = vadd.f32 %v3299_v60, %v3206_v54  ;;  %v3301_v23 = vpop.f32.mrb[73].mxu0 }
 0x798   :  { %v3917_v58 = vadd.f32 %v3301_v23, %v3293_v35 }
 0x79a   :  { %v3305_v56 = vpop.f32.mrb[82].mxu0 }
 0x79b   :  { %v9671_v55 = vadd.f32 %v3915_v6, %v3305_v56  ;;  %v3307_v53 = vpop.f32.mrb[83].mxu0 }
 0x79c   :  { %v9673_v34 = vadd.f32 %v3916_v8, %v3307_v53  ;;  %v4020_v8 = vadd.f32 %v9663_v29, %v9661_v25 }
 0x7a2   :  { %v3382_v31 = vpop.f32.mrb[86].mxu0 }
 0x7a3   :  { %v3384_v9 = vpop.f32.mrb[87].mxu0 }
 0x7a6   :  { %v3388_v26 = vpop.f32.mrb[78].mxu0 }
 0x7a7   :  { %v3918_v1 = vadd.f32 %v3388_v26, %v3295_v18  ;;  %v3390_v47 = vpop.f32.mrb[79].mxu0 }
 0x7a8   :  { %v3919_v30 = vadd.f32 %v3390_v47, %v3382_v31 }
 0x7aa   :  { %v3394_v36 = vpop.f32.mrb[88].mxu0 }
 0x7ab   :  { %v9675_v59 = vadd.f32 %v3917_v58, %v3394_v36  ;;  %v3396_v41 = vpop.f32.mrb[89].mxu0  ;;  %v4021_v58 = vadd.f32 %v4020_v8, %v9665_v28 }
 0x7ac   :  { %v9677_v33 = vadd.f32 %v3918_v1, %v3396_v41 }
 0x7ad   :  { %v4022_v26 = vadd.f32 %v4021_v58, %v9667_v62 }
 0x7af   :  { %v4023_v47 = vadd.f32 %v4022_v26, %v9669_v11 }
 0x7b2   :  { %v3471_v54 = vpop.f32.mrb[92].mxu0 }
 0x7b3   :  { %v3473_v48 = vpop.f32.mrb[93].mxu0 }
 0x7b6   :  { %v3477_v35 = vpop.f32.mrb[84].mxu0 }
 0x7b7   :  { %v3920_v6 = vadd.f32 %v3477_v35, %v3384_v9  ;;  %v3479_v60 = vpop.f32.mrb[85].mxu0  ;;  %v4024_v9 = vadd.f32 %v4023_v47, %v9671_v55 }
 0x7b8   :  { %v3921_v23 = vadd.f32 %v3479_v60, %v3471_v54 }
 0x7ba   :  { %v3483_v56 = vpop.f32.mrb[94].mxu0 }
 0x7bb   :  { %v9681_v53 = vadd.f32 %v3919_v30, %v3483_v56  ;;  %v3485_v18 = vpop.f32.mrb[95].mxu0  ;;  %v4025_v30 = vadd.f32 %v4024_v9, %v9673_v34 }
 0x7bc   :  { %v9683_v31 = vadd.f32 %v3920_v6, %v3485_v18 }
 0x7bd   :  { %v4026_v6 = vadd.f32 %v4025_v30, %v9675_v59 }
 0x7bf   :  { %v4027_v26 = vadd.f32 %v4026_v6, %v9677_v33 }
 0x7c2   :  { %v3560_v1 = vpop.f32.mrb[98].mxu0 }
 0x7c3   :  { %v3562_v36 = vpop.f32.mrb[99].mxu0 }
 0x7c6   :  { %v3566_v41 = vpop.f32.mrb[90].mxu0 }
 0x7c7   :  { %v3922_v54 = vadd.f32 %v3566_v41, %v3473_v48  ;;  %v3568_v35 = vpop.f32.mrb[91].mxu0  ;;  %v4028_v48 = vadd.f32 %v4027_v26, %v9681_v53 }
 0x7c8   :  { %v3923_v60 = vadd.f32 %v3568_v35, %v3560_v1 }
 0x7c9   :  { %v4029_v9 = vadd.f32 %v4028_v48, %v9683_v31 }
 0x7ca   :  { %v3572_v56 = vpop.f32.mrb[100].mxu0 }
 0x7cb   :  { %v9691_v18 = vadd.f32 %v3921_v23, %v3572_v56  ;;  %v3574_v8 = vpop.f32.mrb[101].mxu0 }
 0x7cc   :  { %v9693_v3 = vadd.f32 %v3922_v54, %v3574_v8 }
 0x7cd   :  { %v4030_v23 = vadd.f32 %v4029_v9, %v9691_v18 }
 0x7ce   :  { %v3643_v58 = vpop.f32.mrb[102].mxu0 }
 0x7cf   :  { %v3863_v40 = vadd.f32 %v9659_v21, %v3643_v58  ;;  %v3645_v47 = vpop.f32.mrb[103].mxu0  ;;  %v4031_v6 = vadd.f32 %v4030_v23, %v9693_v3 }
 0x7d2   :  { %v3649_v41 = vpop.f32.mrb[104].mxu0 }
 0x7d3   :  { %v3651_v1 = vpop.f32.mrb[105].mxu0 }
 0x7d4   :  { %v9698_v35 = vadd.f32 %v3863_v40, %v3651_v1 }
 0x7d6   :  { %v3655_v30 = vpop.f32.mrb[96].mxu0 }
 0x7d7   :  { %v3924_v56 = vadd.f32 %v3655_v30, %v3562_v36  ;;  %v3657_v54 = vpop.f32.mrb[97].mxu0 }
 0x7d8   :  { %v9702_v8 = vadd.f32 %v3657_v54, %v3649_v41 }
 0x7da   :  { %v3661_v38 = vpop.f32.mrb[106].mxu0 }
 0x7db   :  { %v9705_v21 = vadd.f32 %v3923_v60, %v3661_v38  ;;  %v3663_v58 = vpop.f32.mrb[107].mxu0 }
 0x7dc   :  { %v9707_v26 = vadd.f32 %v3924_v56, %v3663_v58 }
 0x7dd   :  { %v4032_v40 = vadd.f32 %v4031_v6, %v9705_v21 }
 0x7de   :  { %v8262_v47 = vpop.f32.mrb[108].mxu0 }
 0x7df   :  { %v4033_v48 = vadd.f32 %v4032_v40, %v9707_v26  ;;  %v5112_v1 = vpop.f32.mrb[109].mxu0 }
 0x7e1   :  { %v4034_v9 = vadd.f32 %v4033_v48, %v9702_v8 }
 0x7e3   :  { %v4035_v36 = vadd.f32 %v4034_v9, %v9698_v35 }
 0x7e5   :  { %4036 = vadd.xlane.f32.xlu0 %v4035_v36 }
 0x872   :  { %v4037_v41 = vpop.xlane.xlu0 %4036 }
 0x873   :  { %v4038_v30 = vmul.f32 0.00045955883, %v4037_v41 }
 0x875   :  { %v4039_v23 = vsub.f32 %v9661_v25, %v4038_v30  ;;  %v4040_v38 = vsub.f32 %v9663_v29, %v4038_v30  ;;  %v4041_v60 = vsub.f32 %v9665_v28, %v4038_v30  ;;  %v4042_v6 = vsub.f32 %v9667_v62, %v4038_v30 }
 0x876   :  { %v4043_v58 = vsub.f32 %v9669_v11, %v4038_v30  ;;  %v4044_v48 = vsub.f32 %v9671_v55, %v4038_v30  ;;  %v4045_v36 = vsub.f32 %v9673_v34, %v4038_v30  ;;  %v4046_v19 = vsub.f32 %v9675_v59, %v4038_v30 }
 0x877   :  { %v4073_v56 = vmul.f32 %v4039_v23, %v4039_v23  ;;  %v4074_v54 = vmul.f32 %v4040_v38, %v4040_v38  ;;  %v4075_v40 = vmul.f32 %v4041_v60, %v4041_v60  ;;  %v4076_v1 = vmul.f32 %v4042_v6, %v4042_v6 }
 0x878   :  { %v4077_v41 = vmul.f32 %v4043_v58, %v4043_v58  ;;  %v4078_v52 = vmul.f32 %v4044_v48, %v4044_v48  ;;  %v4047_v23 = vsub.f32 %v9677_v33, %v4038_v30  ;;  %v4079_v38 = vmul.f32 %v4045_v36, %v4045_v36 }
 0x879   :  { %v4090_v47 = vadd.f32 %v4074_v54, %v4073_v56  ;;  %v4048_v16 = vsub.f32 %v9681_v53, %v4038_v30  ;;  %v4080_v60 = vmul.f32 %v4046_v19, %v4046_v19  ;;  %v4049_v54 = vsub.f32 %v9683_v31, %v4038_v30 }
 0x87a   :  { %v4081_v6 = vmul.f32 %v4047_v23, %v4047_v23 }
 0x87b   :  { %v4091_v9 = vadd.f32 %v4090_v47, %v4075_v40  ;;  %v4050_v47 = vsub.f32 %v9691_v18, %v4038_v30  ;;  %v4082_v58 = vmul.f32 %v4048_v16, %v4048_v16  ;;  %v4083_v48 = vmul.f32 %v4049_v54, %v4049_v54 }
 0x87d   :  { %v4092_v37 = vadd.f32 %v4091_v9, %v4076_v1  ;;  %v4051_v9 = vsub.f32 %v9693_v3, %v4038_v30  ;;  %v4084_v36 = vmul.f32 %v4050_v47, %v4050_v47 }
 0x87f   :  { %v4093_v17 = vadd.f32 %v4092_v37, %v4077_v41  ;;  %v4052_v41 = vsub.f32 %v9705_v21, %v4038_v30  ;;  %v4085_v19 = vmul.f32 %v4051_v9, %v4051_v9  ;;  %v8090_v9 = vld [vmem:[%s11154_s6 + $0x10] sm:$0xff] }
 0x881   :  { %v4094_v13 = vadd.f32 %v4093_v17, %v4078_v52  ;;  %v4053_v52 = vsub.f32 %v9707_v26, %v4038_v30  ;;  %v4086_v23 = vmul.f32 %v4052_v41, %v4052_v41 }
 0x883   :  { %v4095_v56 = vadd.f32 %v4094_v13, %v4079_v38  ;;  %v4054_v38 = vsub.f32 %v9702_v8, %v4038_v30  ;;  %v4087_v16 = vmul.f32 %v4053_v52, %v4053_v52 }
 0x885   :  { %v4096_v40 = vadd.f32 %v4095_v56, %v4080_v60  ;;  %v4055_v56 = vsub.f32 %v9698_v35, %v4038_v30  ;;  %v8091_v35 = vld [vmem:[%s11155_s7 + $0x10] sm:$0xff] }
 0x887   :  { %v4097_v1 = vadd.f32 %v4096_v40, %v4081_v6  ;;  %v4088_v40 = vmul.f32 %v4054_v38, %v4054_v38  ;;  %v4089_v54 = vmul.f32 %v4055_v56, %v4055_v56 }
 0x889   :  { %v4098_v37 = vadd.f32 %v4097_v1, %v4082_v58 }
 0x88b   :  { %v4099_v17 = vadd.f32 %v4098_v37, %v4083_v48 }
 0x88d   :  { %v4100_v13 = vadd.f32 %v4099_v17, %v4084_v36 }
 0x88f   :  { %v4101_v60 = vadd.f32 %v4100_v13, %v4085_v19  ;;  %v9746_v19 = vld [vmem:[%s11152_s4 + $0x18] sm:$0xff]  ;;  %v11187_v13 = vmov 0.0  }
 0x891   :  { %v4102_v6 = vadd.f32 %v4101_v60, %v4086_v23 }
 0x893   :  { %v4103_v12 = vadd.f32 %v4102_v6, %v4087_v16  ;;  %v9763_v6 = vstv %s8092_s24 }
 0x895   :  { %v4104_v58 = vadd.f32 %v4103_v12, %v4088_v40  ;;  %v9739_v12 = vld [vmem:[%s11152_s4 + $0x10] sm:$0xff] }
 0x896   :  { %8263 = vmatprep.mubr.msk.f32.mxu0 %vm4321_vm4, %v9739_v12 }
 0x897   :  { %v4105_v1 = vadd.f32 %v4104_v58, %v4089_v54  ;;  %8264 = vmatmul.mubr.msk.f32.gmra.mrb[110].mxu0 %vm4321_vm4, %v9746_v19 }
 0x898   :  { %5924 = vmatprep.mubr.f32.mxu0 %v11187_v13 }
 0x899   :  { %4106 = vadd.xlane.f32.xlu1 %v4105_v1 }
 0x926   :  { %v4107_v47 = vpop.xlane.xlu1 %4106 }
 0x927   :  { %v4108_v48 = vmul.f32 0.00045955883, %v4107_v47 }
 0x929   :  { %v4111_v37 = vadd.f32 1e-05, %v4108_v48 }
 0x92b   :  { %8537 = vrsqrt.f32 %v4111_v37 }
 0x935   :  { %v8538_v41 = vpop.eup %8537 }
 0x936   :  { %v4113_v36 = vmul.f32 %v8538_v41, %v8090_v9 }
 0x938   :  { %4120 = vperm.xlu0 %8532, %v4113_v36   ;;  %v4116_v17 = vmul.f32 %v4113_v36, %v4038_v30 }
 0x93a   :  { %v4117_v52 = vsub.f32 %v8091_v35, %v4116_v17 }
 0x93c   :  { %4142 = vperm.xlu1 %8531, %v4117_v52  }
 0x9b7   :  { %v9751_v30 = vpop.permute.xlu0 %4120 }
 0x9b8   :  { %v4124_v38 = vmul.f32 %v9751_v30, %v9663_v29  ;;  %v4126_v23 = vmul.f32 %v9751_v30, %v9667_v62  ;;  %v4123_v60 = vmul.f32 %v9751_v30, %v9661_v25  ;;  %v4125_v56 = vmul.f32 %v9751_v30, %v9665_v28 }
 0x9bb   :  { %v9761_v16 = vpop.permute.xlu1 %4142 }
 0x9bc   :  { %v4146_v40 = vadd.f32 %v9761_v16, %v4124_v38  ;;  %v4148_v54 = vadd.f32 %v9761_v16, %v4126_v23  ;;  %v4145_v58 = vadd.f32 %v9761_v16, %v4123_v60  ;;  %v4147_v29 = vadd.f32 %v9761_v16, %v4125_v56 }
 0x9bd   :  { %v4130_v23 = vmul.f32 %v9751_v30, %v9675_v59  ;;  %v4129_v60 = vmul.f32 %v9751_v30, %v9673_v34 }
 0x9be   :  { %vm4164_vm3 = vcmp.ge.f32.partialorder %v4146_v40, 0.0  ;;  %v4182_v62 = vmul.f32 %v9763_v6, %v4146_v40  ;;  %vm4166_vm5 = vcmp.ge.f32.partialorder %v4148_v54, 0.0  ;;  %v4184_v25 = vmul.f32 %v9763_v6, %v4148_v54 }
 0x9bf   :  { %vm4163_vm6 = vcmp.ge.f32.partialorder %v4145_v58, 0.0  ;;  %v4181_v28 = vmul.f32 %v9763_v6, %v4145_v58  ;;  %vm4165_vm7 = vcmp.ge.f32.partialorder %v4147_v29, 0.0  ;;  %v4183_v1 = vmul.f32 %v9763_v6, %v4147_v29 }
 0x9c0   :  { %v4199_v47 = vsel %vm4164_vm3, %v4146_v40, %v4182_v62  ;;  %v4201_v48 = vsel %vm4166_vm5, %v4148_v54, %v4184_v25  ;;  %v4131_v62 = vmul.f32 %v9751_v30, %v9677_v33 }
 0x9c1   :  { %v9774_v37 = vpack.c.bf16 %v4199_v47, %v9433_v61  ;;  %v8356_v9 = vpack.c.bf16 %v4201_v48, %v9445_v63  ;;  %v4198_v41 = vsel %vm4163_vm6, %v4145_v58, %v4181_v28  ;;  %v4200_v36 = vsel %vm4165_vm7, %v4147_v29, %v4183_v1 }
 0x9c2   :  { %v9778_v35 = vpack.c.bf16 %v4198_v41, %v9435_v49  ;;  %v8358_v17 = vpack.c.bf16 %v4200_v36, %v9451_v2  ;;  %v4128_v61 = vmul.f32 %v9751_v30, %v9671_v55  ;;  %v4132_v29 = vmul.f32 %v9751_v30, %v9681_v53 }
 0x9c3   :  { %8349 = vmatprep.subr.bf16.mxu1 %v9774_v37  ;;  %8421 = vmatprep.subr.bf16.mxu0 %v8356_v9  ;;  %v4134_v48 = vmul.f32 %v9751_v30, %v9691_v18 }
 0x9c4   :  { %8351 = vmatpush1.bf16.msra.mxu1 %v9778_v35  ;;  %8423 = vmatpush1.bf16.msra.mxu0 %v8358_v17  ;;  %v4150_v49 = vadd.f32 %v9761_v16, %v4128_v61 }
 0x9c5   :  { %8353 = vmatprep.subr.bf16.mxu1 %v9092_v42  ;;  %v4127_v42 = vmul.f32 %v9751_v30, %v9669_v11 }
 0x9c6   :  { %v4186_v63 = vmul.f32 %v9763_v6, %v4150_v49  ;;  %vm4168_vm8 = vcmp.ge.f32.partialorder %v4150_v49, 0.0 }
 0x9c7   :  { %8093 = vmatmul.mubr.msk.f32.vlgmr.msra.gmra.mrb[54].mxu1 %vm4321_vm4, %v9645_v50 }
 0x9c8   :  { %8355 = vmatpush1.bf16.msra.mxu1 %v9101_v43  ;;  %4404 = vmatprep.mubr.f32.mxu1 %v11187_v13  ;;  %v4149_v43 = vadd.f32 %v9761_v16, %v4127_v42  ;;  %v4203_v55 = vsel %vm4168_vm8, %v4150_v49, %v4186_v63  ;;  %v4136_v49 = vmul.f32 %v9751_v30, %v9705_v21  ;;  %vm5722_vm8 = vcmask 326656  }
 0x9c9   :  { %8357 = vmatprep.subr.bf16.mxu1 %v8356_v9  ;;  %v9809_v11 = vpack.c.bf16 %v4203_v55, %v9473_v39  ;;  %v4152_v39 = vadd.f32 %v9761_v16, %v4130_v23  ;;  %v4133_v9 = vmul.f32 %v9751_v30, %v9683_v31  ;;  %v4135_v42 = vmul.f32 %v9751_v30, %v9693_v3  ;;  %v11188_v3 = vld [vmem:[#allocation12_spill] sm:$0xff]  ;;  %v11190_v23 = vld [vmem:[#allocation13_spill] sm:$0xff] }
 0x9ca   :  { %v4185_v2 = vmul.f32 %v9763_v6, %v4149_v43  ;;  %vm4167_vm9 = vcmp.ge.f32.partialorder %v4149_v43, 0.0 }
 0x9cb   :  { %8094 = vmatmul.mubr.msk.f32.gmra.mrb[56].mxu1 %vm4321_vm4, %v9654_v20  ;;  %v4188_v59 = vmul.f32 %v9763_v6, %v4152_v39  ;;  %vm4170_vm10 = vcmp.ge.f32.partialorder %v4152_v39, 0.0 }
 0x9cc   :  { %8359 = vmatpush1.bf16.msra.mxu1 %v8358_v17  ;;  %4410 = vmatprep.mubr.f32.mxu1 %v11187_v13  ;;  %v4202_v52 = vsel %vm4167_vm9, %v4149_v43, %v4185_v2 }
 0x9cd   :  { %8361 = vmatprep.subr.bf16.mxu1 %v9106_v4  ;;  %v9815_v38 = vpack.c.bf16 %v4202_v52, %v9479_v10  ;;  %v4151_v10 = vadd.f32 %v9761_v16, %v4129_v60  ;;  %v4205_v40 = vsel %vm4170_vm10, %v4152_v39, %v4188_v59  ;;  %v11189_v52 = vld [vmem:[#allocation9_spill] sm:$0xff]  ;;  %v4138_v60 = vmul.f32 %v9751_v30, %v9702_v8  ;;  %v11191_v59 = vld [vmem:[#allocation10_spill] sm:$0xff] }
 0x9ce   :  { %v9839_v34 = vpack.c.bf16 %v4205_v40, %v9501_v44  ;;  %v4154_v44 = vadd.f32 %v9761_v16, %v4132_v29 }
 0x9cf   :  { %8095 = vmatmul.mubr.msk.f32.gmra.mrb[58].mxu1 %vm4321_vm4, %v9739_v12  ;;  %v4187_v56 = vmul.f32 %v9763_v6, %v4151_v10  ;;  %vm4169_vm11 = vcmp.ge.f32.partialorder %v4151_v10, 0.0 }
 0x9d0   :  { %4416 = vmatprep.mubr.f32.mxu1 %v11187_v13  ;;  %v4190_v53 = vmul.f32 %v9763_v6, %v4154_v44  ;;  %vm4172_vm12 = vcmp.ge.f32.partialorder %v4154_v44, 0.0 }
 0x9d1   :  { %v4204_v54 = vsel %vm4169_vm11, %v4151_v10, %v4187_v56  ;;  %v4160_v10 = vadd.f32 %v9761_v16, %v4138_v60  ;;  %v4137_v56 = vmul.f32 %v9751_v30, %v9707_v26  ;;  %v8265_v26 = vpop.f32.mrb[110].mxu0  ;;  %v11192_v30 = vld [vmem:[#allocation14_spill] sm:$0xff] }
 0x9d2   :  { %v9845_v58 = vpack.c.bf16 %v4204_v54, %v9507_v46  ;;  %v4153_v46 = vadd.f32 %v9761_v16, %v4131_v62  ;;  %v4207_v28 = vsel %vm4172_vm12, %v4154_v44, %v4190_v53  ;;  %v11193_v62 = vld [vmem:[#allocation11_spill] sm:$0xff] }
 0x9d3   :  { %8096 = vmatmul.mubr.msk.f32.gmra.mrb[60].mxu1 %vm4321_vm4, %v9746_v19  ;;  %v9869_v33 = vpack.c.bf16 %v4207_v28, %v9529_v51  ;;  %v4156_v51 = vadd.f32 %v9761_v16, %v4134_v48  ;;  %v4159_v40 = vadd.f32 %v9761_v16, %v4137_v56  ;;  %v4196_v8 = vmul.f32 %v9763_v6, %v4160_v10  ;;  %v11196_v53 = vld [vmem:[#allocation7_spill] sm:$0xff] }
 0x9d4   :  { %4487 = vmatprep.mubr.f32.mxu1 %v11187_v13  ;;  %v4189_v25 = vmul.f32 %v9763_v6, %v4153_v46  ;;  %vm4171_vm13 = vcmp.ge.f32.partialorder %v4153_v46, 0.0  ;;  %vm4178_vm1 = vcmp.ge.f32.partialorder %v4160_v10, 0.0 }
 0x9d5   :  { %v4192_v18 = vmul.f32 %v9763_v6, %v4156_v51  ;;  %vm4174_vm14 = vcmp.ge.f32.partialorder %v4156_v51, 0.0  ;;  %v4195_v54 = vmul.f32 %v9763_v6, %v4159_v40  ;;  %v4213_v29 = vsel %vm4178_vm1, %v4160_v10, %v4196_v8 }
 0x9d6   :  { %v4206_v1 = vsel %vm4171_vm13, %v4153_v46, %v4189_v25  ;;  %vm4177_vm3 = vcmp.ge.f32.partialorder %v4159_v40, 0.0  ;;  %v11194_v46 = vld [vmem:[#allocation15_spill] sm:$0xff]  ;;  %v11197_v25 = vld [vmem:[#allocation8_spill] sm:$0xff] }
 0x9d7   :  { %8097 = vmatmul.mubr.msk.f32.vlgmr.msra.gmra.mrb[62].mxu1 %vm4321_vm4, %v9645_v50  ;;  %v9875_v47 = vpack.c.bf16 %v4206_v1, %v9535_v27  ;;  %v4155_v27 = vadd.f32 %v9761_v16, %v4133_v9  ;;  %v4209_v36 = vsel %vm4174_vm14, %v4156_v51, %v4192_v18  ;;  %v4212_v44 = vsel %vm4177_vm3, %v4159_v40, %v4195_v54 }
 0x9d8   :  { %8363 = vmatpush1.bf16.msra.mxu1 %v9156_v57  ;;  %4493 = vmatprep.mubr.f32.mxu1 %v11187_v13  ;;  %v9899_v31 = vpack.c.bf16 %v4209_v36, %v9557_v24  ;;  %v4158_v24 = vadd.f32 %v9761_v16, %v4136_v49 }
 0x9d9   :  { %8365 = vmatprep.subr.bf16.mxu1 %v9809_v11  ;;  %v4191_v41 = vmul.f32 %v9763_v6, %v4155_v27  ;;  %vm4173_vm15 = vcmp.ge.f32.partialorder %v4155_v27, 0.0 }
 0x9da   :  { %v4194_v21 = vmul.f32 %v9763_v6, %v4158_v24  ;;  %vm4176_vm0 = vcmp.ge.f32.partialorder %v4158_v24, 0.0 }
 0x9db   :  { %8098 = vmatmul.mubr.msk.f32.gmra.mrb[64].mxu1 %vm4321_vm4, %v9654_v20  ;;  %v4208_v17 = vsel %vm4173_vm15, %v4155_v27, %v4191_v41 }
 0x9dc   :  { %8367 = vmatpush1.bf16.msra.mxu1 %v9815_v38  ;;  %4499 = vmatprep.mubr.f32.mxu1 %v11187_v13  ;;  %v9905_v61 = vpack.c.bf16 %v4208_v17, %v9563_v22  ;;  %v4157_v22 = vadd.f32 %v9761_v16, %v4135_v42  ;;  %v4211_v63 = vsel %vm4176_vm0, %v4158_v24, %v4194_v21 }
 0x9dd   :  { %8369 = vmatprep.subr.bf16.mxu1 %v9161_v32  ;;  %v9929_v2 = vpack.c.bf16 %v4211_v63, %v11188_v3  ;;  %v9959_v16 = vpack.c.bf16 %v4213_v29, %v11192_v30 }
 0x9de   :  { %v4193_v43 = vmul.f32 %v9763_v6, %v4157_v22  ;;  %vm4175_vm2 = vcmp.ge.f32.partialorder %v4157_v22, 0.0  ;;  %v9965_v6 = vpack.c.bf16 %v4212_v44, %v11194_v46 }
 0x9df   :  { %8099 = vmatmul.mubr.msk.f32.gmra.mrb[54].mxu1 %vm4321_vm4, %v9739_v12 }
 0x9e0   :  { %4505 = vmatprep.mubr.f32.mxu1 %v11187_v13  ;;  %v4210_v55 = vsel %vm4175_vm2, %v4157_v22, %v4193_v43  ;;  %11195 = vst [vmem:[#allocation12_spill] sm:$0xff] %v9965_v6 }
 0x9e1   :  { %v9935_v39 = vpack.c.bf16 %v4210_v55, %v11190_v23 }
 0x9e3   :  { %8100 = vmatmul.mubr.msk.f32.gmra.mrb[66].mxu1 %vm4321_vm4, %v9746_v19 }
 0x9e4   :  { %4576 = vmatprep.mubr.f32.mxu1 %v11187_v13 }
 0x9e7   :  { %8101 = vmatmul.mubr.msk.f32.vlgmr.msra.gmra.mrb[68].mxu1 %vm4321_vm4, %v9645_v50 }
 0x9e8   :  { %8371 = vmatpush1.bf16.msra.mxu1 %v9184_v45  ;;  %4582 = vmatprep.mubr.f32.mxu1 %v11187_v13 }
 0x9e9   :  { %8373 = vmatprep.subr.bf16.mxu1 %v9839_v34 }
 0x9eb   :  { %8102 = vmatmul.mubr.msk.f32.gmra.mrb[70].mxu1 %vm4321_vm4, %v9654_v20 }
 0x9ec   :  { %8375 = vmatpush1.bf16.msra.mxu1 %v9845_v58  ;;  %4588 = vmatprep.mubr.f32.mxu1 %v11187_v13 }
 0x9ed   :  { %8377 = vmatprep.subr.bf16.mxu1 %v9189_v0 }
 0x9ef   :  { %8103 = vmatmul.mubr.msk.f32.gmra.mrb[62].mxu1 %vm4321_vm4, %v9739_v12 }
 0x9f0   :  { %4594 = vmatprep.mubr.f32.mxu1 %v11187_v13 }
 0x9f3   :  { %8104 = vmatmul.mubr.msk.f32.gmra.mrb[72].mxu1 %vm4321_vm4, %v9746_v19 }
 0x9f4   :  { %4665 = vmatprep.mubr.f32.mxu1 %v11187_v13 }
 0x9f7   :  { %8105 = vmatmul.mubr.msk.f32.vlgmr.msra.gmra.mrb[74].mxu1 %vm4321_vm4, %v9645_v50 }
 0x9f8   :  { %8379 = vmatpush1.bf16.msra.mxu1 %v9212_v7  ;;  %4671 = vmatprep.mubr.f32.mxu1 %v11187_v13 }
 0x9f9   :  { %8381 = vmatprep.subr.bf16.mxu1 %v9869_v33 }
 0x9fb   :  { %8106 = vmatmul.mubr.msk.f32.gmra.mrb[76].mxu1 %vm4321_vm4, %v9654_v20 }
 0x9fc   :  { %8383 = vmatpush1.bf16.msra.mxu1 %v9875_v47  ;;  %4677 = vmatprep.mubr.f32.mxu1 %v11187_v13 }
 0x9fd   :  { %8385 = vmatprep.subr.bf16.mxu1 %v9217_v5 }
 0x9ff   :  { %8107 = vmatmul.mubr.msk.f32.gmra.mrb[68].mxu1 %vm4321_vm4, %v9739_v12 }
 0xa00   :  { %4683 = vmatprep.mubr.f32.mxu1 %v11187_v13 }
 0xa03   :  { %8108 = vmatmul.mubr.msk.f32.gmra.mrb[78].mxu1 %vm4321_vm4, %v9746_v19 }
 0xa04   :  { %4754 = vmatprep.mubr.f32.mxu1 %v11187_v13 }
 0xa07   :  { %8109 = vmatmul.mubr.msk.f32.vlgmr.msra.gmra.mrb[80].mxu1 %vm4321_vm4, %v9645_v50 }
 0xa08   :  { %8387 = vmatpush1.bf16.msra.mxu1 %v9233_v14  ;;  %4760 = vmatprep.mubr.f32.mxu1 %v11187_v13 }
 0xa09   :  { %8389 = vmatprep.subr.bf16.mxu1 %v9899_v31 }
 0xa0b   :  { %8110 = vmatmul.mubr.msk.f32.gmra.mrb[82].mxu1 %vm4321_vm4, %v9654_v20 }
 0xa0c   :  { %8391 = vmatpush1.bf16.msra.mxu1 %v9905_v61  ;;  %4766 = vmatprep.mubr.f32.mxu1 %v11187_v13 }
 0xa0d   :  { %8393 = vmatprep.subr.bf16.mxu1 %v9239_v15 }
 0xa0f   :  { %8111 = vmatmul.mubr.msk.f32.gmra.mrb[74].mxu1 %vm4321_vm4, %v9739_v12 }
 0xa10   :  { %4772 = vmatprep.mubr.f32.mxu1 %v11187_v13 }
 0xa13   :  { %8112 = vmatmul.mubr.msk.f32.gmra.mrb[84].mxu1 %vm4321_vm4, %v9746_v19 }
 0xa14   :  { %4843 = vmatprep.mubr.f32.mxu1 %v11187_v13 }
 0xa17   :  { %8113 = vmatmul.mubr.msk.f32.vlgmr.msra.gmra.mrb[86].mxu1 %vm4321_vm4, %v9645_v50 }
 0xa18   :  { %8395 = vmatpush1.bf16.msra.mxu1 %v11189_v52  ;;  %4849 = vmatprep.mubr.f32.mxu1 %v11187_v13 }
 0xa19   :  { %8397 = vmatprep.subr.bf16.mxu1 %v9929_v2 }
 0xa1b   :  { %8114 = vmatmul.mubr.msk.f32.gmra.mrb[88].mxu1 %vm4321_vm4, %v9654_v20 }
 0xa1c   :  { %8399 = vmatpush1.bf16.msra.mxu1 %v9935_v39  ;;  %4855 = vmatprep.mubr.f32.mxu1 %v11187_v13 }
 0xa1d   :  { %8401 = vmatprep.subr.bf16.mxu1 %v11191_v59 }
 0xa1f   :  { %8115 = vmatmul.mubr.msk.f32.gmra.mrb[80].mxu1 %vm4321_vm4, %v9739_v12 }
 0xa20   :  { %4861 = vmatprep.mubr.f32.mxu1 %v11187_v13 }
 0xa23   :  { %8116 = vmatmul.mubr.msk.f32.gmra.mrb[90].mxu1 %vm4321_vm4, %v9746_v19 }
 0xa24   :  { %4932 = vmatprep.mubr.f32.mxu1 %v11187_v13 }
 0xa27   :  { %8117 = vmatmul.mubr.msk.f32.vlgmr.msra.gmra.mrb[92].mxu1 %vm4321_vm4, %v9645_v50 }
 0xa28   :  { %8403 = vmatpush1.bf16.msra.mxu1 %v11193_v62  ;;  %4938 = vmatprep.mubr.f32.mxu1 %v11187_v13 }
 0xa29   :  { %8405 = vmatprep.subr.bf16.mxu1 %v9959_v16 }
 0xa2b   :  { %8118 = vmatmul.mubr.msk.f32.gmra.mrb[94].mxu1 %vm4321_vm4, %v9654_v20 }
 0xa2c   :  { %8407 = vmatpush1.bf16.msra.mxu1 %v9965_v6  ;;  %4944 = vmatprep.mubr.f32.mxu1 %v11187_v13 }
 0xa2d   :  { %8409 = vmatprep.subr.bf16.mxu1 %v11196_v53 }
 0xa2f   :  { %8119 = vmatmul.mubr.msk.f32.gmra.mrb[86].mxu1 %vm4321_vm4, %v9739_v12 }
 0xa30   :  { %4950 = vmatprep.mubr.f32.mxu1 %v11187_v13 }
 0xa33   :  { %8120 = vmatmul.mubr.msk.f32.gmra.mrb[96].mxu1 %vm4321_vm4, %v9746_v19 }
 0xa34   :  { %5021 = vmatprep.mubr.f32.mxu1 %v11187_v13 }
 0xa37   :  { %8121 = vmatmul.mubr.msk.f32.vlgmr.msra.gmra.mrb[98].mxu1 %vm4321_vm4, %v9645_v50  ;;  %v9993_v50 = vpop.f32.mrb[111].mxu0 }
 0xa38   :  { %8411 = vmatpush1.bf16.msra.mxu1 %v11197_v25  ;;  %5027 = vmatprep.mubr.f32.mxu1 %v11187_v13 }
 0xa39   :  { %8413 = vmatprep.subr.bf16.mxu1 %v9774_v37 }
 0xa3b   :  { %8122 = vmatmul.mubr.msk.f32.gmra.mrb[100].mxu1 %vm4321_vm4, %v9654_v20 }
 0xa3c   :  { %8415 = vmatpush1.bf16.msra.mxu1 %v9778_v35  ;;  %5033 = vmatprep.mubr.f32.mxu1 %v11187_v13 }
 0xa3f   :  { %8123 = vmatmul.mubr.msk.f32.gmra.mrb[92].mxu1 %vm4321_vm4, %v9739_v12 }
 0xa40   :  { %5039 = vmatprep.mubr.f32.mxu1 %v11187_v13 }
 0xa43   :  { %8124 = vmatmul.mubr.msk.f32.gmra.mrb[102].mxu1 %vm4321_vm4, %v9746_v19 }
 0xa44   :  { %5811 = vmatprep.mubr.f32.mxu1 %v11187_v13 }
 0xa9e   :  { %v4406_v37 = vpop.f32.mrb[56].mxu1 }
 0xa9f   :  { %v4408_v28 = vpop.f32.mrb[57].mxu1 }
 0xaa2   :  { %v4412_v1 = vpop.f32.mrb[58].mxu1 }
 0xaa3   :  { %v4414_v20 = vpop.f32.mrb[59].mxu1 }
 0xaa4   :  { %v5291_v48 = vadd.f32 %v4414_v20, %v4406_v37 }
 0xaa6   :  { %v4418_v35 = vpop.f32.mrb[60].mxu1 }
 0xaa7   :  { %v4420_v51 = vpop.f32.mrb[61].mxu1 }
 0xaa8   :  { %v9995_v9 = vadd.f32 %v4420_v51, %v4412_v1 }
 0xaae   :  { %v4495_v27 = vpop.f32.mrb[64].mxu1 }
 0xaaf   :  { %v4497_v12 = vpop.f32.mrb[65].mxu1 }
 0xab2   :  { %v4501_v18 = vpop.f32.mrb[54].mxu1 }
 0xab3   :  { %v5292_v41 = vadd.f32 %v4501_v18, %v4408_v28  ;;  %v4503_v36 = vpop.f32.mrb[55].mxu1 }
 0xab4   :  { %v5293_v17 = vadd.f32 %v4503_v36, %v4495_v27 }
 0xab6   :  { %v4507_v19 = vpop.f32.mrb[66].mxu1 }
 0xab7   :  { %v9997_v49 = vadd.f32 %v5291_v48, %v4507_v19  ;;  %v4509_v24 = vpop.f32.mrb[67].mxu1 }
 0xab8   :  { %v9999_v42 = vadd.f32 %v5292_v41, %v4509_v24 }
 0xabe   :  { %v4584_v22 = vpop.f32.mrb[70].mxu1 }
 0xabf   :  { %v4586_v21 = vpop.f32.mrb[71].mxu1 }
 0xac2   :  { %v4590_v43 = vpop.f32.mrb[62].mxu1 }
 0xac3   :  { %v5294_v63 = vadd.f32 %v4590_v43, %v4497_v12  ;;  %v4592_v3 = vpop.f32.mrb[63].mxu1 }
 0xac4   :  { %v5295_v55 = vadd.f32 %v4592_v3, %v4584_v22 }
 0xac6   :  { %v4596_v23 = vpop.f32.mrb[72].mxu1 }
 0xac7   :  { %v10001_v60 = vadd.f32 %v5293_v17, %v4596_v23  ;;  %v4598_v10 = vpop.f32.mrb[73].mxu1 }
 0xac8   :  { %v10003_v56 = vadd.f32 %v5294_v63, %v4598_v10 }
 0xace   :  { %v4673_v40 = vpop.f32.mrb[76].mxu1 }
 0xacf   :  { %v4675_v8 = vpop.f32.mrb[77].mxu1 }
 0xad2   :  { %v4679_v54 = vpop.f32.mrb[68].mxu1 }
 0xad3   :  { %v5296_v29 = vadd.f32 %v4679_v54, %v4586_v21  ;;  %v4681_v26 = vpop.f32.mrb[69].mxu1  ;;  %v5400_v21 = vadd.f32 %v9997_v49, %v9995_v9 }
 0xad4   :  { %v5297_v30 = vadd.f32 %v4681_v26, %v4673_v40 }
 0xad5   :  { %v5401_v23 = vadd.f32 %v5400_v21, %v9999_v42 }
 0xad6   :  { %v4685_v44 = vpop.f32.mrb[78].mxu1 }
 0xad7   :  { %v10005_v46 = vadd.f32 %v5295_v55, %v4685_v44  ;;  %v4687_v53 = vpop.f32.mrb[79].mxu1  ;;  %v5402_v10 = vadd.f32 %v5401_v23, %v10001_v60 }
 0xad8   :  { %v10007_v25 = vadd.f32 %v5296_v29, %v4687_v53 }
 0xade   :  { %v4762_v37 = vpop.f32.mrb[82].mxu1 }
 0xadf   :  { %v4764_v28 = vpop.f32.mrb[83].mxu1 }
 0xae2   :  { %v4768_v1 = vpop.f32.mrb[74].mxu1 }
 0xae3   :  { %v5298_v20 = vadd.f32 %v4768_v1, %v4675_v8  ;;  %v4770_v48 = vpop.f32.mrb[75].mxu1  ;;  %v5403_v8 = vadd.f32 %v5402_v10, %v10003_v56 }
 0xae4   :  { %v5299_v35 = vadd.f32 %v4770_v48, %v4762_v37 }
 0xae5   :  { %v5404_v29 = vadd.f32 %v5403_v8, %v10005_v46 }
 0xae6   :  { %v4774_v51 = vpop.f32.mrb[84].mxu1 }
 0xae7   :  { %v10009_v27 = vadd.f32 %v5297_v30, %v4774_v51  ;;  %v4776_v12 = vpop.f32.mrb[85].mxu1  ;;  %v5405_v37 = vadd.f32 %v5404_v29, %v10007_v25 }
 0xae8   :  { %v10011_v18 = vadd.f32 %v5298_v20, %v4776_v12 }
 0xae9   :  { %v5406_v1 = vadd.f32 %v5405_v37, %v10009_v27 }
 0xaeb   :  { %v5407_v12 = vadd.f32 %v5406_v1, %v10011_v18 }
 0xaee   :  { %v4851_v41 = vpop.f32.mrb[88].mxu1 }
 0xaef   :  { %v4853_v36 = vpop.f32.mrb[89].mxu1 }
 0xaf2   :  { %v4857_v17 = vpop.f32.mrb[80].mxu1 }
 0xaf3   :  { %v5300_v19 = vadd.f32 %v4857_v17, %v4764_v28  ;;  %v4859_v24 = vpop.f32.mrb[81].mxu1 }
 0xaf4   :  { %v5301_v22 = vadd.f32 %v4859_v24, %v4851_v41 }
 0xaf6   :  { %v4863_v43 = vpop.f32.mrb[90].mxu1 }
 0xaf7   :  { %v10015_v63 = vadd.f32 %v5299_v35, %v4863_v43  ;;  %v4865_v3 = vpop.f32.mrb[91].mxu1 }
 0xaf8   :  { %v10017_v55 = vadd.f32 %v5300_v19, %v4865_v3 }
 0xafe   :  { %v4940_v40 = vpop.f32.mrb[94].mxu1 }
 0xaff   :  { %v4942_v54 = vpop.f32.mrb[95].mxu1 }
 0xb02   :  { %v4946_v26 = vpop.f32.mrb[86].mxu1 }
 0xb03   :  { %v5302_v30 = vadd.f32 %v4946_v26, %v4853_v36  ;;  %v4948_v44 = vpop.f32.mrb[87].mxu1  ;;  %v5408_v36 = vadd.f32 %v5407_v12, %v10015_v63 }
 0xb04   :  { %v5303_v53 = vadd.f32 %v4948_v44, %v4940_v40 }
 0xb05   :  { %v5409_v43 = vadd.f32 %v5408_v36, %v10017_v55 }
 0xb06   :  { %v4952_v28 = vpop.f32.mrb[96].mxu1 }
 0xb07   :  { %v10025_v20 = vadd.f32 %v5301_v22, %v4952_v28  ;;  %v4954_v48 = vpop.f32.mrb[97].mxu1 }
 0xb08   :  { %v10027_v35 = vadd.f32 %v5302_v30, %v4954_v48 }
 0xb09   :  { %v5410_v22 = vadd.f32 %v5409_v43, %v10025_v20 }
 0xb0a   :  { %v5023_v51 = vpop.f32.mrb[98].mxu1 }
 0xb0b   :  { %v5243_v41 = vadd.f32 %v9993_v50, %v5023_v51  ;;  %v5025_v17 = vpop.f32.mrb[99].mxu1  ;;  %v5411_v29 = vadd.f32 %v5410_v22, %v10027_v35 }
 0xb0e   :  { %v5029_v19 = vpop.f32.mrb[100].mxu1 }
 0xb0f   :  { %v5031_v24 = vpop.f32.mrb[101].mxu1 }
 0xb10   :  { %v5306_v21 = vadd.f32 %v5243_v41, %v5031_v24 }
 0xb12   :  { %v5035_v3 = vpop.f32.mrb[92].mxu1 }
 0xb13   :  { %v5304_v23 = vadd.f32 %v5035_v3, %v4942_v54  ;;  %v5037_v10 = vpop.f32.mrb[93].mxu1 }
 0xb14   :  { %v10034_v40 = vadd.f32 %v5037_v10, %v5029_v19 }
 0xb16   :  { %v5041_v8 = vpop.f32.mrb[102].mxu1 }
 0xb17   :  { %v10037_v26 = vadd.f32 %v5303_v53, %v5041_v8  ;;  %v5043_v50 = vpop.f32.mrb[103].mxu1 }
 0xb18   :  { %v10039_v30 = vadd.f32 %v5304_v23, %v5043_v50 }
 0xb19   :  { %v5412_v44 = vadd.f32 %v5411_v29, %v10037_v26 }
 0xb1b   :  { %v5413_v37 = vadd.f32 %v5412_v44, %v10039_v30 }
 0xb1d   :  { %v5414_v28 = vadd.f32 %v5413_v37, %v10034_v40 }
 0xb1f   :  { %v5415_v1 = vadd.f32 %v5414_v28, %v5306_v21 }
 0xb21   :  { %5416 = vadd.xlane.f32.xlu0 %v5415_v1 }
 0xbae   :  { %v5417_v54 = vpop.xlane.xlu0 %5416 }
 0xbaf   :  { %v5418_v48 = vmul.f32 0.00045955883, %v5417_v54 }
 0xbb1   :  { %v5419_v51 = vsub.f32 %v9995_v9, %v5418_v48  ;;  %v5420_v12 = vsub.f32 %v9997_v49, %v5418_v48  ;;  %v5421_v53 = vsub.f32 %v9999_v42, %v5418_v48  ;;  %v5422_v36 = vsub.f32 %v10001_v60, %v5418_v48 }
 0xbb2   :  { %v5423_v19 = vsub.f32 %v10003_v56, %v5418_v48  ;;  %v5424_v3 = vsub.f32 %v10005_v46, %v5418_v48  ;;  %v5425_v10 = vsub.f32 %v10007_v25, %v5418_v48  ;;  %v5426_v50 = vsub.f32 %v10009_v27, %v5418_v48 }
 0xbb3   :  { %v5453_v41 = vmul.f32 %v5419_v51, %v5419_v51  ;;  %v5454_v17 = vmul.f32 %v5420_v12, %v5420_v12  ;;  %v5455_v24 = vmul.f32 %v5421_v53, %v5421_v53  ;;  %v5456_v22 = vmul.f32 %v5422_v36, %v5422_v36 }
 0xbb4   :  { %v5457_v8 = vmul.f32 %v5423_v19, %v5423_v19  ;;  %v5458_v44 = vmul.f32 %v5424_v3, %v5424_v3  ;;  %v5427_v28 = vsub.f32 %v10011_v18, %v5418_v48  ;;  %v5459_v1 = vmul.f32 %v5425_v10, %v5425_v10 }
 0xbb5   :  { %v5470_v43 = vadd.f32 %v5454_v17, %v5453_v41  ;;  %v5428_v51 = vsub.f32 %v10015_v63, %v5418_v48  ;;  %v5460_v12 = vmul.f32 %v5426_v50, %v5426_v50  ;;  %v5429_v41 = vsub.f32 %v10017_v55, %v5418_v48 }
 0xbb6   :  { %v5461_v17 = vmul.f32 %v5427_v28, %v5427_v28 }
 0xbb7   :  { %v5471_v23 = vadd.f32 %v5470_v43, %v5455_v24  ;;  %v5430_v24 = vsub.f32 %v10025_v20, %v5418_v48  ;;  %v5462_v19 = vmul.f32 %v5428_v51, %v5428_v51  ;;  %v5463_v3 = vmul.f32 %v5429_v41, %v5429_v41 }
 0xbb9   :  { %v5472_v29 = vadd.f32 %v5471_v23, %v5456_v22  ;;  %v5431_v22 = vsub.f32 %v10027_v35, %v5418_v48  ;;  %v5464_v10 = vmul.f32 %v5430_v24, %v5430_v24 }
 0xbbb   :  { %v5473_v37 = vadd.f32 %v5472_v29, %v5457_v8  ;;  %v5432_v8 = vsub.f32 %v10037_v26, %v5418_v48  ;;  %v5465_v50 = vmul.f32 %v5431_v22, %v5431_v22  ;;  %v8129_v22 = vld [vmem:[%s11154_s6 + $0x18] sm:$0xff]  ;;  %s8131_s6 = sld [smem:[#allocation4 + $0x3]] }
 0xbbd   :  { %v5474_v54 = vadd.f32 %v5473_v37, %v5458_v44  ;;  %v5433_v44 = vsub.f32 %v10039_v30, %v5418_v48  ;;  %v5466_v28 = vmul.f32 %v5432_v8, %v5432_v8 }
 0xbbf   :  { %v5475_v53 = vadd.f32 %v5474_v54, %v5459_v1  ;;  %v5434_v1 = vsub.f32 %v10034_v40, %v5418_v48 }
 0xbc1   :  { %v5476_v36 = vadd.f32 %v5475_v53, %v5460_v12  ;;  %v5435_v12 = vsub.f32 %v5306_v21, %v5418_v48  ;;  %v5467_v53 = vmul.f32 %v5433_v44, %v5433_v44  ;;  %v8130_v21 = vld [vmem:[%s11155_s7 + $0x18] sm:$0xff]  ;;  %v7132_v44 = vld [vmem:[%s11156_s8] sm:$0xff] }
 0xbc3   :  { %v5477_v43 = vadd.f32 %v5476_v36, %v5461_v17  ;;  %v5468_v17 = vmul.f32 %v5434_v1, %v5434_v1  ;;  %v5469_v6 = vmul.f32 %v5435_v12, %v5435_v12  ;;  %v10084_v12 = vstv %s8131_s6  ;;  %s8204_s6 = sld [smem:[#allocation4 + $0x4]] }
 0xbc5   :  { %v5478_v23 = vadd.f32 %v5477_v43, %v5462_v19 }
 0xbc7   :  { %v5479_v29 = vadd.f32 %v5478_v23, %v5463_v3 }
 0xbc9   :  { %v5480_v37 = vadd.f32 %v5479_v29, %v5464_v10 }
 0xbcb   :  { %v5481_v54 = vadd.f32 %v5480_v37, %v5465_v50 }
 0xbcd   :  { %v5482_v51 = vadd.f32 %v5481_v54, %v5466_v28 }
 0xbcf   :  { %v5483_v36 = vadd.f32 %v5482_v51, %v5467_v53 }
 0xbd1   :  { %v5484_v41 = vadd.f32 %v5483_v36, %v5468_v17 }
 0xbd3   :  { %v5485_v19 = vadd.f32 %v5484_v41, %v5469_v6  ;;  %v7133_v6 = vld [vmem:[%s11157_s9] sm:$0xff] }
 0xbd5   :  { %5486 = vadd.xlane.f32.xlu1 %v5485_v19 }
 0xc62   :  { %v5487_v43 = vpop.xlane.xlu1 %5486 }
 0xc63   :  { %v5488_v24 = vmul.f32 0.00045955883, %v5487_v43 }
 0xc65   :  { %v5491_v3 = vadd.f32 1e-05, %v5488_v24 }
 0xc67   :  { %8539 = vrsqrt.f32 %v5491_v3  ;;  %v10102_v3 = vld [vmem:[%s11153_s5] sm:$0xff] }
 0xc71   :  { %v8540_v23 = vpop.eup %8539 }
 0xc72   :  { %v5493_v8 = vmul.f32 %v8540_v23, %v8129_v22 }
 0xc74   :  { %5500 = vperm.xlu0 %8532, %v5493_v8   ;;  %v5496_v10 = vmul.f32 %v5493_v8, %v5418_v48 }
 0xc76   :  { %v5497_v29 = vsub.f32 %v8130_v21, %v5496_v10 }
 0xc78   :  { %7192 = vperm.xlu0 %8532, %v7133_v6   ;;  %5522 = vperm.xlu1 %8531, %v5497_v29  }
 0xc7c   :  { %7153 = vperm.xlu0 %8532, %v7132_v44  }
 0xcf3   :  { %v10072_v50 = vpop.permute.xlu0 %5500 }
 0xcf4   :  { %v5504_v37 = vmul.f32 %v10072_v50, %v9997_v49  ;;  %v5506_v48 = vmul.f32 %v10072_v50, %v10001_v60  ;;  %v5503_v1 = vmul.f32 %v10072_v50, %v9995_v9  ;;  %v5505_v28 = vmul.f32 %v10072_v50, %v9999_v42 }
 0xcf5   :  { %v5508_v53 = vmul.f32 %v10072_v50, %v10005_v46  ;;  %v5510_v42 = vmul.f32 %v10072_v50, %v10009_v27  ;;  %v5507_v27 = vmul.f32 %v10072_v50, %v10003_v56  ;;  %v5509_v21 = vmul.f32 %v10072_v50, %v10007_v25  ;;  %v10123_v25 = vld [vmem:[%s11153_s5 + $0x8] sm:$0xff] }
 0xcf6   :  { %v5516_v44 = vmul.f32 %v10072_v50, %v10037_v26 }
 0xcf7   :  { %v10082_v54 = vpop.permute.xlu1 %5522 }
 0xcf8   :  { %v5526_v51 = vadd.f32 %v10082_v54, %v5504_v37  ;;  %v5528_v49 = vadd.f32 %v10082_v54, %v5506_v48  ;;  %v5525_v17 = vadd.f32 %v10082_v54, %v5503_v1  ;;  %v5527_v60 = vadd.f32 %v10082_v54, %v5505_v28 }
 0xcf9   :  { %v5530_v9 = vadd.f32 %v10082_v54, %v5508_v53  ;;  %v5532_v8 = vadd.f32 %v10082_v54, %v5510_v42  ;;  %v5529_v56 = vadd.f32 %v10082_v54, %v5507_v27  ;;  %v5531_v6 = vadd.f32 %v10082_v54, %v5509_v21  ;;  %v10430_v21 = vpop.permute.xlu0 %7192 }
 0xcfa   :  { %vm5544_vm4 = vcmp.ge.f32.partialorder %v5526_v51, 0.0  ;;  %v5562_v36 = vmul.f32 %v10084_v12, %v5526_v51  ;;  %vm5546_vm5 = vcmp.ge.f32.partialorder %v5528_v49, 0.0  ;;  %v5564_v41 = vmul.f32 %v10084_v12, %v5528_v49 }
 0xcfb   :  { %vm5543_vm6 = vcmp.ge.f32.partialorder %v5525_v17, 0.0  ;;  %v5561_v46 = vmul.f32 %v10084_v12, %v5525_v17  ;;  %vm5545_vm7 = vcmp.ge.f32.partialorder %v5527_v60, 0.0  ;;  %v5563_v19 = vmul.f32 %v10084_v12, %v5527_v60 }
 0xcfc   :  { %v5579_v43 = vsel %vm5544_vm4, %v5526_v51, %v5562_v36  ;;  %v5581_v24 = vsel %vm5546_vm5, %v5528_v49, %v5564_v41  ;;  %v5566_v10 = vmul.f32 %v10084_v12, %v5530_v9  ;;  %vm5548_vm9 = vcmp.ge.f32.partialorder %v5530_v9, 0.0  ;;  %v10216_v36 = vld [vmem:[%s11153_s5 + $0x30] sm:$0xff]  ;;  %v10227_v41 = vld [vmem:[%s11153_s5 + $0x38] sm:$0xff] }
 0xcfd   :  { %5755 = vmatprep.subr.mxu1 %v5579_v43  ;;  %5868 = vmatprep.subr.mxu0 %v5581_v24  ;;  %v5578_v22 = vsel %vm5543_vm6, %v5525_v17, %v5561_v46  ;;  %v5580_v23 = vsel %vm5545_vm7, %v5527_v60, %v5563_v19  ;;  %v5568_v29 = vmul.f32 %v10084_v12, %v5532_v8  ;;  %vm5550_vm10 = vcmp.ge.f32.partialorder %v5532_v8, 0.0  ;;  %v10175_v60 = vld [vmem:[%s11153_s5 + $0x18] sm:$0xff] }
 0xcfe   :  { %5756 = vmatpush1.msra.mxu1 %v5578_v22  ;;  %5869 = vmatpush1.msra.mxu0 %v5580_v23  ;;  %v5565_v26 = vmul.f32 %v10084_v12, %v5529_v56  ;;  %vm5547_vm11 = vcmp.ge.f32.partialorder %v5529_v56, 0.0  ;;  %vm5549_vm12 = vcmp.ge.f32.partialorder %v5531_v6, 0.0  ;;  %v5512_v46 = vmul.f32 %v10072_v50, %v10015_v63 }
 0xcff   :  { %8132 = vmatmul.mubr.msk.f32.vlgmr.msra.gmra.mrb[104].mxu1 %vm5722_vm8, %v10102_v3  ;;  %8140 = vmatmul.mubr.msk.f32.vlgmr.msra.gmra.mrb[112].mxu0 %vm5722_vm8, %v10102_v3  ;;  %v5514_v19 = vmul.f32 %v10072_v50, %v10025_v20  ;;  %v5511_v63 = vmul.f32 %v10072_v50, %v10011_v18  ;;  %v5513_v20 = vmul.f32 %v10072_v50, %v10017_v55 }
 0xd00   :  { %8425 = vmatprep.subr.bf16.mxu1 %v9106_v4  ;;  %8433 = vmatprep.subr.bf16.mxu0 %v9161_v32  ;;  %v5518_v4 = vmul.f32 %v10072_v50, %v10034_v40  ;;  %v5517_v32 = vmul.f32 %v10072_v50, %v10039_v30  ;;  %v5585_v40 = vsel %vm5550_vm10, %v5532_v8, %v5568_v29  ;;  %v10152_v30 = vld [vmem:[%s11153_s5 + $0x10] sm:$0xff] }
 0xd01   :  { %8427 = vmatpush1.bf16.msra.mxu1 %v9156_v57  ;;  %8435 = vmatpush1.bf16.msra.mxu0 %v9184_v45  ;;  %v5515_v57 = vmul.f32 %v10072_v50, %v10027_v35  ;;  %v5583_v45 = vsel %vm5548_vm9, %v5530_v9, %v5566_v10  ;;  %v5534_v43 = vadd.f32 %v10082_v54, %v5512_v46 }
 0xd02   :  { %8429 = vmatprep.subr.bf16.mxu1 %v9809_v11  ;;  %8437 = vmatprep.subr.bf16.mxu0 %v9839_v34  ;;  %v5538_v11 = vadd.f32 %v10082_v54, %v5516_v44  ;;  %v5567_v34 = vmul.f32 %v10084_v12, %v5531_v6  ;;  %v5540_v35 = vadd.f32 %v10082_v54, %v5518_v4 }
 0xd03   :  { %5817 = vmatprep.mubr.f32.mxu1 %v11187_v13  ;;  %5930 = vmatprep.mubr.f32.mxu0 %v11187_v13  ;;  %v5537_v48 = vadd.f32 %v10082_v54, %v5515_v57  ;;  %v5536_v24 = vadd.f32 %v10082_v54, %v5514_v19  ;;  %v5533_v27 = vadd.f32 %v10082_v54, %v5511_v63  ;;  %vm5552_vm2 = vcmp.ge.f32.partialorder %v5534_v43, 0.0  ;;  %v10448_v19 = vpop.permute.xlu0 %7153 }
 0xd04   :  { %8133 = vmatmul.mubr.msk.f32.gmra.mrb[106].mxu1 %vm5722_vm8, %v10123_v25  ;;  %8141 = vmatmul.mubr.msk.f32.gmra.mrb[114].mxu0 %vm5722_vm8, %v10123_v25  ;;  %vm5556_vm13 = vcmp.ge.f32.partialorder %v5538_v11, 0.0  ;;  %v5574_v37 = vmul.f32 %v10084_v12, %v5538_v11  ;;  %vm5558_vm14 = vcmp.ge.f32.partialorder %v5540_v35, 0.0  ;;  %v5576_v1 = vmul.f32 %v10084_v12, %v5540_v35 }
 0xd05   :  { %8431 = vmatpush1.bf16.msra.mxu1 %v9815_v38  ;;  %8439 = vmatpush1.bf16.msra.mxu0 %v9845_v58  ;;  %v5539_v38 = vadd.f32 %v10082_v54, %v5517_v32  ;;  %v5582_v58 = vsel %vm5547_vm11, %v5529_v56, %v5565_v26  ;;  %vm5555_vm15 = vcmp.ge.f32.partialorder %v5537_v48, 0.0  ;;  %v5573_v53 = vmul.f32 %v10084_v12, %v5537_v48 }
 0xd06   :  { %5981 = vmatprep.subr.mxu1 %v5583_v45  ;;  %6094 = vmatprep.subr.mxu0 %v5585_v40  ;;  %v10161_v28 = vsel %vm5556_vm13, %v5538_v11, %v5574_v37  ;;  %v5584_v51 = vsel %vm5549_vm12, %v5531_v6, %v5567_v34  ;;  %v10169_v49 = vsel %vm5558_vm14, %v5540_v35, %v5576_v1  ;;  %vm5554_vm1 = vcmp.ge.f32.partialorder %v5536_v24, 0.0 }
 0xd07   :  { %5823 = vmatprep.mubr.f32.mxu1 %v11187_v13  ;;  %5936 = vmatprep.mubr.f32.mxu0 %v11187_v13  ;;  %vm5557_vm0 = vcmp.ge.f32.partialorder %v5539_v38, 0.0  ;;  %v5575_v17 = vmul.f32 %v10084_v12, %v5539_v38  ;;  %v10177_v9 = vsel %vm5555_vm15, %v5537_v48, %v5573_v53  ;;  %v5535_v22 = vadd.f32 %v10082_v54, %v5513_v20 }
 0xd08   :  { %8134 = vmatmul.mubr.msk.f32.gmra.mrb[108].mxu1 %vm5722_vm8, %v10152_v30  ;;  %8142 = vmatmul.mubr.msk.f32.gmra.mrb[116].mxu0 %vm5722_vm8, %v10152_v30  ;;  %v5570_v23 = vmul.f32 %v10084_v12, %v5534_v43  ;;  %v5572_v18 = vmul.f32 %v10084_v12, %v5536_v24  ;;  %vm5551_vm3 = vcmp.ge.f32.partialorder %v5533_v27, 0.0 }
 0xd09   :  { %5982 = vmatpush1.msra.mxu1 %v5582_v58  ;;  %6095 = vmatpush1.msra.mxu0 %v5584_v51  ;;  %v10181_v42 = vsel %vm5557_vm0, %v5539_v38, %v5575_v17  ;;  %vm5553_vm4 = vcmp.ge.f32.partialorder %v5535_v22, 0.0 }
 0xd0a   :  { %8441 = vmatprep.subr.bf16.mxu1 %v9189_v0  ;;  %8449 = vmatprep.subr.bf16.mxu0 %v9217_v5  ;;  %v10194_v0 = vld [vmem:[%s11153_s5 + $0x20] sm:$0xff]  ;;  %v10205_v5 = vld [vmem:[%s11153_s5 + $0x28] sm:$0xff] }
 0xd0b   :  { %5829 = vmatprep.mubr.f32.mxu1 %v11187_v13  ;;  %5942 = vmatprep.mubr.f32.mxu0 %v11187_v13 }
 0xd0c   :  { %8135 = vmatmul.mubr.msk.f32.gmra.mrb[110].mxu1 %vm5722_vm8, %v10175_v60  ;;  %8143 = vmatmul.mubr.msk.f32.gmra.mrb[118].mxu0 %vm5722_vm8, %v10175_v60 }
 0xd0d   :  { %5835 = vmatprep.mubr.f32.mxu1 %v11187_v13  ;;  %5948 = vmatprep.mubr.f32.mxu0 %v11187_v13 }
 0xd10   :  { %8136 = vmatmul.mubr.msk.f32.gmra.mrb[112].mxu1 %vm5722_vm8, %v10194_v0  ;;  %8144 = vmatmul.mubr.msk.f32.gmra.mrb[120].mxu0 %vm5722_vm8, %v10194_v0 }
 0xd11   :  { %5841 = vmatprep.mubr.f32.mxu1 %v11187_v13  ;;  %5954 = vmatprep.mubr.f32.mxu0 %v11187_v13 }
 0xd14   :  { %8137 = vmatmul.mubr.msk.f32.gmra.mrb[114].mxu1 %vm5722_vm8, %v10205_v5  ;;  %8145 = vmatmul.mubr.msk.f32.gmra.mrb[122].mxu0 %vm5722_vm8, %v10205_v5 }
 0xd15   :  { %5847 = vmatprep.mubr.f32.mxu1 %v11187_v13  ;;  %5960 = vmatprep.mubr.f32.mxu0 %v11187_v13 }
 0xd18   :  { %8138 = vmatmul.mubr.msk.f32.gmra.mrb[116].mxu1 %vm5722_vm8, %v10216_v36  ;;  %8146 = vmatmul.mubr.msk.f32.gmra.mrb[124].mxu0 %vm5722_vm8, %v10216_v36 }
 0xd19   :  { %5853 = vmatprep.mubr.f32.mxu1 %v11187_v13  ;;  %5966 = vmatprep.mubr.f32.mxu0 %v11187_v13 }
 0xd1c   :  { %8139 = vmatmul.mubr.msk.f32.gmra.mrb[118].mxu1 %vm5722_vm8, %v10227_v41  ;;  %8147 = vmatmul.mubr.msk.f32.gmra.mrb[126].mxu0 %vm5722_vm8, %v10227_v41 }
 0xd1d   :  { %6037 = vmatprep.mubr.f32.mxu1 %v11187_v13  ;;  %6150 = vmatprep.mubr.f32.mxu0 %v11187_v13 }
 0xd20   :  { %8148 = vmatmul.mubr.msk.f32.vlgmr.msra.gmra.mrb[120].mxu1 %vm5722_vm8, %v10102_v3  ;;  %8156 = vmatmul.mubr.msk.f32.vlgmr.msra.gmra.mrb[128].mxu0 %vm5722_vm8, %v10102_v3 }
 0xd21   :  { %8443 = vmatpush1.bf16.msra.mxu1 %v9212_v7  ;;  %8451 = vmatpush1.bf16.msra.mxu0 %v9233_v14  ;;  %v5569_v7 = vmul.f32 %v10084_v12, %v5533_v27  ;;  %v5571_v14 = vmul.f32 %v10084_v12, %v5535_v22 }
 0xd22   :  { %8445 = vmatprep.subr.bf16.mxu1 %v9869_v33  ;;  %8453 = vmatprep.subr.bf16.mxu0 %v9899_v31  ;;  %v5587_v33 = vsel %vm5552_vm2, %v5534_v43, %v5570_v23  ;;  %v5589_v31 = vsel %vm5554_vm1, %v5536_v24, %v5572_v18 }
 0xd23   :  { %6043 = vmatprep.mubr.f32.mxu1 %v11187_v13  ;;  %6156 = vmatprep.mubr.f32.mxu0 %v11187_v13  ;;  %v5586_v55 = vsel %vm5551_vm3, %v5533_v27, %v5569_v7 }
 0xd24   :  { %8149 = vmatmul.mubr.msk.f32.gmra.mrb[122].mxu1 %vm5722_vm8, %v10123_v25  ;;  %8157 = vmatmul.mubr.msk.f32.gmra.mrb[130].mxu0 %vm5722_vm8, %v10123_v25 }
 0xd25   :  { %8447 = vmatpush1.bf16.msra.mxu1 %v9875_v47  ;;  %8455 = vmatpush1.bf16.msra.mxu0 %v9905_v61  ;;  %v5588_v47 = vsel %vm5553_vm4, %v5535_v22, %v5571_v14  ;;  %v8612_v61 = vld [vmem:[%s11148_s0 + $0x80] sm:$0xff] }
 0xd26   :  { %6207 = vmatprep.subr.mxu1 %v5587_v33  ;;  %6320 = vmatprep.subr.mxu0 %v5589_v31 }
 0xd27   :  { %6049 = vmatprep.mubr.f32.mxu1 %v11187_v13  ;;  %6162 = vmatprep.mubr.f32.mxu0 %v11187_v13 }
 0xd28   :  { %8150 = vmatmul.mubr.msk.f32.gmra.mrb[124].mxu1 %vm5722_vm8, %v10152_v30  ;;  %8158 = vmatmul.mubr.msk.f32.gmra.mrb[132].mxu0 %vm5722_vm8, %v10152_v30 }
 0xd29   :  { %6208 = vmatpush1.msra.mxu1 %v5586_v55  ;;  %6321 = vmatpush1.msra.mxu0 %v5588_v47 }
 0xd2a   :  { %8457 = vmatprep.subr.bf16.mxu1 %v9239_v15  ;;  %8465 = vmatprep.subr.bf16.mxu0 %v11191_v59  ;;  %v11198_v15 = vld [vmem:[#allocation12_spill] sm:$0xff] }
 0xd2b   :  { %6055 = vmatprep.mubr.f32.mxu1 %v11187_v13  ;;  %6168 = vmatprep.mubr.f32.mxu0 %v11187_v13 }
 0xd2c   :  { %8151 = vmatmul.mubr.msk.f32.gmra.mrb[126].mxu1 %vm5722_vm8, %v10175_v60  ;;  %8159 = vmatmul.mubr.msk.f32.gmra.mrb[134].mxu0 %vm5722_vm8, %v10175_v60 }
 0xd2d   :  { %6061 = vmatprep.mubr.f32.mxu1 %v11187_v13  ;;  %6174 = vmatprep.mubr.f32.mxu0 %v11187_v13 }
 0xd30   :  { %8152 = vmatmul.mubr.msk.f32.gmra.mrb[128].mxu1 %vm5722_vm8, %v10194_v0  ;;  %8160 = vmatmul.mubr.msk.f32.gmra.mrb[136].mxu0 %vm5722_vm8, %v10194_v0 }
 0xd31   :  { %6067 = vmatprep.mubr.f32.mxu1 %v11187_v13  ;;  %6180 = vmatprep.mubr.f32.mxu0 %v11187_v13 }
 0xd34   :  { %8153 = vmatmul.mubr.msk.f32.gmra.mrb[130].mxu1 %vm5722_vm8, %v10205_v5  ;;  %8161 = vmatmul.mubr.msk.f32.gmra.mrb[138].mxu0 %vm5722_vm8, %v10205_v5 }
 0xd35   :  { %6073 = vmatprep.mubr.f32.mxu1 %v11187_v13  ;;  %6186 = vmatprep.mubr.f32.mxu0 %v11187_v13 }
 0xd38   :  { %8154 = vmatmul.mubr.msk.f32.gmra.mrb[132].mxu1 %vm5722_vm8, %v10216_v36  ;;  %8162 = vmatmul.mubr.msk.f32.gmra.mrb[140].mxu0 %vm5722_vm8, %v10216_v36 }
 0xd39   :  { %6079 = vmatprep.mubr.f32.mxu1 %v11187_v13  ;;  %6192 = vmatprep.mubr.f32.mxu0 %v11187_v13 }
 0xd3c   :  { %8155 = vmatmul.mubr.msk.f32.gmra.mrb[134].mxu1 %vm5722_vm8, %v10227_v41  ;;  %8163 = vmatmul.mubr.msk.f32.gmra.mrb[142].mxu0 %vm5722_vm8, %v10227_v41 }
 0xd3d   :  { %6263 = vmatprep.mubr.f32.mxu1 %v11187_v13  ;;  %6376 = vmatprep.mubr.f32.mxu0 %v11187_v13 }
 0xd40   :  { %8164 = vmatmul.mubr.msk.f32.vlgmr.msra.gmra.mrb[136].mxu1 %vm5722_vm8, %v10102_v3  ;;  %8172 = vmatmul.mubr.msk.f32.vlgmr.msra.gmra.mrb[144].mxu0 %vm5722_vm8, %v10102_v3 }
 0xd41   :  { %8459 = vmatpush1.bf16.msra.mxu1 %v11189_v52  ;;  %8467 = vmatpush1.bf16.msra.mxu0 %v11193_v62 }
 0xd42   :  { %8461 = vmatprep.subr.bf16.mxu1 %v9929_v2  ;;  %8469 = vmatprep.subr.bf16.mxu0 %v9959_v16 }
 0xd43   :  { %6269 = vmatprep.mubr.f32.mxu1 %v11187_v13  ;;  %6382 = vmatprep.mubr.f32.mxu0 %v11187_v13 }
 0xd44   :  { %8165 = vmatmul.mubr.msk.f32.gmra.mrb[138].mxu1 %vm5722_vm8, %v10123_v25  ;;  %8173 = vmatmul.mubr.msk.f32.gmra.mrb[146].mxu0 %vm5722_vm8, %v10123_v25 }
 0xd45   :  { %8463 = vmatpush1.bf16.msra.mxu1 %v9935_v39  ;;  %8471 = vmatpush1.bf16.msra.mxu0 %v11198_v15 }
 0xd46   :  { %6433 = vmatprep.subr.mxu1 %v10161_v28  ;;  %6546 = vmatprep.subr.mxu0 %v10169_v49 }
 0xd47   :  { %6275 = vmatprep.mubr.f32.mxu1 %v11187_v13  ;;  %6388 = vmatprep.mubr.f32.mxu0 %v11187_v13 }
 0xd48   :  { %8166 = vmatmul.mubr.msk.f32.gmra.mrb[140].mxu1 %vm5722_vm8, %v10152_v30  ;;  %8174 = vmatmul.mubr.msk.f32.gmra.mrb[148].mxu0 %vm5722_vm8, %v10152_v30 }
 0xd49   :  { %6434 = vmatpush1.msra.mxu1 %v10177_v9  ;;  %6547 = vmatpush1.msra.mxu0 %v10181_v42 }
 0xd4a   :  { %6281 = vmatprep.mubr.f32.mxu1 %v11187_v13  ;;  %6394 = vmatprep.mubr.f32.mxu0 %v11187_v13 }
 0xd4b   :  { %8266 = vmatprep.subr.mxu1 %v8612_v61 }
 0xd4c   :  { %8167 = vmatmul.mubr.msk.f32.gmra.mrb[142].mxu1 %vm5722_vm8, %v10175_v60  ;;  %8175 = vmatmul.mubr.msk.f32.gmra.mrb[150].mxu0 %vm5722_vm8, %v10175_v60 }
 0xd4d   :  { %6287 = vmatprep.mubr.f32.mxu1 %v11187_v13  ;;  %6400 = vmatprep.mubr.f32.mxu0 %v11187_v13 }
 0xd50   :  { %8168 = vmatmul.mubr.msk.f32.gmra.mrb[144].mxu1 %vm5722_vm8, %v10194_v0  ;;  %8176 = vmatmul.mubr.msk.f32.gmra.mrb[152].mxu0 %vm5722_vm8, %v10194_v0 }
 0xd51   :  { %6293 = vmatprep.mubr.f32.mxu1 %v11187_v13  ;;  %6406 = vmatprep.mubr.f32.mxu0 %v11187_v13 }
 0xd54   :  { %8169 = vmatmul.mubr.msk.f32.gmra.mrb[146].mxu1 %vm5722_vm8, %v10205_v5  ;;  %8177 = vmatmul.mubr.msk.f32.gmra.mrb[154].mxu0 %vm5722_vm8, %v10205_v5 }
 0xd55   :  { %6299 = vmatprep.mubr.f32.mxu1 %v11187_v13  ;;  %6412 = vmatprep.mubr.f32.mxu0 %v11187_v13 }
 0xd58   :  { %8170 = vmatmul.mubr.msk.f32.gmra.mrb[148].mxu1 %vm5722_vm8, %v10216_v36  ;;  %8178 = vmatmul.mubr.msk.f32.gmra.mrb[156].mxu0 %vm5722_vm8, %v10216_v36 }
 0xd59   :  { %6305 = vmatprep.mubr.f32.mxu1 %v11187_v13  ;;  %6418 = vmatprep.mubr.f32.mxu0 %v11187_v13 }
 0xd5c   :  { %8171 = vmatmul.mubr.msk.f32.gmra.mrb[150].mxu1 %vm5722_vm8, %v10227_v41  ;;  %8179 = vmatmul.mubr.msk.f32.gmra.mrb[158].mxu0 %vm5722_vm8, %v10227_v41 }
 0xd5d   :  { %6489 = vmatprep.mubr.f32.mxu1 %v11187_v13  ;;  %6602 = vmatprep.mubr.f32.mxu0 %v11187_v13 }
 0xd60   :  { %8180 = vmatmul.mubr.msk.f32.vlgmr.msra.gmra.mrb[152].mxu1 %vm5722_vm8, %v10102_v3  ;;  %8188 = vmatmul.mubr.msk.f32.vlgmr.msra.gmra.mrb[160].mxu0 %vm5722_vm8, %v10102_v3 }
 0xd61   :  { %6495 = vmatprep.mubr.f32.mxu1 %v11187_v13  ;;  %6608 = vmatprep.mubr.f32.mxu0 %v11187_v13 }
 0xd62   :  { %8267 = vmatpush3.msra.mxu1 %v8612_v61 }
 0xd64   :  { %8181 = vmatmul.mubr.msk.f32.gmra.mrb[154].mxu1 %vm5722_vm8, %v10123_v25  ;;  %8189 = vmatmul.mubr.msk.f32.gmra.mrb[162].mxu0 %vm5722_vm8, %v10123_v25 }
 0xd65   :  { %6501 = vmatprep.mubr.f32.mxu1 %v11187_v13  ;;  %6614 = vmatprep.mubr.f32.mxu0 %v11187_v13 }
 0xd68   :  { %8182 = vmatmul.mubr.msk.f32.gmra.mrb[156].mxu1 %vm5722_vm8, %v10152_v30  ;;  %8190 = vmatmul.mubr.msk.f32.gmra.mrb[164].mxu0 %vm5722_vm8, %v10152_v30 }
 0xd69   :  { %6507 = vmatprep.mubr.f32.mxu1 %v11187_v13  ;;  %6620 = vmatprep.mubr.f32.mxu0 %v11187_v13 }
 0xd6c   :  { %8183 = vmatmul.mubr.msk.f32.gmra.mrb[158].mxu1 %vm5722_vm8, %v10175_v60  ;;  %8191 = vmatmul.mubr.msk.f32.gmra.mrb[166].mxu0 %vm5722_vm8, %v10175_v60 }
 0xd6d   :  { %6513 = vmatprep.mubr.f32.mxu1 %v11187_v13  ;;  %6626 = vmatprep.mubr.f32.mxu0 %v11187_v13 }
 0xd70   :  { %8184 = vmatmul.mubr.msk.f32.gmra.mrb[160].mxu1 %vm5722_vm8, %v10194_v0  ;;  %8192 = vmatmul.mubr.msk.f32.gmra.mrb[168].mxu0 %vm5722_vm8, %v10194_v0 }
 0xd71   :  { %6519 = vmatprep.mubr.f32.mxu1 %v11187_v13  ;;  %6632 = vmatprep.mubr.f32.mxu0 %v11187_v13 }
 0xd74   :  { %8185 = vmatmul.mubr.msk.f32.gmra.mrb[162].mxu1 %vm5722_vm8, %v10205_v5  ;;  %8193 = vmatmul.mubr.msk.f32.gmra.mrb[170].mxu0 %vm5722_vm8, %v10205_v5 }
 0xd75   :  { %6525 = vmatprep.mubr.f32.mxu1 %v11187_v13  ;;  %6638 = vmatprep.mubr.f32.mxu0 %v11187_v13 }
 0xd78   :  { %8186 = vmatmul.mubr.msk.f32.gmra.mrb[164].mxu1 %vm5722_vm8, %v10216_v36  ;;  %8194 = vmatmul.mubr.msk.f32.gmra.mrb[172].mxu0 %vm5722_vm8, %v10216_v36 }
 0xd79   :  { %6531 = vmatprep.mubr.f32.mxu1 %v11187_v13  ;;  %6644 = vmatprep.mubr.f32.mxu0 %v11187_v13 }
 0xd7c   :  { %8187 = vmatmul.mubr.msk.f32.gmra.mrb[166].mxu1 %vm5722_vm8, %v10227_v41  ;;  %8195 = vmatmul.mubr.msk.f32.gmra.mrb[174].mxu0 %vm5722_vm8, %v10227_v41 }
 0xd7d   :  { %8268 = vmatprep.mubr.msk.f32.mxu1 %vm5722_vm8, %v10102_v3 }
 0xd80   :  { %8269 = vmatmul.mubr.msk.f32.vlgmr.msra.gmra.mrb[168].mxu1 %vm5722_vm8, %v10123_v25 }
 0xd81   :  { %8271 = vmatprep.mubr.msk.f32.mxu1 %vm5722_vm8, %v10152_v30 }
 0xd84   :  { %8272 = vmatmul.mubr.msk.f32.gmra.mrb[170].mxu1 %vm5722_vm8, %v10175_v60 }
 0xd85   :  { %8274 = vmatprep.mubr.msk.f32.mxu1 %vm5722_vm8, %v10194_v0 }
 0xd88   :  { %8275 = vmatmul.mubr.msk.f32.gmra.mrb[172].mxu1 %vm5722_vm8, %v10205_v5 }
 0xd89   :  { %8277 = vmatprep.mubr.msk.f32.mxu1 %vm5722_vm8, %v10216_v36 }
 0xd8c   :  { %8278 = vmatmul.mubr.msk.f32.gmra.mrb[174].mxu1 %vm5722_vm8, %v10227_v41 }
 0xdd2   :  { %v5813_v13 = vpop.f32.mrb[104].mxu1  ;;  %v5926_v2 = vpop.f32.mrb[112].mxu0 }
 0xdd3   :  { %v5815_v52 = vpop.f32.mrb[105].mxu1  ;;  %v5928_v39 = vpop.f32.mrb[113].mxu0 }
 0xdd7   :  { %v5819_v59 = vpop.f32.mrb[106].mxu1  ;;  %v5932_v16 = vpop.f32.mrb[114].mxu0 }
 0xdd8   :  { %v5821_v62 = vpop.f32.mrb[107].mxu1  ;;  %v5934_v50 = vpop.f32.mrb[115].mxu0 }
 0xddb   :  { %v5825_v54 = vpop.f32.mrb[108].mxu1  ;;  %v5938_v12 = vpop.f32.mrb[116].mxu0 }
 0xddc   :  { %v5827_v3 = vpop.f32.mrb[109].mxu1  ;;  %v5940_v8 = vpop.f32.mrb[117].mxu0  ;;  %v7156_v18 = vadd.f32 %v10448_v19, %v5825_v54 }
 0xddf   :  { %v5831_v10 = vpop.f32.mrb[110].mxu1  ;;  %v5944_v56 = vpop.f32.mrb[118].mxu0 }
 0xde0   :  { %v7195_v6 = vadd.f32 %v10430_v21, %v5831_v10  ;;  %v5833_v25 = vpop.f32.mrb[111].mxu1  ;;  %v5946_v29 = vpop.f32.mrb[119].mxu0 }
 0xde2   :  { %v7212_v44 = vmul.f32 0.5, %v7195_v6 }
 0xde3   :  { %v5837_v4 = vpop.f32.mrb[112].mxu1  ;;  %v5950_v57 = vpop.f32.mrb[120].mxu0 }
 0xde4   :  { %8541 = vtanh.f32 %v7212_v44  ;;  %v10433_v32 = vadd.f32 %v5837_v4, %v5815_v52  ;;  %v10435_v45 = vadd.f32 %v5950_v57, %v5928_v39  ;;  %v5839_v26 = vpop.f32.mrb[113].mxu1  ;;  %v5952_v11 = vpop.f32.mrb[121].mxu0 }
 0xde5   :  { %v10437_v34 = vadd.f32 %v5926_v2, %v5839_v26 }
 0xde6   :  { %v7366_v44 = vadd.f32 %v10448_v19, %v10433_v32 }
 0xde7   :  { %v5843_v35 = vpop.f32.mrb[114].mxu1  ;;  %v5956_v40 = vpop.f32.mrb[122].mxu0 }
 0xde8   :  { %v7087_v30 = vadd.f32 %v5843_v35, %v5821_v62  ;;  %v7089_v37 = vadd.f32 %v5956_v40, %v5934_v50  ;;  %v5845_v48 = vpop.f32.mrb[115].mxu1  ;;  %v5958_v1 = vpop.f32.mrb[123].mxu0  ;;  %v7368_v35 = vadd.f32 %v10448_v19, %v10435_v45 }
 0xde9   :  { %v7088_v38 = vadd.f32 %v5932_v16, %v5845_v48 }
 0xdea   :  { %v7400_v58 = vadd.f32 %v10430_v21, %v7087_v30  ;;  %v7402_v28 = vadd.f32 %v10430_v21, %v7089_v37 }
 0xdeb   :  { %v7401_v53 = vadd.f32 %v10430_v21, %v7088_v38  ;;  %v5849_v51 = vpop.f32.mrb[116].mxu1  ;;  %v5962_v49 = vpop.f32.mrb[124].mxu0  ;;  %v7367_v38 = vadd.f32 %v10448_v19, %v10437_v34 }
 0xdec   :  { %v7417_v17 = vmul.f32 0.5, %v7400_v58  ;;  %v7419_v60 = vmul.f32 0.5, %v7402_v28  ;;  %v10442_v9 = vadd.f32 %v5849_v51, %v5827_v3  ;;  %v10444_v42 = vadd.f32 %v5962_v49, %v5940_v8  ;;  %v5851_v0 = vpop.f32.mrb[117].mxu1  ;;  %v5964_v5 = vpop.f32.mrb[125].mxu0 }
 0xded   :  { %v7418_v36 = vmul.f32 0.5, %v7401_v53  ;;  %v10446_v41 = vadd.f32 %v5938_v12, %v5851_v0 }
 0xdee   :  { %v8542_v46 = vpop.eup %8541  ;;  %8543 = vtanh.f32 %v7417_v17 }
 0xdef   :  { %v7246_v43 = vadd.f32 1.0, %v8542_v46  ;;  %8545 = vtanh.f32 %v7419_v60  ;;  %v5855_v24 = vpop.f32.mrb[118].mxu1  ;;  %v5968_v63 = vpop.f32.mrb[126].mxu0 }
 0xdf0   :  { %8547 = vtanh.f32 %v7418_v36  ;;  %v6967_v20 = vadd.f32 %v5855_v24, %v5833_v25  ;;  %v6969_v27 = vadd.f32 %v5968_v63, %v5946_v29  ;;  %v5857_v22 = vpop.f32.mrb[119].mxu1  ;;  %v5970_v23 = vpop.f32.mrb[127].mxu0  ;;  %v7157_v24 = vadd.f32 %v10448_v19, %v10442_v9 }
 0xdf1   :  { %v7263_v7 = vmul.f32 0.5, %v7246_v43  ;;  %v6968_v14 = vadd.f32 %v5944_v56, %v5857_v22  ;;  %v7159_v63 = vadd.f32 %v10448_v19, %v10444_v42 }
 0xdf2   :  { %v7196_v33 = vadd.f32 %v10430_v21, %v6967_v20  ;;  %v7198_v31 = vadd.f32 %v10430_v21, %v6969_v27 }
 0xdf3   :  { %v10453_v55 = vmul.f32 %v7263_v7, %v7156_v18  ;;  %v7197_v47 = vadd.f32 %v10430_v21, %v6968_v14  ;;  %v6039_v15 = vpop.f32.mrb[120].mxu1  ;;  %v10456_v61 = vpop.f32.mrb[128].mxu0 }
 0xdf4   :  { %v7213_v13 = vmul.f32 0.5, %v7196_v33  ;;  %v7215_v2 = vmul.f32 0.5, %v7198_v31  ;;  %v10458_v52 = vadd.f32 %v6039_v15, %v5952_v11  ;;  %v6041_v39 = vpop.f32.mrb[121].mxu1  ;;  %v6154_v59 = vpop.f32.mrb[129].mxu0  ;;  %v7158_v15 = vadd.f32 %v10448_v19, %v10446_v41 }
 0xdf5   :  { %7297 = vst [vmem:[%s11161_s13] sm:$0xff] %v10453_v55  ;;  %v7214_v16 = vmul.f32 0.5, %v7197_v47 }
 0xdf6   :  { %8549 = vtanh.f32 %v7213_v13 }
 0xdf7   :  { %8551 = vtanh.f32 %v7215_v2  ;;  %v6045_v62 = vpop.f32.mrb[122].mxu1  ;;  %v10464_v50 = vpop.f32.mrb[130].mxu0 }
 0xdf8   :  { %v8544_v54 = vpop.eup %8543  ;;  %8553 = vtanh.f32 %v7214_v16  ;;  %v7090_v12 = vadd.f32 %v6045_v62, %v5958_v1  ;;  %v6047_v3 = vpop.f32.mrb[123].mxu1 }
 0xdf9   :  { %v6160_v8 = vpop.f32.mrb[131].mxu0  ;;  %v8546_v10 = vpop.eup %8545  ;;  %v7451_v56 = vadd.f32 1.0, %v8544_v54 }
 0xdfa   :  { %v8548_v6 = vpop.eup %8547  ;;  %v7453_v25 = vadd.f32 1.0, %v8546_v10  ;;  %v7403_v29 = vadd.f32 %v10430_v21, %v7090_v12 }
 0xdfb   :  { %v7468_v4 = vmul.f32 0.5, %v7451_v56  ;;  %v7452_v57 = vadd.f32 1.0, %v8548_v6  ;;  %v6051_v26 = vpop.f32.mrb[124].mxu1  ;;  %v10469_v11 = vpop.f32.mrb[132].mxu0 }
 0xdfc   :  { %v7470_v40 = vmul.f32 0.5, %v7453_v25  ;;  %v7420_v30 = vmul.f32 0.5, %v7403_v29  ;;  %v10473_v37 = vadd.f32 %v6051_v26, %v5964_v5  ;;  %v6053_v48 = vpop.f32.mrb[125].mxu1  ;;  %v6166_v1 = vpop.f32.mrb[133].mxu0  ;;  %v7369_v29 = vadd.f32 %v10448_v19, %v10458_v52 }
 0xdfd   :  { %v10477_v58 = vmul.f32 %v7468_v4, %v7366_v44  ;;  %v7469_v32 = vmul.f32 0.5, %v7452_v57 }
 0xdfe   :  { %v10479_v28 = vmul.f32 %v7470_v40, %v7368_v35  ;;  %8555 = vtanh.f32 %v7420_v30 }
 0xdff   :  { %v10481_v53 = vmul.f32 %v7469_v32, %v7367_v38  ;;  %v6057_v51 = vpop.f32.mrb[126].mxu1  ;;  %v10483_v49 = vpop.f32.mrb[134].mxu0 }
 0xe00   :  { %v8550_v45 = vpop.eup %8549  ;;  %v6970_v17 = vadd.f32 %v6057_v51, %v5970_v23  ;;  %v6059_v60 = vpop.f32.mrb[127].mxu1 }
 0xe01   :  { %v6172_v0 = vpop.f32.mrb[135].mxu0  ;;  %v8552_v5 = vpop.eup %8551  ;;  %v7247_v36 = vadd.f32 1.0, %v8550_v45 }
 0xe02   :  { %v8554_v46 = vpop.eup %8553  ;;  %v7249_v43 = vadd.f32 1.0, %v8552_v5  ;;  %v7199_v34 = vadd.f32 %v10430_v21, %v6970_v17 }
 0xe03   :  { %v7264_v20 = vmul.f32 0.5, %v7247_v36  ;;  %v7248_v27 = vadd.f32 1.0, %v8554_v46  ;;  %v6063_v22 = vpop.f32.mrb[128].mxu1  ;;  %v6176_v18 = vpop.f32.mrb[136].mxu0 }
 0xe04   :  { %v7266_v7 = vmul.f32 0.5, %v7249_v43  ;;  %v7216_v23 = vmul.f32 0.5, %v7199_v34  ;;  %v10490_v14 = vadd.f32 %v6063_v22, %v6041_v39  ;;  %v10492_v33 = vadd.f32 %v6176_v18, %v6154_v59  ;;  %v6065_v31 = vpop.f32.mrb[129].mxu1  ;;  %v6178_v47 = vpop.f32.mrb[137].mxu0 }
 0xe05   :  { %v10496_v13 = vmul.f32 %v7264_v20, %v7157_v24  ;;  %v7265_v9 = vmul.f32 0.5, %v7248_v27  ;;  %v10499_v42 = vadd.f32 %v10456_v61, %v6065_v31 }
 0xe06   :  { %v10501_v2 = vmul.f32 %v7266_v7, %v7159_v63  ;;  %8557 = vtanh.f32 %v7216_v23 }
 0xe07   :  { %v10503_v16 = vmul.f32 %v7265_v9, %v7158_v15  ;;  %v6069_v39 = vpop.f32.mrb[130].mxu1  ;;  %v6182_v62 = vpop.f32.mrb[138].mxu0 }
 0xe08   :  { %v8556_v59 = vpop.eup %8555  ;;  %v7091_v54 = vadd.f32 %v6069_v39, %v6047_v3  ;;  %v7093_v12 = vadd.f32 %v6182_v62, %v6160_v8  ;;  %v6071_v10 = vpop.f32.mrb[131].mxu1 }
 0xe09   :  { %v6184_v56 = vpop.f32.mrb[139].mxu0  ;;  %v7454_v6 = vadd.f32 1.0, %v8556_v59  ;;  %v7092_v41 = vadd.f32 %v10464_v50, %v6071_v10 }
 0xe0a   :  { %v7404_v25 = vadd.f32 %v10430_v21, %v7091_v54  ;;  %v7406_v61 = vadd.f32 %v10430_v21, %v7093_v12 }
 0xe0b   :  { %v7471_v44 = vmul.f32 0.5, %v7454_v6  ;;  %v7405_v4 = vadd.f32 %v10430_v21, %v7092_v41  ;;  %v6075_v57 = vpop.f32.mrb[132].mxu1  ;;  %v6188_v26 = vpop.f32.mrb[140].mxu0  ;;  %v7370_v41 = vadd.f32 %v10448_v19, %v10490_v14 }
 0xe0c   :  { %v7421_v35 = vmul.f32 0.5, %v7404_v25  ;;  %v7423_v3 = vmul.f32 0.5, %v7406_v61  ;;  %v10511_v8 = vadd.f32 %v6075_v57, %v6053_v48  ;;  %v10513_v40 = vadd.f32 %v6188_v26, %v6166_v1  ;;  %v6077_v30 = vpop.f32.mrb[133].mxu1  ;;  %v6190_v50 = vpop.f32.mrb[141].mxu0 }
 0xe0d   :  { %v10515_v38 = vmul.f32 %v7471_v44, %v7369_v29  ;;  %v7422_v32 = vmul.f32 0.5, %v7405_v4  ;;  %v10518_v51 = vadd.f32 %v10469_v11, %v6077_v30  ;;  %v7160_v11 = vadd.f32 %v10448_v19, %v10473_v37 }
 0xe0e   :  { %8559 = vtanh.f32 %v7421_v35  ;;  %v7372_v4 = vadd.f32 %v10448_v19, %v10492_v33  ;;  %v7371_v30 = vadd.f32 %v10448_v19, %v10499_v42 }
 0xe0f   :  { %8561 = vtanh.f32 %v7423_v3  ;;  %v6081_v52 = vpop.f32.mrb[134].mxu1  ;;  %v6194_v45 = vpop.f32.mrb[142].mxu0 }
 0xe10   :  { %v8558_v17 = vpop.eup %8557  ;;  %8563 = vtanh.f32 %v7422_v32  ;;  %v6971_v5 = vadd.f32 %v6081_v52, %v6059_v60  ;;  %v6973_v36 = vadd.f32 %v6194_v45, %v6172_v0  ;;  %v6083_v48 = vpop.f32.mrb[135].mxu1 }
 0xe11   :  { %v6196_v46 = vpop.f32.mrb[143].mxu0  ;;  %v7250_v1 = vadd.f32 1.0, %v8558_v17  ;;  %v6972_v43 = vadd.f32 %v10483_v49, %v6083_v48 }
 0xe12   :  { %v7200_v34 = vadd.f32 %v10430_v21, %v6971_v5  ;;  %v7202_v24 = vadd.f32 %v10430_v21, %v6973_v36 }
 0xe13   :  { %v7267_v63 = vmul.f32 0.5, %v7250_v1  ;;  %v7201_v20 = vadd.f32 %v10430_v21, %v6972_v43  ;;  %v6265_v27 = vpop.f32.mrb[136].mxu1  ;;  %v10526_v22 = vpop.f32.mrb[144].mxu0 }
 0xe14   :  { %v7217_v60 = vmul.f32 0.5, %v7200_v34  ;;  %v7219_v0 = vmul.f32 0.5, %v7202_v24  ;;  %v10528_v18 = vadd.f32 %v6265_v27, %v6178_v47  ;;  %v6267_v7 = vpop.f32.mrb[137].mxu1  ;;  %v6380_v23 = vpop.f32.mrb[145].mxu0 }
 0xe15   :  { %v10530_v49 = vmul.f32 %v7267_v63, %v7160_v11  ;;  %v7218_v31 = vmul.f32 0.5, %v7201_v20  ;;  %v7161_v11 = vadd.f32 %v10448_v19, %v10511_v8  ;;  %v7163_v63 = vadd.f32 %v10448_v19, %v10513_v40 }
 0xe16   :  { %8565 = vtanh.f32 %v7217_v60 }
 0xe17   :  { %8567 = vtanh.f32 %v7219_v0  ;;  %v6271_v15 = vpop.f32.mrb[138].mxu1  ;;  %v10532_v9 = vpop.f32.mrb[146].mxu0 }
 0xe18   :  { %v8560_v37 = vpop.eup %8559  ;;  %8569 = vtanh.f32 %v7218_v31  ;;  %v7094_v39 = vadd.f32 %v6271_v15, %v6184_v56  ;;  %v6273_v62 = vpop.f32.mrb[139].mxu1 }
 0xe19   :  { %v6386_v59 = vpop.f32.mrb[147].mxu0  ;;  %v8562_v54 = vpop.eup %8561  ;;  %v7455_v12 = vadd.f32 1.0, %v8560_v37 }
 0xe1a   :  { %v8564_v10 = vpop.eup %8563  ;;  %v7457_v47 = vadd.f32 1.0, %v8562_v54  ;;  %v7407_v6 = vadd.f32 %v10430_v21, %v7094_v39 }
 0xe1b   :  { %v7472_v25 = vmul.f32 0.5, %v7455_v12  ;;  %v7456_v61 = vadd.f32 1.0, %v8564_v10  ;;  %v6277_v29 = vpop.f32.mrb[140].mxu1  ;;  %v10537_v44 = vpop.f32.mrb[148].mxu0  ;;  %v7162_v12 = vadd.f32 %v10448_v19, %v10518_v51 }
 0xe1c   :  { %v7474_v56 = vmul.f32 0.5, %v7457_v47  ;;  %v7424_v57 = vmul.f32 0.5, %v7407_v6  ;;  %v10541_v26 = vadd.f32 %v6277_v29, %v6190_v50  ;;  %v6279_v35 = vpop.f32.mrb[141].mxu1  ;;  %v6392_v3 = vpop.f32.mrb[149].mxu0 }
 0xe1d   :  { %v10545_v32 = vmul.f32 %v7472_v25, %v7370_v41  ;;  %v7473_v14 = vmul.f32 0.5, %v7456_v61 }
 0xe1e   :  { %v10547_v52 = vmul.f32 %v7474_v56, %v7372_v4  ;;  %8571 = vtanh.f32 %v7424_v57 }
 0xe1f   :  { %v10549_v45 = vmul.f32 %v7473_v14, %v7371_v30  ;;  %v6283_v17 = vpop.f32.mrb[142].mxu1  ;;  %v10551_v5 = vpop.f32.mrb[150].mxu0  ;;  %v7373_v30 = vadd.f32 %v10448_v19, %v10528_v18 }
 0xe20   :  { %v8566_v33 = vpop.eup %8565  ;;  %v6974_v36 = vadd.f32 %v6283_v17, %v6196_v46  ;;  %v6285_v50 = vpop.f32.mrb[143].mxu1 }
 0xe21   :  { %v6398_v48 = vpop.f32.mrb[151].mxu0  ;;  %v8568_v1 = vpop.eup %8567  ;;  %v7251_v43 = vadd.f32 1.0, %v8566_v33 }
 0xe22   :  { %v8570_v34 = vpop.eup %8569  ;;  %v7253_v24 = vadd.f32 1.0, %v8568_v1  ;;  %v7203_v42 = vadd.f32 %v10430_v21, %v6974_v36 }
 0xe23   :  { %v7268_v20 = vmul.f32 0.5, %v7251_v43  ;;  %v7252_v27 = vadd.f32 1.0, %v8570_v34  ;;  %v6289_v60 = vpop.f32.mrb[144].mxu1  ;;  %v6402_v0 = vpop.f32.mrb[152].mxu0 }
 0xe24   :  { %v7270_v31 = vmul.f32 0.5, %v7253_v24  ;;  %v7220_v46 = vmul.f32 0.5, %v7203_v42  ;;  %v10558_v15 = vadd.f32 %v6289_v60, %v6267_v7  ;;  %v10560_v37 = vadd.f32 %v6402_v0, %v6380_v23  ;;  %v6291_v39 = vpop.f32.mrb[145].mxu1  ;;  %v6404_v54 = vpop.f32.mrb[153].mxu0 }
 0xe25   :  { %v10564_v10 = vmul.f32 %v7268_v20, %v7161_v11  ;;  %v7269_v8 = vmul.f32 0.5, %v7252_v27  ;;  %v10567_v40 = vadd.f32 %v10526_v22, %v6291_v39 }
 0xe26   :  { %v10569_v47 = vmul.f32 %v7270_v31, %v7163_v63  ;;  %8573 = vtanh.f32 %v7220_v46 }
 0xe27   :  { %v10571_v6 = vmul.f32 %v7269_v8, %v7162_v12  ;;  %v6295_v7 = vpop.f32.mrb[146].mxu1  ;;  %v6408_v41 = vpop.f32.mrb[154].mxu0 }
 0xe28   :  { %v8572_v23 = vpop.eup %8571  ;;  %v7095_v25 = vadd.f32 %v6295_v7, %v6273_v62  ;;  %v7097_v61 = vadd.f32 %v6408_v41, %v6386_v59  ;;  %v6297_v29 = vpop.f32.mrb[147].mxu1 }
 0xe29   :  { %v6410_v4 = vpop.f32.mrb[155].mxu0  ;;  %v7458_v56 = vadd.f32 1.0, %v8572_v23  ;;  %v7096_v51 = vadd.f32 %v10532_v9, %v6297_v29 }
 0xe2a   :  { %v7408_v57 = vadd.f32 %v10430_v21, %v7095_v25  ;;  %v7410_v22 = vadd.f32 %v10430_v21, %v7097_v61 }
 0xe2b   :  { %v7475_v14 = vmul.f32 0.5, %v7458_v56  ;;  %v7409_v17 = vadd.f32 %v10430_v21, %v7096_v51  ;;  %v6301_v33 = vpop.f32.mrb[148].mxu1  ;;  %v6414_v36 = vpop.f32.mrb[156].mxu0 }
 0xe2c   :  { %v7425_v1 = vmul.f32 0.5, %v7408_v57  ;;  %v7427_v62 = vmul.f32 0.5, %v7410_v22  ;;  %v10579_v59 = vadd.f32 %v6301_v33, %v6279_v35  ;;  %v10581_v43 = vadd.f32 %v6414_v36, %v6392_v3  ;;  %v6303_v34 = vpop.f32.mrb[149].mxu1  ;;  %v6416_v9 = vpop.f32.mrb[157].mxu0 }
 0xe2d   :  { %v10583_v24 = vmul.f32 %v7475_v14, %v7373_v30  ;;  %v7426_v42 = vmul.f32 0.5, %v7409_v17  ;;  %v10586_v11 = vadd.f32 %v10537_v44, %v6303_v34  ;;  %v7164_v44 = vadd.f32 %v10448_v19, %v10541_v26 }
 0xe2e   :  { %8575 = vtanh.f32 %v7425_v1  ;;  %v7536_v33 = vadd.f32 %v10481_v53, %v10477_v58 }
 0xe2f   :  { %8577 = vtanh.f32 %v7427_v62  ;;  %v6307_v18 = vpop.f32.mrb[150].mxu1  ;;  %v6420_v63 = vpop.f32.mrb[158].mxu0  ;;  %v7374_v62 = vadd.f32 %v10448_v19, %v10558_v15 }
 0xe30   :  { %v8574_v20 = vpop.eup %8573  ;;  %8579 = vtanh.f32 %v7426_v42  ;;  %v6975_v27 = vadd.f32 %v6307_v18, %v6285_v50  ;;  %v6977_v60 = vadd.f32 %v6420_v63, %v6398_v48  ;;  %v6309_v35 = vpop.f32.mrb[151].mxu1  ;;  %v7376_v63 = vadd.f32 %v10448_v19, %v10560_v37 }
 0xe31   :  { %v6422_v0 = vpop.f32.mrb[159].mxu0  ;;  %v7254_v3 = vadd.f32 1.0, %v8574_v20  ;;  %v6976_v31 = vadd.f32 %v10551_v5, %v6309_v35 }
 0xe32   :  { %v7204_v46 = vadd.f32 %v10430_v21, %v6975_v27  ;;  %v7206_v39 = vadd.f32 %v10430_v21, %v6977_v60 }
 0xe33   :  { %v7271_v12 = vmul.f32 0.5, %v7254_v3  ;;  %v7205_v8 = vadd.f32 %v10430_v21, %v6976_v31  ;;  %v6491_v7 = vpop.f32.mrb[152].mxu1  ;;  %v10594_v41 = vpop.f32.mrb[160].mxu0  ;;  %v7375_v31 = vadd.f32 %v10448_v19, %v10567_v40 }
 0xe34   :  { %v7221_v50 = vmul.f32 0.5, %v7204_v46  ;;  %v7223_v48 = vmul.f32 0.5, %v7206_v39  ;;  %v10596_v23 = vadd.f32 %v6491_v7, %v6404_v54  ;;  %v6493_v25 = vpop.f32.mrb[153].mxu1  ;;  %v6606_v61 = vpop.f32.mrb[161].mxu0  ;;  %v7331_v39 = vadd.f32 %v10496_v13, %v10453_v55 }
 0xe35   :  { %v10598_v5 = vmul.f32 %v7271_v12, %v7164_v44  ;;  %v7222_v29 = vmul.f32 0.5, %v7205_v8  ;;  %v7537_v44 = vadd.f32 %v7536_v33, %v10479_v28  ;;  %v7165_v33 = vadd.f32 %v10448_v19, %v10579_v59 }
 0xe36   :  { %8581 = vtanh.f32 %v7221_v50 }
 0xe37   :  { %8583 = vtanh.f32 %v7223_v48  ;;  %v6497_v56 = vpop.f32.mrb[154].mxu1  ;;  %v10600_v51 = vpop.f32.mrb[162].mxu0  ;;  %v7538_v50 = vadd.f32 %v7537_v44, %v10515_v38 }
 0xe38   :  { %v8576_v26 = vpop.eup %8575  ;;  %8585 = vtanh.f32 %v7222_v29  ;;  %v7098_v57 = vadd.f32 %v6497_v56, %v6410_v4  ;;  %v10602_v22 = vpop.f32.mrb[155].mxu1 }
 0xe39   :  { %v10604_v30 = vpop.f32.mrb[163].mxu0  ;;  %v8578_v14 = vpop.eup %8577  ;;  %v7459_v54 = vadd.f32 1.0, %v8576_v26 }
 0xe3a   :  { %v8580_v17 = vpop.eup %8579  ;;  %v7461_v36 = vadd.f32 1.0, %v8578_v14  ;;  %v7411_v1 = vadd.f32 %v10430_v21, %v7098_v57  ;;  %v7332_v57 = vadd.f32 %v7331_v39, %v10503_v16  ;;  %v7539_v14 = vadd.f32 %v7538_v50, %v10545_v32 }
 0xe3b   :  { %v7476_v34 = vmul.f32 0.5, %v7459_v54  ;;  %v7460_v42 = vadd.f32 1.0, %v8580_v17  ;;  %v6503_v18 = vpop.f32.mrb[156].mxu1  ;;  %v10611_v4 = vpop.f32.mrb[164].mxu0 }
 0xe3c   :  { %v7478_v20 = vmul.f32 0.5, %v7461_v36  ;;  %v7428_v27 = vmul.f32 0.5, %v7411_v1  ;;  %v10615_v60 = vadd.f32 %v6503_v18, %v6416_v9  ;;  %v10617_v35 = vpop.f32.mrb[157].mxu1  ;;  %v10619_v3 = vpop.f32.mrb[165].mxu0  ;;  %v7540_v44 = vadd.f32 %v7539_v14, %v10549_v45 }
 0xe3d   :  { %v10623_v15 = vmul.f32 %v7476_v34, %v7374_v62  ;;  %v7477_v46 = vmul.f32 0.5, %v7460_v42 }
 0xe3e   :  { %v10628_v37 = vmul.f32 %v7478_v20, %v7376_v63  ;;  %8587 = vtanh.f32 %v7428_v27 }
 0xe3f   :  { %v10630_v9 = vmul.f32 %v7477_v46, %v7375_v31  ;;  %v6509_v12 = vpop.f32.mrb[158].mxu1  ;;  %v10632_v8 = vpop.f32.mrb[166].mxu0  ;;  %v7166_v46 = vadd.f32 %v10448_v19, %v10586_v11 }
 0xe40   :  { %v8582_v7 = vpop.eup %8581  ;;  %v6978_v40 = vadd.f32 %v6509_v12, %v6422_v0  ;;  %v10635_v48 = vpop.f32.mrb[159].mxu1  ;;  %v7167_v0 = vadd.f32 %v10448_v19, %v10581_v43 }
 0xe41   :  { %v10637_v29 = vpop.f32.mrb[167].mxu0  ;;  %v8584_v56 = vpop.eup %8583  ;;  %v7255_v55 = vadd.f32 1.0, %v8582_v7 }
 0xe42   :  { %v8586_v26 = vpop.eup %8585  ;;  %v7257_v54 = vadd.f32 1.0, %v8584_v56  ;;  %v7207_v17 = vadd.f32 %v10430_v21, %v6978_v40  ;;  %v7333_v40 = vadd.f32 %v7332_v57, %v10501_v2 }
 0xe43   :  { %v7272_v36 = vmul.f32 0.5, %v7255_v55  ;;  %v7256_v1 = vadd.f32 1.0, %v8586_v26  ;;  %v6515_v62 = vpop.f32.mrb[160].mxu1  ;;  %v6628_v34 = vpop.f32.mrb[168].mxu0 }
 0xe44   :  { %v7274_v42 = vmul.f32 0.5, %v7257_v54  ;;  %v7224_v18 = vmul.f32 0.5, %v7207_v17  ;;  %v10646_v63 = vadd.f32 %v6515_v62, %v6493_v25  ;;  %v10648_v20 = vadd.f32 %v6628_v34, %v6606_v61  ;;  %v6517_v27 = vpop.f32.mrb[161].mxu1  ;;  %v10650_v31 = vpop.f32.mrb[169].mxu0 }
 0xe45   :  { %v10654_v59 = vmul.f32 %v7272_v36, %v7165_v33  ;;  %v7273_v39 = vmul.f32 0.5, %v7256_v1  ;;  %v10657_v43 = vadd.f32 %v10594_v41, %v6517_v27  ;;  %v7334_v17 = vadd.f32 %v7333_v40, %v10530_v49 }
 0xe46   :  { %v10660_v12 = vmul.f32 %v7274_v42, %v7167_v0  ;;  %8589 = vtanh.f32 %v7224_v18  ;;  %v7541_v33 = vadd.f32 %v7540_v44, %v10547_v52 }
 0xe47   :  { %v10662_v25 = vmul.f32 %v7273_v39, %v7166_v46  ;;  %v6521_v61 = vpop.f32.mrb[162].mxu1  ;;  %v6634_v7 = vpop.f32.mrb[170].mxu0 }
 0xe48   :  { %v8588_v50 = vpop.eup %8587  ;;  %v7099_v11 = vadd.f32 %v6521_v61, %v10602_v22  ;;  %v7101_v56 = vadd.f32 %v6634_v7, %v10604_v30  ;;  %v6523_v55 = vpop.f32.mrb[163].mxu1  ;;  %v7377_v22 = vadd.f32 %v10448_v19, %v10596_v23  ;;  %v7335_v7 = vadd.f32 %v7334_v17, %v10564_v10 }
 0xe49   :  { %v6636_v26 = vpop.f32.mrb[171].mxu0  ;;  %v7462_v41 = vadd.f32 1.0, %v8588_v50  ;;  %v7100_v54 = vadd.f32 %v10600_v51, %v6523_v55  ;;  %v7542_v50 = vadd.f32 %v7541_v33, %v10583_v24 }
 0xe4a   :  { %v7415_v14 = vadd.f32 %v10430_v21, %v6636_v26  ;;  %v7412_v0 = vadd.f32 %v10430_v21, %v7099_v11  ;;  %v7414_v36 = vadd.f32 %v10430_v21, %v7101_v56 }
 0xe4b   :  { %v7479_v57 = vmul.f32 0.5, %v7462_v41  ;;  %v7413_v30 = vadd.f32 %v10430_v21, %v7100_v54  ;;  %v6527_v62 = vpop.f32.mrb[164].mxu1  ;;  %v6640_v34 = vpop.f32.mrb[172].mxu0  ;;  %v7543_v41 = vadd.f32 %v7542_v50, %v10623_v15 }
 0xe4c   :  { %v7432_v1 = vmul.f32 0.5, %v7415_v14  ;;  %v7429_v51 = vmul.f32 0.5, %v7412_v0  ;;  %v7431_v42 = vmul.f32 0.5, %v7414_v36  ;;  %v10677_v18 = vadd.f32 %v6527_v62, %v10617_v35  ;;  %v6529_v46 = vpop.f32.mrb[165].mxu1  ;;  %v6642_v39 = vpop.f32.mrb[173].mxu0 }
 0xe4d   :  { %v10680_v27 = vadd.f32 %v6640_v34, %v10619_v3  ;;  %v10682_v44 = vmul.f32 %v7479_v57, %v7377_v22  ;;  %v7430_v61 = vmul.f32 0.5, %v7413_v30  ;;  %v10685_v23 = vadd.f32 %v10611_v4, %v6529_v46 }
 0xe4e   :  { %8591 = vtanh.f32 %v7432_v1  ;;  %v7336_v14 = vadd.f32 %v7335_v7, %v10571_v6  ;;  %v7168_v0 = vadd.f32 %v10448_v19, %v10615_v60  ;;  %v7544_v1 = vadd.f32 %v7543_v41, %v10630_v9 }
 0xe4f   :  { %8593 = vtanh.f32 %v7429_v51  ;;  %v6533_v35 = vpop.f32.mrb[166].mxu1  ;;  %v6646_v40 = vpop.f32.mrb[174].mxu0 }
 0xe50   :  { %8595 = vtanh.f32 %v7431_v42  ;;  %v8590_v11 = vpop.eup %8589  ;;  %v6979_v3 = vadd.f32 %v6533_v35, %v10635_v48  ;;  %v6981_v56 = vadd.f32 %v6646_v40, %v10637_v29  ;;  %v6535_v55 = vpop.f32.mrb[167].mxu1  ;;  %v7337_v34 = vadd.f32 %v7336_v14, %v10569_v47 }
 0xe51   :  { %8597 = vtanh.f32 %v7430_v61  ;;  %v6648_v26 = vpop.f32.mrb[175].mxu0  ;;  %v7258_v4 = vadd.f32 1.0, %v8590_v11  ;;  %v6980_v54 = vadd.f32 %v10632_v8, %v6535_v55  ;;  %v7381_v35 = vadd.f32 %v10448_v19, %v10650_v31 }
 0xe52   :  { %v7208_v17 = vadd.f32 %v10430_v21, %v6979_v3  ;;  %v7210_v33 = vadd.f32 %v10430_v21, %v6981_v56  ;;  %v7338_v60 = vadd.f32 %v7337_v34, %v10598_v5  ;;  %v7545_v11 = vadd.f32 %v7544_v1, %v10628_v37 }
 0xe53   :  { %v7275_v36 = vmul.f32 0.5, %v7258_v4  ;;  %v7209_v48 = vadd.f32 %v10430_v21, %v6980_v54  ;;  %v8270_v29 = vpop.f32.mrb[168].mxu1  ;;  %v7378_v4 = vadd.f32 %v10448_v19, %v10646_v63  ;;  %v7380_v54 = vadd.f32 %v10448_v19, %v10648_v20 }
 0xe54   :  { %v7225_v22 = vmul.f32 0.5, %v7208_v17  ;;  %v7227_v57 = vmul.f32 0.5, %v7210_v33  ;;  %v6717_v30 = vpop.f32.mrb[169].mxu1  ;;  %v7339_v56 = vadd.f32 %v7338_v60, %v10654_v59  ;;  %v7379_v29 = vadd.f32 %v10448_v19, %v10657_v43 }
 0xe55   :  { %v10700_v62 = vmul.f32 %v7275_v36, %v7168_v0  ;;  %v7226_v8 = vmul.f32 0.5, %v7209_v48  ;;  %v7546_v63 = vadd.f32 %v7545_v11, %v10682_v44 }
 0xe56   :  { %8599 = vtanh.f32 %v7225_v22  ;;  %v7340_v20 = vadd.f32 %v7339_v56, %v10662_v25  ;;  %v7171_v56 = vadd.f32 %v10448_v19, %v10680_v27 }
 0xe57   :  { %8601 = vtanh.f32 %v7227_v57  ;;  %v8273_v42 = vpop.f32.mrb[170].mxu1 }
 0xe58   :  { %v8592_v51 = vpop.eup %8591  ;;  %8603 = vtanh.f32 %v7226_v8  ;;  %v7211_v61 = vadd.f32 %v8273_v42, %v10430_v21  ;;  %v6727_v7 = vpop.f32.mrb[171].mxu1 }
 0xe59   :  { %v8594_v46 = vpop.eup %8593  ;;  %v7466_v39 = vadd.f32 1.0, %v8592_v51 }
 0xe5a   :  { %v8596_v50 = vpop.eup %8595  ;;  %v7463_v40 = vadd.f32 1.0, %v8594_v46  ;;  %v7228_v41 = vmul.f32 0.5, %v7211_v61 }
 0xe5b   :  { %v8598_v3 = vpop.eup %8597  ;;  %v7465_v55 = vadd.f32 1.0, %v8596_v50  ;;  %v7483_v26 = vmul.f32 0.5, %v7466_v39  ;;  %v8276_v33 = vpop.f32.mrb[172].mxu1  ;;  %v7341_v50 = vadd.f32 %v7340_v20, %v10660_v12 }
 0xe5c   :  { %v7480_v14 = vmul.f32 0.5, %v7463_v40  ;;  %v7464_v17 = vadd.f32 1.0, %v8598_v3  ;;  %8605 = vtanh.f32 %v7228_v41  ;;  %v7416_v31 = vadd.f32 %v8276_v33, %v10430_v21  ;;  %v6737_v36 = vpop.f32.mrb[173].mxu1 }
 0xe5d   :  { %v7482_v0 = vmul.f32 0.5, %v7465_v55  ;;  %v10714_v48 = vmul.f32 %v7483_v26, %v7381_v35  ;;  %v7169_v35 = vadd.f32 %v10448_v19, %v10677_v18  ;;  %v7170_v55 = vadd.f32 %v10448_v19, %v10685_v23 }
 0xe5e   :  { %v10718_v22 = vmul.f32 %v7480_v14, %v7378_v4  ;;  %v7481_v57 = vmul.f32 0.5, %v7464_v17  ;;  %v7433_v30 = vmul.f32 0.5, %v7416_v31  ;;  %v7342_v14 = vadd.f32 %v7341_v50, %v10700_v62 }
 0xe5f   :  { %v10722_v1 = vmul.f32 %v7482_v0, %v7380_v54  ;;  %v8279_v34 = vpop.f32.mrb[174].mxu1  ;;  %v7172_v31 = vadd.f32 %v10448_v19, %v6727_v7 }
 0xe60   :  { %v10724_v8 = vmul.f32 %v7481_v57, %v7379_v29  ;;  %v7547_v21 = vadd.f32 %v7546_v63, %v10718_v22  ;;  %v8600_v51 = vpop.eup %8599  ;;  %8607 = vtanh.f32 %v7433_v30  ;;  %v6747_v42 = vpop.f32.mrb[175].mxu1 }
 0xe61   :  { %v8602_v46 = vpop.eup %8601  ;;  %v7259_v43 = vadd.f32 1.0, %v8600_v51 }
 0xe62   :  { %v7548_v60 = vadd.f32 %v7547_v21, %v10724_v8  ;;  %v8604_v39 = vpop.eup %8603  ;;  %v7261_v61 = vadd.f32 1.0, %v8602_v46  ;;  %v7382_v21 = vadd.f32 %v10448_v19, %v6737_v36 }
 0xe63   :  { %v7276_v40 = vmul.f32 0.5, %v7259_v43  ;;  %v7260_v11 = vadd.f32 1.0, %v8604_v39 }
 0xe64   :  { %v7549_v3 = vadd.f32 %v7548_v60, %v10722_v1  ;;  %v7278_v26 = vmul.f32 0.5, %v7261_v61 }
 0xe65   :  { %v7277_v41 = vmul.f32 0.5, %v7260_v11  ;;  %v10737_v54 = vmul.f32 %v7276_v40, %v7169_v35 }
 0xe66   :  { %v7550_v4 = vadd.f32 %v7549_v3, %v10714_v48  ;;  %v8606_v17 = vpop.eup %8605  ;;  %v10740_v18 = vmul.f32 %v7278_v26, %v7171_v56  ;;  %v10768_v3 = vld [vmem:[%s11161_s13] sm:$0xff] }
 0xe67   :  { %v7262_v33 = vadd.f32 1.0, %v8606_v17  ;;  %v10742_v0 = vmul.f32 %v7277_v41, %v7170_v55  ;;  %v7343_v27 = vadd.f32 %v7342_v14, %v10737_v54 }
 0xe68   :  { %7552 = vadd.xlane.f32.xlu0 %v7550_v4 }
 0xe69   :  { %v7279_v23 = vmul.f32 0.5, %v7262_v33  ;;  %v7344_v29 = vadd.f32 %v7343_v27, %v10742_v0 }
 0xe6a   :  { %v8608_v57 = vpop.eup %8607 }
 0xe6b   :  { %v10747_v63 = vmul.f32 %v7279_v23, %v7172_v31  ;;  %v7467_v20 = vadd.f32 1.0, %v8608_v57  ;;  %v7345_v30 = vadd.f32 %v7344_v29, %v10740_v18 }
 0xe6d   :  { %v7484_v34 = vmul.f32 0.5, %v7467_v20  ;;  %7347 = vadd.xlane.f32.xlu1 %v7345_v30 }
 0xe6f   :  { %v10751_v51 = vmul.f32 %v7484_v34, %v7382_v21 }
 0xef5   :  { %v7553_v42 = vpop.xlane.xlu0 %7552 }
 0xefa   :  { %v7348_v46 = vpop.xlane.xlu1 %7347 }
 0xefb   :  { %v7554_v43 = vadd.f32 %v7553_v42, %v7348_v46 }
 0xefd   :  { %v10753_v60 = vmul.f32 0.00024414063, %v7554_v43 }
 0xeff   :  { %v7659_v7 = vsub.f32 %v10477_v58, %v10753_v60  ;;  %v7660_v39 = vsub.f32 %v10481_v53, %v10753_v60  ;;  %v7661_v61 = vsub.f32 %v10479_v28, %v10753_v60  ;;  %v7662_v36 = vsub.f32 %v10515_v38, %v10753_v60 }
 0xf00   :  { %v7663_v35 = vsub.f32 %v10545_v32, %v10753_v60  ;;  %v7573_v56 = vsub.f32 %v10768_v3, %v10753_v60  ;;  %v7574_v55 = vsub.f32 %v10496_v13, %v10753_v60  ;;  %v7664_v26 = vsub.f32 %v10549_v45, %v10753_v60 }
 0xf01   :  { %v7693_v50 = vmul.f32 %v7659_v7, %v7659_v7  ;;  %v7694_v19 = vmul.f32 %v7660_v39, %v7660_v39  ;;  %v7695_v40 = vmul.f32 %v7661_v61, %v7661_v61  ;;  %v7696_v41 = vmul.f32 %v7662_v36, %v7662_v36 }
 0xf02   :  { %v7665_v14 = vsub.f32 %v10547_v52, %v10753_v60  ;;  %v7697_v17 = vmul.f32 %v7663_v35, %v7663_v35  ;;  %v7575_v27 = vsub.f32 %v10503_v16, %v10753_v60  ;;  %v7607_v31 = vmul.f32 %v7573_v56, %v7573_v56 }
 0xf03   :  { %v7710_v11 = vadd.f32 %v7694_v19, %v7693_v50  ;;  %v7608_v23 = vmul.f32 %v7574_v55, %v7574_v55  ;;  %v7666_v29 = vsub.f32 %v10583_v24, %v10753_v60  ;;  %v7698_v57 = vmul.f32 %v7664_v26, %v7664_v26 }
 0xf04   :  { %v7576_v30 = vsub.f32 %v10501_v2, %v10753_v60  ;;  %v7667_v21 = vsub.f32 %v10623_v15, %v10753_v60  ;;  %v7699_v34 = vmul.f32 %v7665_v14, %v7665_v14  ;;  %v7577_v46 = vsub.f32 %v10530_v49, %v10753_v60 }
 0xf05   :  { %v7711_v4 = vadd.f32 %v7710_v11, %v7695_v40  ;;  %v7609_v43 = vmul.f32 %v7575_v27, %v7575_v27  ;;  %v7624_v7 = vadd.f32 %v7608_v23, %v7607_v31  ;;  %v7668_v39 = vsub.f32 %v10630_v9, %v10753_v60 }
 0xf06   :  { %v7700_v61 = vmul.f32 %v7666_v29, %v7666_v29  ;;  %v7578_v19 = vsub.f32 %v10564_v10, %v10753_v60  ;;  %v7610_v36 = vmul.f32 %v7576_v30, %v7576_v30  ;;  %v7669_v40 = vsub.f32 %v10628_v37, %v10753_v60 }
 0xf07   :  { %v7712_v33 = vadd.f32 %v7711_v4, %v7696_v41  ;;  %v7625_v35 = vadd.f32 %v7624_v7, %v7609_v43  ;;  %v7701_v11 = vmul.f32 %v7667_v21, %v7667_v21  ;;  %v7579_v55 = vsub.f32 %v10571_v6, %v10753_v60 }
 0xf08   :  { %v7611_v26 = vmul.f32 %v7577_v46, %v7577_v46  ;;  %v7670_v4 = vsub.f32 %v10682_v44, %v10753_v60  ;;  %v7702_v14 = vmul.f32 %v7668_v39, %v7668_v39  ;;  %v7612_v27 = vmul.f32 %v7578_v19, %v7578_v19 }
 0xf09   :  { %v7713_v20 = vadd.f32 %v7712_v33, %v7697_v17  ;;  %v7626_v41 = vadd.f32 %v7625_v35, %v7610_v36  ;;  %v7580_v33 = vsub.f32 %v10569_v47, %v10753_v60  ;;  %v7671_v23 = vsub.f32 %v10718_v22, %v10753_v60 }
 0xf0a   :  { %v7703_v29 = vmul.f32 %v7669_v40, %v7669_v40  ;;  %v7613_v30 = vmul.f32 %v7579_v55, %v7579_v55  ;;  %v7582_v43 = vsub.f32 %v10654_v59, %v10753_v60  ;;  %v7583_v36 = vsub.f32 %v10662_v25, %v10753_v60 }
 0xf0b   :  { %v7714_v42 = vadd.f32 %v7713_v20, %v7698_v57  ;;  %v7627_v31 = vadd.f32 %v7626_v41, %v7611_v26  ;;  %v7581_v20 = vsub.f32 %v10598_v5, %v10753_v60  ;;  %v7614_v7 = vmul.f32 %v7580_v33, %v7580_v33 }
 0xf0c   :  { %v7584_v26 = vsub.f32 %v10660_v12, %v10753_v60  ;;  %v7616_v41 = vmul.f32 %v7582_v43, %v7582_v43  ;;  %v7585_v33 = vsub.f32 %v10700_v62, %v10753_v60  ;;  %v7588_v43 = vsub.f32 %v10740_v18, %v10753_v60 }
 0xf0d   :  { %v7715_v50 = vadd.f32 %v7714_v42, %v7699_v34  ;;  %v7628_v21 = vadd.f32 %v7627_v31, %v7612_v27  ;;  %v7672_v34 = vsub.f32 %v10724_v8, %v10753_v60  ;;  %v7704_v42 = vmul.f32 %v7670_v4, %v7670_v4 }
 0xf0e   :  { %v7615_v35 = vmul.f32 %v7581_v20, %v7581_v20  ;;  %v7617_v27 = vmul.f32 %v7583_v36, %v7583_v36  ;;  %v7618_v20 = vmul.f32 %v7584_v26, %v7584_v26 }
 0xf0f   :  { %v7716_v56 = vadd.f32 %v7715_v50, %v7700_v61  ;;  %v7629_v39 = vadd.f32 %v7628_v21, %v7613_v30  ;;  %v7673_v61 = vsub.f32 %v10722_v1, %v10753_v60  ;;  %v7705_v50 = vmul.f32 %v7671_v23, %v7671_v23 }
 0xf11   :  { %v7717_v17 = vadd.f32 %v7716_v56, %v7701_v11  ;;  %v7630_v40 = vadd.f32 %v7629_v39, %v7614_v7  ;;  %v7674_v11 = vsub.f32 %v10714_v48, %v10753_v60  ;;  %v7706_v56 = vmul.f32 %v7672_v34, %v7672_v34 }
 0xf12   :  { %v7587_v34 = vsub.f32 %v10742_v0, %v10753_v60 }
 0xf13   :  { %v7718_v57 = vadd.f32 %v7717_v17, %v7702_v14  ;;  %v7631_v4 = vadd.f32 %v7630_v40, %v7615_v35  ;;  %v7707_v14 = vmul.f32 %v7673_v61, %v7673_v61  ;;  %v7708_v23 = vmul.f32 %v7674_v11, %v7674_v11 }
 0xf14   :  { %v7621_v61 = vmul.f32 %v7587_v34, %v7587_v34 }
 0xf15   :  { %v7719_v46 = vadd.f32 %v7718_v57, %v7703_v29  ;;  %v7632_v31 = vadd.f32 %v7631_v4, %v7616_v41  ;;  %v7586_v57 = vsub.f32 %v10737_v54, %v10753_v60  ;;  %v7730_v41 = vld [vmem:[%s11158_s10] sm:$0xff] }
 0xf17   :  { %v7720_v19 = vadd.f32 %v7719_v46, %v7704_v42  ;;  %v7633_v30 = vadd.f32 %v7632_v31, %v7617_v27  ;;  %v7619_v42 = vmul.f32 %v7585_v33, %v7585_v33  ;;  %v7620_v7 = vmul.f32 %v7586_v57, %v7586_v57 }
 0xf19   :  { %v7721_v55 = vadd.f32 %v7720_v19, %v7705_v50  ;;  %v7634_v46 = vadd.f32 %v7633_v30, %v7618_v20  ;;  %v7622_v19 = vmul.f32 %v7588_v43, %v7588_v43 }
 0xf1b   :  { %v7722_v17 = vadd.f32 %v7721_v55, %v7706_v56  ;;  %v7635_v39 = vadd.f32 %v7634_v46, %v7619_v42 }
 0xf1d   :  { %v7723_v29 = vadd.f32 %v7722_v17, %v7707_v14  ;;  %v7636_v50 = vadd.f32 %v7635_v39, %v7620_v7  ;;  %v7734_v17 = vld [vmem:[%s11159_s11] sm:$0xff] }
 0xf1f   :  { %v7724_v21 = vadd.f32 %v7723_v29, %v7708_v23  ;;  %v7637_v36 = vadd.f32 %v7636_v50, %v7621_v61  ;;  %v10831_v23 = vstv %s8204_s6 }
 0xf21   :  { %7726 = vadd.xlane.f32.xlu1 %v7724_v21  ;;  %v7638_v35 = vadd.f32 %v7637_v36, %v7622_v19 }
 0xf23   :  { %7640 = vadd.xlane.f32.xlu0 %v7638_v35 }
 0xfae   :  { %v7727_v40 = vpop.xlane.xlu1 %7726 }
 0xfb0   :  { %v7641_v11 = vpop.xlane.xlu0 %7640 }
 0xfb1   :  { %v7728_v56 = vadd.f32 %v7727_v40, %v7641_v11 }
 0xfb3   :  { %v7729_v55 = vmul.f32 0.00024414063, %v7728_v56 }
 0xfb5   :  { %v7731_v26 = vadd.f32 1e-05, %v7729_v55 }
 0xfb7   :  { %8609 = vrsqrt.f32 %v7731_v26 }
 0xfc1   :  { %v8610_v4 = vpop.eup %8609 }
 0xfc2   :  { %v7733_v14 = vmul.f32 %v8610_v4, %v7730_v41 }
 0xfc4   :  { %7740 = vperm.xlu0 %8532, %v7733_v14   ;;  %v7735_v33 = vmul.f32 %v7733_v14, %v10753_v60 }
 0xfc6   :  { %v7736_v27 = vsub.f32 %v7734_v17, %v7735_v33 }
 0xfc8   :  { %7762 = vperm.xlu1 %8531, %v7736_v27  }
0x1043   :  { %v7741_v31 = vpop.permute.xlu0 %7740 }
0x1044   :  { %v7743_v29 = vmul.f32 %v7741_v31, %v10768_v3  ;;  %v7744_v57 = vmul.f32 %v7741_v31, %v10496_v13  ;;  %v7745_v20 = vmul.f32 %v7741_v31, %v10503_v16  ;;  %v7746_v30 = vmul.f32 %v7741_v31, %v10501_v2 }
0x1045   :  { %v7747_v21 = vmul.f32 %v7741_v31, %v10530_v49  ;;  %v7748_v34 = vmul.f32 %v7741_v31, %v10564_v10  ;;  %v7749_v60 = vmul.f32 %v7741_v31, %v10571_v6  ;;  %v7750_v42 = vmul.f32 %v7741_v31, %v10569_v47 }
0x1046   :  { %v7751_v46 = vmul.f32 %v7741_v31, %v10598_v5  ;;  %v7752_v43 = vmul.f32 %v7741_v31, %v10654_v59  ;;  %v7753_v3 = vmul.f32 %v7741_v31, %v10662_v25  ;;  %v7754_v13 = vmul.f32 %v7741_v31, %v10660_v12 }
0x1047   :  { %v7755_v16 = vmul.f32 %v7741_v31, %v10700_v62  ;;  %v7756_v2 = vmul.f32 %v7741_v31, %v10737_v54  ;;  %v7757_v49 = vmul.f32 %v7741_v31, %v10742_v0  ;;  %v7758_v10 = vmul.f32 %v7741_v31, %v10740_v18 }
0x1048   :  { %v7759_v6 = vmul.f32 %v7741_v31, %v10747_v63  ;;  %v10851_v47 = vmul.f32 %v7741_v31, %v10477_v58  ;;  %v10854_v5 = vmul.f32 %v7741_v31, %v10481_v53  ;;  %v10857_v59 = vmul.f32 %v7741_v31, %v10479_v28  ;;  %v10871_v58 = vpop.permute.xlu1 %7762 }
0x1049   :  { %v10860_v12 = vmul.f32 %v7741_v31, %v10515_v38  ;;  %v10863_v25 = vmul.f32 %v7741_v31, %v10545_v32  ;;  %v10866_v62 = vmul.f32 %v7741_v31, %v10549_v45  ;;  %v10869_v54 = vmul.f32 %v7741_v31, %v10547_v52 }
0x104a   :  { %v10874_v53 = vmul.f32 %v7741_v31, %v10583_v24  ;;  %v10877_v28 = vmul.f32 %v7741_v31, %v10623_v15  ;;  %v10880_v38 = vmul.f32 %v7741_v31, %v10630_v9  ;;  %v10883_v32 = vmul.f32 %v7741_v31, %v10628_v37 }
0x104b   :  { %v10886_v45 = vmul.f32 %v7741_v31, %v10682_v44  ;;  %v10889_v52 = vmul.f32 %v7741_v31, %v10718_v22  ;;  %v10892_v18 = vmul.f32 %v7741_v31, %v10724_v8  ;;  %v10895_v24 = vmul.f32 %v7741_v31, %v10722_v1 }
0x104c   :  { %v10898_v15 = vmul.f32 %v7741_v31, %v10714_v48  ;;  %v10901_v9 = vmul.f32 %v7741_v31, %v10751_v51  ;;  %v7765_v37 = vadd.f32 %v10871_v58, %v7743_v29  ;;  %v7766_v44 = vadd.f32 %v10871_v58, %v7744_v57 }
0x104d   :  { %v7767_v0 = vadd.f32 %v10871_v58, %v7745_v20  ;;  %v7768_v22 = vadd.f32 %v10871_v58, %v7746_v30  ;;  %v7769_v8 = vadd.f32 %v10871_v58, %v7747_v21  ;;  %v7770_v63 = vadd.f32 %v10871_v58, %v7748_v34 }
0x104e   :  { %v7771_v1 = vadd.f32 %v10871_v58, %v7749_v60  ;;  %v7772_v48 = vadd.f32 %v10871_v58, %v7750_v42  ;;  %v7773_v7 = vadd.f32 %v10871_v58, %v7751_v46  ;;  %v7774_v51 = vadd.f32 %v10871_v58, %v7752_v43 }
0x104f   :  { %v7775_v39 = vadd.f32 %v10871_v58, %v7753_v3  ;;  %v7776_v61 = vadd.f32 %v10871_v58, %v7754_v13  ;;  %v7777_v50 = vadd.f32 %v10871_v58, %v7755_v16  ;;  %v7778_v19 = vadd.f32 %v10871_v58, %v7756_v2 }
0x1050   :  { %v7779_v36 = vadd.f32 %v10871_v58, %v7757_v49  ;;  %v10919_v35 = vadd.f32 %v10871_v58, %v7758_v10  ;;  %v10922_v40 = vadd.f32 %v10871_v58, %v7759_v6  ;;  %vm7783_vm6 = vcmp.ge.f32.partialorder %v7766_v44, 0.0 }
0x1051   :  { %vm7784_vm7 = vcmp.ge.f32.partialorder %v7767_v0, 0.0  ;;  %vm7785_vm8 = vcmp.ge.f32.partialorder %v7768_v22, 0.0  ;;  %vm7786_vm9 = vcmp.ge.f32.partialorder %v7769_v8, 0.0  ;;  %vm7787_vm10 = vcmp.ge.f32.partialorder %v7770_v63, 0.0 }
0x1052   :  { %vm7788_vm11 = vcmp.ge.f32.partialorder %v7771_v1, 0.0  ;;  %vm7789_vm12 = vcmp.ge.f32.partialorder %v7772_v48, 0.0  ;;  %vm7790_vm13 = vcmp.ge.f32.partialorder %v7773_v7, 0.0  ;;  %vm7791_vm14 = vcmp.ge.f32.partialorder %v7774_v51, 0.0 }
0x1053   :  { %vm7792_vm15 = vcmp.ge.f32.partialorder %v7775_v39, 0.0  ;;  %vm7793_vm0 = vcmp.ge.f32.partialorder %v7776_v61, 0.0  ;;  %vm7794_vm2 = vcmp.ge.f32.partialorder %v7777_v50, 0.0  ;;  %vm7795_vm1 = vcmp.ge.f32.partialorder %v7778_v19, 0.0 }
0x1054   :  { %vm7796_vm3 = vcmp.ge.f32.partialorder %v7779_v36, 0.0  ;;  %vm7797_vm4 = vcmp.ge.f32.partialorder %v10919_v35, 0.0  ;;  %v7800_v11 = vmul.f32 %v10831_v23, %v7765_v37  ;;  %v7801_v56 = vmul.f32 %v10831_v23, %v7766_v44 }
0x1055   :  { %v7802_v55 = vmul.f32 %v10831_v23, %v7767_v0  ;;  %v7803_v26 = vmul.f32 %v10831_v23, %v7768_v22  ;;  %v7804_v41 = vmul.f32 %v10831_v23, %v7769_v8  ;;  %v7805_v4 = vmul.f32 %v10831_v23, %v7770_v63 }
0x1056   :  { %v7806_v14 = vmul.f32 %v10831_v23, %v7771_v1  ;;  %v7807_v17 = vmul.f32 %v10831_v23, %v7772_v48  ;;  %v7808_v33 = vmul.f32 %v10831_v23, %v7773_v7  ;;  %v7809_v27 = vmul.f32 %v10831_v23, %v7774_v51 }
0x1057   :  { %v7810_v31 = vmul.f32 %v10831_v23, %v7775_v39  ;;  %v7811_v29 = vmul.f32 %v10831_v23, %v7776_v61  ;;  %v7812_v57 = vmul.f32 %v10831_v23, %v7777_v50  ;;  %v7813_v20 = vmul.f32 %v10831_v23, %v7778_v19 }
0x1058   :  { %v7814_v30 = vmul.f32 %v10831_v23, %v7779_v36  ;;  %v7815_v21 = vmul.f32 %v10831_v23, %v10919_v35  ;;  %v7816_v34 = vmul.f32 %v10831_v23, %v10922_v40  ;;  %vm11199_vm5 = vcmp.ge.f32.partialorder %v7765_v37, 0.0 }
0x1059   :  { %v7817_v60 = vsel %vm11199_vm5, %v7765_v37, %v7800_v11  ;;  %v7818_v42 = vsel %vm7783_vm6, %v7766_v44, %v7801_v56  ;;  %v7819_v46 = vsel %vm7784_vm7, %v7767_v0, %v7802_v55  ;;  %v7820_v43 = vsel %vm7785_vm8, %v7768_v22, %v7803_v26 }
0x105a   :  { %v7821_v3 = vsel %vm7786_vm9, %v7769_v8, %v7804_v41  ;;  %v7822_v13 = vsel %vm7787_vm10, %v7770_v63, %v7805_v4  ;;  %v7823_v16 = vsel %vm7788_vm11, %v7771_v1, %v7806_v14  ;;  %7834 = vst [vmem:[%s11161_s13] sm:$0xff] %v7817_v60  ;;  %7835 = vst [vmem:[%s11161_s13 + $0x8] sm:$0xff] %v7818_v42  ;;  %vm11200_vm5 = vcmp.ge.f32.partialorder %v10922_v40, 0.0 }
0x105b   :  { %7836 = vst [vmem:[%s11161_s13 + $0x10] sm:$0xff] %v7819_v46  ;;  %v7824_v2 = vsel %vm7789_vm12, %v7772_v48, %v7807_v17  ;;  %v7825_v49 = vsel %vm7790_vm13, %v7773_v7, %v7808_v33  ;;  %v7826_v10 = vsel %vm7791_vm14, %v7774_v51, %v7809_v27  ;;  %v7827_v6 = vsel %vm7792_vm15, %v7775_v39, %v7810_v31 }
0x105c   :  { %7837 = vst [vmem:[%s11161_s13 + $0x18] sm:$0xff] %v7820_v43  ;;  %7838 = vst [vmem:[%s11161_s13 + $0x20] sm:$0xff] %v7821_v3  ;;  %v7828_v37 = vsel %vm7793_vm0, %v7776_v61, %v7811_v29  ;;  %v7829_v44 = vsel %vm7794_vm2, %v7777_v50, %v7812_v57  ;;  %v7830_v0 = vsel %vm7795_vm1, %v7778_v19, %v7813_v20 }
0x105d   :  { %7839 = vst [vmem:[%s11161_s13 + $0x28] sm:$0xff] %v7822_v13  ;;  %7840 = vst [vmem:[%s11161_s13 + $0x30] sm:$0xff] %v7823_v16  ;;  %v7831_v22 = vsel %vm7796_vm3, %v7779_v36, %v7814_v30  ;;  %v7832_v8 = vsel %vm7797_vm4, %v10919_v35, %v7815_v21  ;;  %v7833_v63 = vsel %vm11200_vm5, %v10922_v40, %v7816_v34 }
0x105e   :  { %7841 = vst [vmem:[%s11161_s13 + $0x38] sm:$0xff] %v7824_v2  ;;  %7842 = vst [vmem:[%s11161_s13 + $0x40] sm:$0xff] %v7825_v49  ;;  %v7885_v1 = vadd.f32 %v10851_v47, %v10871_v58  ;;  %v7886_v48 = vadd.f32 %v10854_v5, %v10871_v58  ;;  %v7887_v7 = vadd.f32 %v10857_v59, %v10871_v58 }
0x105f   :  { %7843 = vst [vmem:[%s11161_s13 + $0x48] sm:$0xff] %v7826_v10  ;;  %7844 = vst [vmem:[%s11161_s13 + $0x50] sm:$0xff] %v7827_v6  ;;  %v7888_v51 = vadd.f32 %v10860_v12, %v10871_v58  ;;  %v7889_v47 = vadd.f32 %v10863_v25, %v10871_v58  ;;  %v7890_v5 = vadd.f32 %v10866_v62, %v10871_v58 }
0x1060   :  { %7845 = vst [vmem:[%s11161_s13 + $0x58] sm:$0xff] %v7828_v37  ;;  %7846 = vst [vmem:[%s11161_s13 + $0x60] sm:$0xff] %v7829_v44  ;;  %v7891_v39 = vadd.f32 %v10869_v54, %v10871_v58  ;;  %v7892_v61 = vadd.f32 %v10874_v53, %v10871_v58  ;;  %v7893_v50 = vadd.f32 %v10877_v28, %v10871_v58  ;;  %vm7903_vm7 = vcmp.ge.f32.partialorder %v7886_v48, 0.0 }
0x1061   :  { %7847 = vst [vmem:[%s11161_s13 + $0x68] sm:$0xff] %v7830_v0  ;;  %7848 = vst [vmem:[%s11161_s13 + $0x70] sm:$0xff] %v7831_v22  ;;  %v7894_v59 = vadd.f32 %v10880_v38, %v10871_v58  ;;  %v7895_v12 = vadd.f32 %v10883_v32, %v10871_v58  ;;  %v7896_v25 = vadd.f32 %v10886_v45, %v10871_v58  ;;  %vm7904_vm8 = vcmp.ge.f32.partialorder %v7887_v7, 0.0 }
0x1062   :  { %7849 = vst [vmem:[%s11161_s13 + $0x78] sm:$0xff] %v7832_v8  ;;  %7850 = vst [vmem:[%s11161_s13 + $0x80] sm:$0xff] %v7833_v63  ;;  %v7897_v62 = vadd.f32 %v10889_v52, %v10871_v58  ;;  %v7898_v54 = vadd.f32 %v10892_v18, %v10871_v58  ;;  %v7899_v53 = vadd.f32 %v10895_v24, %v10871_v58  ;;  %vm7905_vm9 = vcmp.ge.f32.partialorder %v7888_v51, 0.0 }
0x1063   :  { %v11049_v28 = vadd.f32 %v10898_v15, %v10871_v58  ;;  %v11053_v38 = vadd.f32 %v10901_v9, %v10871_v58  ;;  %vm7906_vm10 = vcmp.ge.f32.partialorder %v7889_v47, 0.0  ;;  %vm7907_vm11 = vcmp.ge.f32.partialorder %v7890_v5, 0.0 }
0x1064   :  { %vm7908_vm12 = vcmp.ge.f32.partialorder %v7891_v39, 0.0  ;;  %vm7909_vm13 = vcmp.ge.f32.partialorder %v7892_v61, 0.0  ;;  %vm7910_vm14 = vcmp.ge.f32.partialorder %v7893_v50, 0.0  ;;  %vm7911_vm15 = vcmp.ge.f32.partialorder %v7894_v59, 0.0 }
0x1065   :  { %vm7912_vm0 = vcmp.ge.f32.partialorder %v7895_v12, 0.0  ;;  %vm7913_vm2 = vcmp.ge.f32.partialorder %v7896_v25, 0.0  ;;  %vm7914_vm1 = vcmp.ge.f32.partialorder %v7897_v62, 0.0  ;;  %vm7915_vm3 = vcmp.ge.f32.partialorder %v7898_v54, 0.0 }
0x1066   :  { %vm7916_vm4 = vcmp.ge.f32.partialorder %v7899_v53, 0.0  ;;  %vm7917_vm5 = vcmp.ge.f32.partialorder %v11049_v28, 0.0  ;;  %v7919_v58 = vmul.f32 %v7885_v1, %v10831_v23  ;;  %v7920_v32 = vmul.f32 %v7886_v48, %v10831_v23 }
0x1067   :  { %v7921_v45 = vmul.f32 %v7887_v7, %v10831_v23  ;;  %v7922_v52 = vmul.f32 %v7888_v51, %v10831_v23  ;;  %v7923_v18 = vmul.f32 %v7889_v47, %v10831_v23  ;;  %v7924_v24 = vmul.f32 %v7890_v5, %v10831_v23 }
0x1068   :  { %v7925_v15 = vmul.f32 %v7891_v39, %v10831_v23  ;;  %v7926_v9 = vmul.f32 %v7892_v61, %v10831_v23  ;;  %v7927_v19 = vmul.f32 %v7893_v50, %v10831_v23  ;;  %v7928_v36 = vmul.f32 %v7894_v59, %v10831_v23 }
0x1069   :  { %v7929_v35 = vmul.f32 %v7895_v12, %v10831_v23  ;;  %v7930_v40 = vmul.f32 %v7896_v25, %v10831_v23  ;;  %v7931_v11 = vmul.f32 %v7897_v62, %v10831_v23  ;;  %v7932_v56 = vmul.f32 %v7898_v54, %v10831_v23 }
0x106a   :  { %v7933_v55 = vmul.f32 %v7899_v53, %v10831_v23  ;;  %v7934_v26 = vmul.f32 %v11049_v28, %v10831_v23  ;;  %v7935_v41 = vmul.f32 %v11053_v38, %v10831_v23  ;;  %vm11201_vm6 = vcmp.ge.f32.partialorder %v7885_v1, 0.0 }
0x106b   :  { %v7936_v4 = vsel %vm11201_vm6, %v7885_v1, %v7919_v58  ;;  %v7937_v14 = vsel %vm7903_vm7, %v7886_v48, %v7920_v32  ;;  %v7938_v17 = vsel %vm7904_vm8, %v7887_v7, %v7921_v45  ;;  %v7939_v33 = vsel %vm7905_vm9, %v7888_v51, %v7922_v52 }
0x106c   :  { %v7940_v27 = vsel %vm7906_vm10, %v7889_v47, %v7923_v18  ;;  %v7941_v31 = vsel %vm7907_vm11, %v7890_v5, %v7924_v24  ;;  %v7942_v29 = vsel %vm7908_vm12, %v7891_v39, %v7925_v15  ;;  %7953 = vst [vmem:[%s11162_s14] sm:$0xff] %v7936_v4  ;;  %7954 = vst [vmem:[%s11162_s14 + $0x8] sm:$0xff] %v7937_v14  ;;  %vm11202_vm6 = vcmp.ge.f32.partialorder %v11053_v38, 0.0 }
0x106d   :  { %7955 = vst [vmem:[%s11162_s14 + $0x10] sm:$0xff] %v7938_v17  ;;  %v7943_v23 = vsel %vm7909_vm13, %v7892_v61, %v7926_v9  ;;  %v7944_v57 = vsel %vm7910_vm14, %v7893_v50, %v7927_v19  ;;  %v7945_v20 = vsel %vm7911_vm15, %v7894_v59, %v7928_v36  ;;  %v7946_v30 = vsel %vm7912_vm0, %v7895_v12, %v7929_v35 }
0x106e   :  { %7956 = vst [vmem:[%s11162_s14 + $0x18] sm:$0xff] %v7939_v33  ;;  %7957 = vst [vmem:[%s11162_s14 + $0x20] sm:$0xff] %v7940_v27  ;;  %v7947_v21 = vsel %vm7913_vm2, %v7896_v25, %v7930_v40  ;;  %v7948_v34 = vsel %vm7914_vm1, %v7897_v62, %v7931_v11  ;;  %v7949_v60 = vsel %vm7915_vm3, %v7898_v54, %v7932_v56 }
0x106f   :  { %7958 = vst [vmem:[%s11162_s14 + $0x28] sm:$0xff] %v7941_v31  ;;  %7959 = vst [vmem:[%s11162_s14 + $0x30] sm:$0xff] %v7942_v29  ;;  %v7950_v42 = vsel %vm7916_vm4, %v7899_v53, %v7933_v55  ;;  %v7951_v46 = vsel %vm7917_vm5, %v11049_v28, %v7934_v26  ;;  %v7952_v43 = vsel %vm11202_vm6, %v11053_v38, %v7935_v41 }
0x1070   :  { %7960 = vst [vmem:[%s11162_s14 + $0x38] sm:$0xff] %v7943_v23  ;;  %7961 = vst [vmem:[%s11162_s14 + $0x40] sm:$0xff] %v7944_v57 }
0x1071   :  { %7962 = vst [vmem:[%s11162_s14 + $0x48] sm:$0xff] %v7945_v20  ;;  %7963 = vst [vmem:[%s11162_s14 + $0x50] sm:$0xff] %v7946_v30 }
0x1072   :  { %7964 = vst [vmem:[%s11162_s14 + $0x58] sm:$0xff] %v7947_v21  ;;  %7965 = vst [vmem:[%s11162_s14 + $0x60] sm:$0xff] %v7948_v34 }
0x1073   :  { %7966 = vst [vmem:[%s11162_s14 + $0x68] sm:$0xff] %v7949_v60  ;;  %7967 = vst [vmem:[%s11162_s14 + $0x70] sm:$0xff] %v7950_v42 }
0x1074   :  { %7968 = vst [vmem:[%s11162_s14 + $0x78] sm:$0xff] %v7951_v46  ;;  %7969 = vst [vmem:[%s11162_s14 + $0x80] sm:$0xff] %v7952_v43 }
0x1075   :  { %7978 = vsyncpa [#allocation5], 1 }

</bundles_post_ra>
